<compile_context>
chip_gen: v7x
topology: tpu7x:2x2x1
jax: 0.10.0
libtpu: 0.0.40
codegen_flags: <defaults>
</compile_context>

<pallas_src>
import math
import functools

import jax
import jax.numpy as jnp
from jax.experimental import pallas as pl
from jax.experimental.pallas import tpu as pltpu


def encoder_kernel(x_ref,
                   wq_ref, bq_ref, wk_ref, bk_ref, wv_ref, bv_ref,
                   wo_ref, bo_ref,
                   ln1_g_ref, ln1_b_ref,
                   w1_ref, b1_ref, w2_ref, b2_ref,
                   ln2_g_ref, ln2_b_ref,
                   out_ref, *, num_heads):
    f32 = jnp.float32
    bf16 = jnp.bfloat16

    Bt, S, D = x_ref.shape
    R = Bt * S
    H = num_heads
    hd = D // H

    x = x_ref[...].reshape(R, D).astype(f32)        # (R, D), rows = Bt*S
    xb = x.astype(bf16)

    def linear(h_bf16, w_ref, b_ref):
        # bf16 MXU matmul, f32 accumulation, bias added in f32.
        return (jnp.dot(h_bf16, w_ref[...], preferred_element_type=f32)
                + b_ref[...].astype(f32))

    # ---- QKV projections (row-batched over Bt*S) ----------------------------
    scale = 1.0 / math.sqrt(hd)
    q = (linear(xb, wq_ref, bq_ref) * scale).astype(bf16)   # scale folded into q
    k = linear(xb, wk_ref, bk_ref).astype(bf16)
    v = linear(xb, wv_ref, bv_ref).astype(bf16)

    # ---- Multi-head attention: all heads in one batched einsum --------------
    def split_heads(t):                 # (R, D) -> (H*Bt, S, hd)
        return jnp.concatenate(
            [t[:, h * hd:(h + 1) * hd].reshape(Bt, S, hd) for h in range(H)],
            axis=0)

    qs, ks, vs = split_heads(q), split_heads(k), split_heads(v)

    s = jnp.einsum('bqd,bkd->bqk', qs, ks,
                   preferred_element_type=f32)               # (H*Bt, S, S) f32
    s = s - jnp.max(s, axis=-1, keepdims=True)               # stable softmax
    p = jnp.exp(s)
    l = jnp.sum(p, axis=-1, keepdims=True)
    p = p * pl.reciprocal(l, approx=True)
    # attention dropout: identity (eval mode)

    ctx = jnp.einsum('bqk,bkd->bqd', p.astype(bf16), vs,
                     preferred_element_type=f32)             # (H*Bt, S, hd)

    # merge heads back to (R, D)
    ctx = jnp.concatenate(
        [ctx[h * Bt:(h + 1) * Bt].reshape(R, hd) for h in range(H)],
        axis=-1).astype(bf16)

    attn_out = linear(ctx, wo_ref, bo_ref)                   # output projection
    # residual dropout: identity (eval mode)
    h1 = x + attn_out

    # ---- LayerNorm (one-pass stats, biased variance, eps=1e-12) -------------
    def layernorm(h, g_ref, b_ref):
        mu = jnp.mean(h, axis=-1, keepdims=True)
        ms = jnp.mean(h * h, axis=-1, keepdims=True)
        inv = jax.lax.rsqrt(ms - mu * mu + 1e-12)
        return (h - mu) * inv * g_ref[...].astype(f32) + b_ref[...].astype(f32)

    h1 = layernorm(h1, ln1_g_ref, ln1_b_ref)

    # ---- MLP: Linear -> GELU(exact erf) -> Linear ----------------------------
    ff = linear(h1.astype(bf16), w1_ref, b1_ref)
    ff = 0.5 * ff * (1.0 + jax.lax.erf(ff * (1.0 / math.sqrt(2.0))))
    ff = linear(ff.astype(bf16), w2_ref, b2_ref)
    # MLP dropout: identity (eval mode)

    out = layernorm(h1 + ff, ln2_g_ref, ln2_b_ref)
    out_ref[...] = out.reshape(Bt, S, D).astype(out_ref.dtype)


def _choose_batch_tile(B, S, row_target=128, row_cap=512):
    """Largest divisor of B keeping Bt*S <= row_cap; prefer >=2 grid steps
    (megacore) when the row tile would stay >= row_target."""
    divs = [d for d in range(1, B + 1) if B % d == 0]
    fits = [d for d in divs if d * S <= row_cap]
    bt = max(fits) if fits else 1
    if B // bt < 2:
        for d in sorted(divs, reverse=True):
            if d < bt and d * S >= row_target:
                bt = d
                break
    return bt


def encoder_forward(x, params, batch_tile=None):
    B, S, D = x.shape
    H = params["num_heads"]
    assert D % H == 0, "dim must be divisible by num_heads"

    Bt = batch_tile if batch_tile is not None else _choose_batch_tile(B, S)
    assert B % Bt == 0

    bf16, f32 = jnp.bfloat16, jnp.float32
    # Matmul weights shipped as bf16 (MXU-native, half the DMA/VMEM bytes);
    # biases and LayerNorm params stay f32 (consumed in the f32 epilogue math).
    weight_args = [
        params["wq"].astype(bf16), params["bq"].astype(f32),
        params["wk"].astype(bf16), params["bk"].astype(f32),
        params["wv"].astype(bf16), params["bv"].astype(f32),
        params["wo"].astype(bf16), params["bo"].astype(f32),
        params["ln1_g"].astype(f32), params["ln1_b"].astype(f32),
        params["w1"].astype(bf16), params["b1"].astype(f32),
        params["w2"].astype(bf16), params["b2"].astype(f32),
        params["ln2_g"].astype(f32), params["ln2_b"].astype(f32),
    ]

    def w_spec(a):
        # Whole weight resident per grid step, constant index_map.
        nd = a.ndim
        return pl.BlockSpec(a.shape, lambda i, _nd=nd: (0,) * _nd)

    in_specs = [pl.BlockSpec((Bt, S, D), lambda i: (i, 0, 0))] + \
               [w_spec(a) for a in weight_args]
    out_spec = pl.BlockSpec((Bt, S, D), lambda i: (i, 0, 0))

    kernel = functools.partial(encoder_kernel, num_heads=H)
    return pl.pallas_call(
        kernel,
        out_shape=jax.ShapeDtypeStruct((B, S, D), x.dtype),
        grid_spec=pltpu.PrefetchScalarGridSpec(
            num_scalar_prefetch=0,
            grid=(B // Bt,),
            in_specs=in_specs,
            out_specs=out_spec,
        ),
        compiler_params=pltpu.CompilerParams(
            dimension_semantics=("parallel",),
            vmem_limit_bytes=32 * 1024 * 1024,
        ),
    )(x, *weight_args)


def encoder_reference(x, params):
    """Pure-JAX f32 reference matching the PyTorch forward (eval mode)."""
    B, S, D = x.shape
    H = params["num_heads"]
    hd = D // H

    def lin(h, w, b):
        return h @ w + b

    q = lin(x, params["wq"], params["bq"]).reshape(B, S, H, hd).transpose(0, 2, 1, 3)
    k = lin(x, params["wk"], params["bk"]).reshape(B, S, H, hd).transpose(0, 2, 1, 3)
    v = lin(x, params["wv"], params["bv"]).reshape(B, S, H, hd).transpose(0, 2, 1, 3)

    s = jnp.einsum('bhqd,bhkd->bhqk', q, k) / math.sqrt(hd)
    p = jax.nn.softmax(s, axis=-1)
    ctx = jnp.einsum('bhqk,bhkd->bhqd', p, v)
    ctx = ctx.transpose(0, 2, 1, 3).reshape(B, S, D)
    attn = lin(ctx, params["wo"], params["bo"])

    def layernorm(h, g, b):
        mu = jnp.mean(h, axis=-1, keepdims=True)
        var = jnp.mean((h - mu) ** 2, axis=-1, keepdims=True)
        return (h - mu) / jnp.sqrt(var + 1e-12) * g + b

    h1 = layernorm(x + attn, params["ln1_g"], params["ln1_b"])
    ff = lin(h1, params["w1"], params["b1"])
    ff = 0.5 * ff * (1.0 + jax.lax.erf(ff / math.sqrt(2.0)))
    ff = lin(ff, params["w2"], params["b2"])
    return layernorm(h1 + ff, params["ln2_g"], params["ln2_b"])


def init_params(key, dim, hidden_dim, num_heads):
    """Deterministic synthetic init (PyTorch-like uniform(-1/sqrt(fan_in), ...))."""
    keys = jax.random.split(key, 12)

    def lin(kw, kb, fan_in, fan_out):
        lim = 1.0 / math.sqrt(fan_in)
        w = jax.random.uniform(kw, (fan_in, fan_out), jnp.float32, -lim, lim)
        b = jax.random.uniform(kb, (1, fan_out), jnp.float32, -lim, lim)
        return w, b

    wq, bq = lin(keys[0], keys[1], dim, dim)
    wk, bk = lin(keys[2], keys[3], dim, dim)
    wv, bv = lin(keys[4], keys[5], dim, dim)
    wo, bo = lin(keys[6], keys[7], dim, dim)
    w1, b1 = lin(keys[8], keys[9], dim, hidden_dim)
    w2, b2 = lin(keys[10], keys[11], hidden_dim, dim)

    return {
        "num_heads": num_heads,
        "wq": wq, "bq": bq, "wk": wk, "bk": bk, "wv": wv, "bv": bv,
        "wo": wo, "bo": bo,
        "ln1_g": jnp.ones((1, dim), jnp.float32),
        "ln1_b": jnp.zeros((1, dim), jnp.float32),
        "w1": w1, "b1": b1, "w2": w2, "b2": b2,
        "ln2_g": jnp.ones((1, dim), jnp.float32),
        "ln2_b": jnp.zeros((1, dim), jnp.float32),
    }


if __name__ == "__main__":
    # Small shapes consistent with the module: dim divisible by num_heads=16.
    B, S, D, H, HID = 2, 8, 128, 16, 256
    key = jax.random.PRNGKey(0)
    kx, kp = jax.random.split(key)
    x = jax.random.normal(kx, (B, S, D), jnp.float32)
    params = init_params(kp, D, HID, H)

    out = encoder_forward(x, params)
    out = jax.block_until_ready(out)
    assert out.shape == (B, S, D) and out.dtype == jnp.float32
    assert bool(jnp.isfinite(out).all())

    ref = encoder_reference(x, params)
    err = float(jnp.max(jnp.abs(out - ref)))
    assert err < 6e-2, f"kernel vs reference mismatch: max abs err = {err}"
    print("KERNEL_OK")
</pallas_src>

<mosaic_0001>
module attributes {stable_mosaic.version = 11 : i64} {
  func.func @encoder_kernel(%arg0: i32, %arg1: memref<2x8x128xf32, #tpu.memory_space<vmem>>, %arg2: memref<128x128xbf16, #tpu.memory_space<vmem>>, %arg3: memref<1x128xf32, #tpu.memory_space<vmem>>, %arg4: memref<128x128xbf16, #tpu.memory_space<vmem>>, %arg5: memref<1x128xf32, #tpu.memory_space<vmem>>, %arg6: memref<128x128xbf16, #tpu.memory_space<vmem>>, %arg7: memref<1x128xf32, #tpu.memory_space<vmem>>, %arg8: memref<128x128xbf16, #tpu.memory_space<vmem>>, %arg9: memref<1x128xf32, #tpu.memory_space<vmem>>, %arg10: memref<1x128xf32, #tpu.memory_space<vmem>>, %arg11: memref<1x128xf32, #tpu.memory_space<vmem>>, %arg12: memref<128x256xbf16, #tpu.memory_space<vmem>>, %arg13: memref<1x256xf32, #tpu.memory_space<vmem>>, %arg14: memref<256x128xbf16, #tpu.memory_space<vmem>>, %arg15: memref<1x128xf32, #tpu.memory_space<vmem>>, %arg16: memref<1x128xf32, #tpu.memory_space<vmem>>, %arg17: memref<1x128xf32, #tpu.memory_space<vmem>>, %arg18: memref<2x8x128xf32, #tpu.memory_space<vmem>>) attributes {dimension_semantics = [#tpu.dimension_semantics<parallel>], iteration_bounds = array<i64: 1>, scalar_prefetch = 0 : i64, scratch_operands = 0 : i64, tpu.core_type = #tpu.core_type<tc>, window_params = [{transform_indices = @transform_0, window_bounds = array<i64: 2, 8, 128>}, {pipeline_mode = #tpu.pipeline_mode<synchronous>, transform_indices = @transform_1, window_bounds = array<i64: 128, 128>}, {pipeline_mode = #tpu.pipeline_mode<synchronous>, transform_indices = @transform_2, window_bounds = array<i64: 1, 128>}, {pipeline_mode = #tpu.pipeline_mode<synchronous>, transform_indices = @transform_3, window_bounds = array<i64: 128, 128>}, {pipeline_mode = #tpu.pipeline_mode<synchronous>, transform_indices = @transform_4, window_bounds = array<i64: 1, 128>}, {pipeline_mode = #tpu.pipeline_mode<synchronous>, transform_indices = @transform_5, window_bounds = array<i64: 128, 128>}, {pipeline_mode = #tpu.pipeline_mode<synchronous>, transform_indices = @transform_6, window_bounds = array<i64: 1, 128>}, {pipeline_mode = #tpu.pipeline_mode<synchronous>, transform_indices = @transform_7, window_bounds = array<i64: 128, 128>}, {pipeline_mode = #tpu.pipeline_mode<synchronous>, transform_indices = @transform_8, window_bounds = array<i64: 1, 128>}, {pipeline_mode = #tpu.pipeline_mode<synchronous>, transform_indices = @transform_9, window_bounds = array<i64: 1, 128>}, {pipeline_mode = #tpu.pipeline_mode<synchronous>, transform_indices = @transform_10, window_bounds = array<i64: 1, 128>}, {pipeline_mode = #tpu.pipeline_mode<synchronous>, transform_indices = @transform_11, window_bounds = array<i64: 128, 256>}, {pipeline_mode = #tpu.pipeline_mode<synchronous>, transform_indices = @transform_12, window_bounds = array<i64: 1, 256>}, {pipeline_mode = #tpu.pipeline_mode<synchronous>, transform_indices = @transform_13, window_bounds = array<i64: 256, 128>}, {pipeline_mode = #tpu.pipeline_mode<synchronous>, transform_indices = @transform_14, window_bounds = array<i64: 1, 128>}, {pipeline_mode = #tpu.pipeline_mode<synchronous>, transform_indices = @transform_15, window_bounds = array<i64: 1, 128>}, {pipeline_mode = #tpu.pipeline_mode<synchronous>, transform_indices = @transform_16, window_bounds = array<i64: 1, 128>}, {transform_indices = @transform_17, window_bounds = array<i64: 2, 8, 128>}]} {
    %c0 = arith.constant 0 : index
    %c0_0 = arith.constant 0 : index
    %c0_1 = arith.constant 0 : index
    %0 = vector.load %arg1[%c0, %c0_0, %c0_1] : memref<2x8x128xf32, #tpu.memory_space<vmem>>, vector<2x8x128xf32>
    %1 = vector.shape_cast %0 : vector<2x8x128xf32> to vector<16x128xf32>
    %2 = arith.truncf %1 : vector<16x128xf32> to vector<16x128xbf16>
    %c0_2 = arith.constant 0 : index
    %c0_3 = arith.constant 0 : index
    %3 = vector.load %arg2[%c0_2, %c0_3] : memref<128x128xbf16, #tpu.memory_space<vmem>>, vector<128x128xbf16>
    %cst = arith.constant dense<0.000000e+00> : vector<16x128xf32>
    %4 = tpu.matmul %2, %3, %cst {dimension_numbers = #tpu.dot_dimension_numbers<[1], [0], [0], [1], [0, 0, 1, 1], [], []>} : vector<16x128xbf16>, vector<128x128xbf16>, vector<16x128xf32> -> vector<16x128xf32>
    %c0_4 = arith.constant 0 : index
    %c0_5 = arith.constant 0 : index
    %5 = vector.load %arg3[%c0_4, %c0_5] : memref<1x128xf32, #tpu.memory_space<vmem>>, vector<1x128xf32>
    %6 = vector.broadcast %5 : vector<1x128xf32> to vector<16x128xf32>
    %7 = arith.addf %4, %6 : vector<16x128xf32>
    %cst_6 = arith.constant 0.353553385 : f32
    %8 = vector.broadcast %cst_6 : f32 to vector<16x128xf32>
    %9 = arith.mulf %7, %8 : vector<16x128xf32>
    %10 = arith.truncf %9 : vector<16x128xf32> to vector<16x128xbf16>
    %c0_7 = arith.constant 0 : index
    %c0_8 = arith.constant 0 : index
    %11 = vector.load %arg4[%c0_7, %c0_8] : memref<128x128xbf16, #tpu.memory_space<vmem>>, vector<128x128xbf16>
    %cst_9 = arith.constant dense<0.000000e+00> : vector<16x128xf32>
    %12 = tpu.matmul %2, %11, %cst_9 {dimension_numbers = #tpu.dot_dimension_numbers<[1], [0], [0], [1], [0, 0, 1, 1], [], []>} : vector<16x128xbf16>, vector<128x128xbf16>, vector<16x128xf32> -> vector<16x128xf32>
    %c0_10 = arith.constant 0 : index
    %c0_11 = arith.constant 0 : index
    %13 = vector.load %arg5[%c0_10, %c0_11] : memref<1x128xf32, #tpu.memory_space<vmem>>, vector<1x128xf32>
    %14 = vector.broadcast %13 : vector<1x128xf32> to vector<16x128xf32>
    %15 = arith.addf %12, %14 : vector<16x128xf32>
    %16 = arith.truncf %15 : vector<16x128xf32> to vector<16x128xbf16>
    %c0_12 = arith.constant 0 : index
    %c0_13 = arith.constant 0 : index
    %17 = vector.load %arg6[%c0_12, %c0_13] : memref<128x128xbf16, #tpu.memory_space<vmem>>, vector<128x128xbf16>
    %cst_14 = arith.constant dense<0.000000e+00> : vector<16x128xf32>
    %18 = tpu.matmul %2, %17, %cst_14 {dimension_numbers = #tpu.dot_dimension_numbers<[1], [0], [0], [1], [0, 0, 1, 1], [], []>} : vector<16x128xbf16>, vector<128x128xbf16>, vector<16x128xf32> -> vector<16x128xf32>
    %c0_15 = arith.constant 0 : index
    %c0_16 = arith.constant 0 : index
    %19 = vector.load %arg7[%c0_15, %c0_16] : memref<1x128xf32, #tpu.memory_space<vmem>>, vector<1x128xf32>
    %20 = vector.broadcast %19 : vector<1x128xf32> to vector<16x128xf32>
    %21 = arith.addf %18, %20 : vector<16x128xf32>
    %22 = arith.truncf %21 : vector<16x128xf32> to vector<16x128xbf16>
    %23 = vector.extract_strided_slice %10 {offsets = [0, 0], sizes = [16, 8], strides = [1, 1]} : vector<16x128xbf16> to vector<16x8xbf16>
    %24 = vector.shape_cast %23 : vector<16x8xbf16> to vector<2x8x8xbf16>
    %25 = vector.extract_strided_slice %10 {offsets = [0, 8], sizes = [16, 8], strides = [1, 1]} : vector<16x128xbf16> to vector<16x8xbf16>
    %26 = vector.shape_cast %25 : vector<16x8xbf16> to vector<2x8x8xbf16>
    %27 = vector.extract_strided_slice %10 {offsets = [0, 16], sizes = [16, 8], strides = [1, 1]} : vector<16x128xbf16> to vector<16x8xbf16>
    %28 = vector.shape_cast %27 : vector<16x8xbf16> to vector<2x8x8xbf16>
    %29 = vector.extract_strided_slice %10 {offsets = [0, 24], sizes = [16, 8], strides = [1, 1]} : vector<16x128xbf16> to vector<16x8xbf16>
    %30 = vector.shape_cast %29 : vector<16x8xbf16> to vector<2x8x8xbf16>
    %31 = vector.extract_strided_slice %10 {offsets = [0, 32], sizes = [16, 8], strides = [1, 1]} : vector<16x128xbf16> to vector<16x8xbf16>
    %32 = vector.shape_cast %31 : vector<16x8xbf16> to vector<2x8x8xbf16>
    %33 = vector.extract_strided_slice %10 {offsets = [0, 40], sizes = [16, 8], strides = [1, 1]} : vector<16x128xbf16> to vector<16x8xbf16>
    %34 = vector.shape_cast %33 : vector<16x8xbf16> to vector<2x8x8xbf16>
    %35 = vector.extract_strided_slice %10 {offsets = [0, 48], sizes = [16, 8], strides = [1, 1]} : vector<16x128xbf16> to vector<16x8xbf16>
    %36 = vector.shape_cast %35 : vector<16x8xbf16> to vector<2x8x8xbf16>
    %37 = vector.extract_strided_slice %10 {offsets = [0, 56], sizes = [16, 8], strides = [1, 1]} : vector<16x128xbf16> to vector<16x8xbf16>
    %38 = vector.shape_cast %37 : vector<16x8xbf16> to vector<2x8x8xbf16>
    %39 = vector.extract_strided_slice %10 {offsets = [0, 64], sizes = [16, 8], strides = [1, 1]} : vector<16x128xbf16> to vector<16x8xbf16>
    %40 = vector.shape_cast %39 : vector<16x8xbf16> to vector<2x8x8xbf16>
    %41 = vector.extract_strided_slice %10 {offsets = [0, 72], sizes = [16, 8], strides = [1, 1]} : vector<16x128xbf16> to vector<16x8xbf16>
    %42 = vector.shape_cast %41 : vector<16x8xbf16> to vector<2x8x8xbf16>
    %43 = vector.extract_strided_slice %10 {offsets = [0, 80], sizes = [16, 8], strides = [1, 1]} : vector<16x128xbf16> to vector<16x8xbf16>
    %44 = vector.shape_cast %43 : vector<16x8xbf16> to vector<2x8x8xbf16>
    %45 = vector.extract_strided_slice %10 {offsets = [0, 88], sizes = [16, 8], strides = [1, 1]} : vector<16x128xbf16> to vector<16x8xbf16>
    %46 = vector.shape_cast %45 : vector<16x8xbf16> to vector<2x8x8xbf16>
    %47 = vector.extract_strided_slice %10 {offsets = [0, 96], sizes = [16, 8], strides = [1, 1]} : vector<16x128xbf16> to vector<16x8xbf16>
    %48 = vector.shape_cast %47 : vector<16x8xbf16> to vector<2x8x8xbf16>
    %49 = vector.extract_strided_slice %10 {offsets = [0, 104], sizes = [16, 8], strides = [1, 1]} : vector<16x128xbf16> to vector<16x8xbf16>
    %50 = vector.shape_cast %49 : vector<16x8xbf16> to vector<2x8x8xbf16>
    %51 = vector.extract_strided_slice %10 {offsets = [0, 112], sizes = [16, 8], strides = [1, 1]} : vector<16x128xbf16> to vector<16x8xbf16>
    %52 = vector.shape_cast %51 : vector<16x8xbf16> to vector<2x8x8xbf16>
    %53 = vector.extract_strided_slice %10 {offsets = [0, 120], sizes = [16, 8], strides = [1, 1]} : vector<16x128xbf16> to vector<16x8xbf16>
    %54 = vector.shape_cast %53 : vector<16x8xbf16> to vector<2x8x8xbf16>
    %55 = tpu.concatenate %24, %26, %28, %30, %32, %34, %36, %38, %40, %42, %44, %46, %48, %50, %52, %54 in 0 : vector<2x8x8xbf16>, vector<2x8x8xbf16>, vector<2x8x8xbf16>, vector<2x8x8xbf16>, vector<2x8x8xbf16>, vector<2x8x8xbf16>, vector<2x8x8xbf16>, vector<2x8x8xbf16>, vector<2x8x8xbf16>, vector<2x8x8xbf16>, vector<2x8x8xbf16>, vector<2x8x8xbf16>, vector<2x8x8xbf16>, vector<2x8x8xbf16>, vector<2x8x8xbf16>, vector<2x8x8xbf16> -> vector<32x8x8xbf16>
    %56 = vector.extract_strided_slice %16 {offsets = [0, 0], sizes = [16, 8], strides = [1, 1]} : vector<16x128xbf16> to vector<16x8xbf16>
    %57 = vector.shape_cast %56 : vector<16x8xbf16> to vector<2x8x8xbf16>
    %58 = vector.extract_strided_slice %16 {offsets = [0, 8], sizes = [16, 8], strides = [1, 1]} : vector<16x128xbf16> to vector<16x8xbf16>
    %59 = vector.shape_cast %58 : vector<16x8xbf16> to vector<2x8x8xbf16>
    %60 = vector.extract_strided_slice %16 {offsets = [0, 16], sizes = [16, 8], strides = [1, 1]} : vector<16x128xbf16> to vector<16x8xbf16>
    %61 = vector.shape_cast %60 : vector<16x8xbf16> to vector<2x8x8xbf16>
    %62 = vector.extract_strided_slice %16 {offsets = [0, 24], sizes = [16, 8], strides = [1, 1]} : vector<16x128xbf16> to vector<16x8xbf16>
    %63 = vector.shape_cast %62 : vector<16x8xbf16> to vector<2x8x8xbf16>
    %64 = vector.extract_strided_slice %16 {offsets = [0, 32], sizes = [16, 8], strides = [1, 1]} : vector<16x128xbf16> to vector<16x8xbf16>
    %65 = vector.shape_cast %64 : vector<16x8xbf16> to vector<2x8x8xbf16>
    %66 = vector.extract_strided_slice %16 {offsets = [0, 40], sizes = [16, 8], strides = [1, 1]} : vector<16x128xbf16> to vector<16x8xbf16>
    %67 = vector.shape_cast %66 : vector<16x8xbf16> to vector<2x8x8xbf16>
    %68 = vector.extract_strided_slice %16 {offsets = [0, 48], sizes = [16, 8], strides = [1, 1]} : vector<16x128xbf16> to vector<16x8xbf16>
    %69 = vector.shape_cast %68 : vector<16x8xbf16> to vector<2x8x8xbf16>
    %70 = vector.extract_strided_slice %16 {offsets = [0, 56], sizes = [16, 8], strides = [1, 1]} : vector<16x128xbf16> to vector<16x8xbf16>
    %71 = vector.shape_cast %70 : vector<16x8xbf16> to vector<2x8x8xbf16>
    %72 = vector.extract_strided_slice %16 {offsets = [0, 64], sizes = [16, 8], strides = [1, 1]} : vector<16x128xbf16> to vector<16x8xbf16>
    %73 = vector.shape_cast %72 : vector<16x8xbf16> to vector<2x8x8xbf16>
    %74 = vector.extract_strided_slice %16 {offsets = [0, 72], sizes = [16, 8], strides = [1, 1]} : vector<16x128xbf16> to vector<16x8xbf16>
    %75 = vector.shape_cast %74 : vector<16x8xbf16> to vector<2x8x8xbf16>
    %76 = vector.extract_strided_slice %16 {offsets = [0, 80], sizes = [16, 8], strides = [1, 1]} : vector<16x128xbf16> to vector<16x8xbf16>
    %77 = vector.shape_cast %76 : vector<16x8xbf16> to vector<2x8x8xbf16>
    %78 = vector.extract_strided_slice %16 {offsets = [0, 88], sizes = [16, 8], strides = [1, 1]} : vector<16x128xbf16> to vector<16x8xbf16>
    %79 = vector.shape_cast %78 : vector<16x8xbf16> to vector<2x8x8xbf16>
    %80 = vector.extract_strided_slice %16 {offsets = [0, 96], sizes = [16, 8], strides = [1, 1]} : vector<16x128xbf16> to vector<16x8xbf16>
    %81 = vector.shape_cast %80 : vector<16x8xbf16> to vector<2x8x8xbf16>
    %82 = vector.extract_strided_slice %16 {offsets = [0, 104], sizes = [16, 8], strides = [1, 1]} : vector<16x128xbf16> to vector<16x8xbf16>
    %83 = vector.shape_cast %82 : vector<16x8xbf16> to vector<2x8x8xbf16>
    %84 = vector.extract_strided_slice %16 {offsets = [0, 112], sizes = [16, 8], strides = [1, 1]} : vector<16x128xbf16> to vector<16x8xbf16>
    %85 = vector.shape_cast %84 : vector<16x8xbf16> to vector<2x8x8xbf16>
    %86 = vector.extract_strided_slice %16 {offsets = [0, 120], sizes = [16, 8], strides = [1, 1]} : vector<16x128xbf16> to vector<16x8xbf16>
    %87 = vector.shape_cast %86 : vector<16x8xbf16> to vector<2x8x8xbf16>
    %88 = tpu.concatenate %57, %59, %61, %63, %65, %67, %69, %71, %73, %75, %77, %79, %81, %83, %85, %87 in 0 : vector<2x8x8xbf16>, vector<2x8x8xbf16>, vector<2x8x8xbf16>, vector<2x8x8xbf16>, vector<2x8x8xbf16>, vector<2x8x8xbf16>, vector<2x8x8xbf16>, vector<2x8x8xbf16>, vector<2x8x8xbf16>, vector<2x8x8xbf16>, vector<2x8x8xbf16>, vector<2x8x8xbf16>, vector<2x8x8xbf16>, vector<2x8x8xbf16>, vector<2x8x8xbf16>, vector<2x8x8xbf16> -> vector<32x8x8xbf16>
    %89 = vector.extract_strided_slice %22 {offsets = [0, 0], sizes = [16, 8], strides = [1, 1]} : vector<16x128xbf16> to vector<16x8xbf16>
    %90 = vector.shape_cast %89 : vector<16x8xbf16> to vector<2x8x8xbf16>
    %91 = vector.extract_strided_slice %22 {offsets = [0, 8], sizes = [16, 8], strides = [1, 1]} : vector<16x128xbf16> to vector<16x8xbf16>
    %92 = vector.shape_cast %91 : vector<16x8xbf16> to vector<2x8x8xbf16>
    %93 = vector.extract_strided_slice %22 {offsets = [0, 16], sizes = [16, 8], strides = [1, 1]} : vector<16x128xbf16> to vector<16x8xbf16>
    %94 = vector.shape_cast %93 : vector<16x8xbf16> to vector<2x8x8xbf16>
    %95 = vector.extract_strided_slice %22 {offsets = [0, 24], sizes = [16, 8], strides = [1, 1]} : vector<16x128xbf16> to vector<16x8xbf16>
    %96 = vector.shape_cast %95 : vector<16x8xbf16> to vector<2x8x8xbf16>
    %97 = vector.extract_strided_slice %22 {offsets = [0, 32], sizes = [16, 8], strides = [1, 1]} : vector<16x128xbf16> to vector<16x8xbf16>
    %98 = vector.shape_cast %97 : vector<16x8xbf16> to vector<2x8x8xbf16>
    %99 = vector.extract_strided_slice %22 {offsets = [0, 40], sizes = [16, 8], strides = [1, 1]} : vector<16x128xbf16> to vector<16x8xbf16>
    %100 = vector.shape_cast %99 : vector<16x8xbf16> to vector<2x8x8xbf16>
    %101 = vector.extract_strided_slice %22 {offsets = [0, 48], sizes = [16, 8], strides = [1, 1]} : vector<16x128xbf16> to vector<16x8xbf16>
    %102 = vector.shape_cast %101 : vector<16x8xbf16> to vector<2x8x8xbf16>
    %103 = vector.extract_strided_slice %22 {offsets = [0, 56], sizes = [16, 8], strides = [1, 1]} : vector<16x128xbf16> to vector<16x8xbf16>
    %104 = vector.shape_cast %103 : vector<16x8xbf16> to vector<2x8x8xbf16>
    %105 = vector.extract_strided_slice %22 {offsets = [0, 64], sizes = [16, 8], strides = [1, 1]} : vector<16x128xbf16> to vector<16x8xbf16>
    %106 = vector.shape_cast %105 : vector<16x8xbf16> to vector<2x8x8xbf16>
    %107 = vector.extract_strided_slice %22 {offsets = [0, 72], sizes = [16, 8], strides = [1, 1]} : vector<16x128xbf16> to vector<16x8xbf16>
    %108 = vector.shape_cast %107 : vector<16x8xbf16> to vector<2x8x8xbf16>
    %109 = vector.extract_strided_slice %22 {offsets = [0, 80], sizes = [16, 8], strides = [1, 1]} : vector<16x128xbf16> to vector<16x8xbf16>
    %110 = vector.shape_cast %109 : vector<16x8xbf16> to vector<2x8x8xbf16>
    %111 = vector.extract_strided_slice %22 {offsets = [0, 88], sizes = [16, 8], strides = [1, 1]} : vector<16x128xbf16> to vector<16x8xbf16>
    %112 = vector.shape_cast %111 : vector<16x8xbf16> to vector<2x8x8xbf16>
    %113 = vector.extract_strided_slice %22 {offsets = [0, 96], sizes = [16, 8], strides = [1, 1]} : vector<16x128xbf16> to vector<16x8xbf16>
    %114 = vector.shape_cast %113 : vector<16x8xbf16> to vector<2x8x8xbf16>
    %115 = vector.extract_strided_slice %22 {offsets = [0, 104], sizes = [16, 8], strides = [1, 1]} : vector<16x128xbf16> to vector<16x8xbf16>
    %116 = vector.shape_cast %115 : vector<16x8xbf16> to vector<2x8x8xbf16>
    %117 = vector.extract_strided_slice %22 {offsets = [0, 112], sizes = [16, 8], strides = [1, 1]} : vector<16x128xbf16> to vector<16x8xbf16>
    %118 = vector.shape_cast %117 : vector<16x8xbf16> to vector<2x8x8xbf16>
    %119 = vector.extract_strided_slice %22 {offsets = [0, 120], sizes = [16, 8], strides = [1, 1]} : vector<16x128xbf16> to vector<16x8xbf16>
    %120 = vector.shape_cast %119 : vector<16x8xbf16> to vector<2x8x8xbf16>
    %121 = tpu.concatenate %90, %92, %94, %96, %98, %100, %102, %104, %106, %108, %110, %112, %114, %116, %118, %120 in 0 : vector<2x8x8xbf16>, vector<2x8x8xbf16>, vector<2x8x8xbf16>, vector<2x8x8xbf16>, vector<2x8x8xbf16>, vector<2x8x8xbf16>, vector<2x8x8xbf16>, vector<2x8x8xbf16>, vector<2x8x8xbf16>, vector<2x8x8xbf16>, vector<2x8x8xbf16>, vector<2x8x8xbf16>, vector<2x8x8xbf16>, vector<2x8x8xbf16>, vector<2x8x8xbf16>, vector<2x8x8xbf16> -> vector<32x8x8xbf16>
    "tpu.trace_start"() <{level = 10 : i32, message = "bqd,bkd->bqk"}> : () -> ()
    %cst_17 = arith.constant dense<0.000000e+00> : vector<32x8x8xf32>
    %122 = tpu.matmul %55, %88, %cst_17 {dimension_numbers = #tpu.dot_dimension_numbers<[2], [2], [1], [1], [0, 0, 0, 1, 1, 1], [0], [0]>} : vector<32x8x8xbf16>, vector<32x8x8xbf16>, vector<32x8x8xf32> -> vector<32x8x8xf32>
    "tpu.trace_stop"() : () -> ()
    %cst_18 = arith.constant dense<0xFF800000> : vector<32x8xf32>
    %123 = vector.multi_reduction <maximumf>, %122, %cst_18 [2] : vector<32x8x8xf32> to vector<32x8xf32>
    %124 = vector.shape_cast %123 : vector<32x8xf32> to vector<32x8x1xf32>
    %125 = vector.broadcast %124 : vector<32x8x1xf32> to vector<32x8x8xf32>
    %126 = arith.subf %122, %125 : vector<32x8x8xf32>
    %127 = math.exp %126 : vector<32x8x8xf32>
    %cst_19 = arith.constant dense<0.000000e+00> : vector<32x8xf32>
    %128 = vector.multi_reduction <add>, %127, %cst_19 [2] : vector<32x8x8xf32> to vector<32x8xf32>
    %129 = vector.shape_cast %128 : vector<32x8xf32> to vector<32x8x1xf32>
    %130 = tpu.reciprocal %129 {approx = true} : vector<32x8x1xf32> -> vector<32x8x1xf32>
    %131 = vector.broadcast %130 : vector<32x8x1xf32> to vector<32x8x8xf32>
    %132 = arith.mulf %127, %131 : vector<32x8x8xf32>
    %133 = arith.truncf %132 : vector<32x8x8xf32> to vector<32x8x8xbf16>
    "tpu.trace_start"() <{level = 10 : i32, message = "bqk,bkd->bqd"}> : () -> ()
    %cst_20 = arith.constant dense<0.000000e+00> : vector<32x8x8xf32>
    %134 = tpu.matmul %133, %121, %cst_20 {dimension_numbers = #tpu.dot_dimension_numbers<[2], [1], [1], [2], [0, 0, 0, 1, 1, 2], [0], [0]>} : vector<32x8x8xbf16>, vector<32x8x8xbf16>, vector<32x8x8xf32> -> vector<32x8x8xf32>
    "tpu.trace_stop"() : () -> ()
    %135 = vector.extract_strided_slice %134 {offsets = [0, 0, 0], sizes = [2, 8, 8], strides = [1, 1, 1]} : vector<32x8x8xf32> to vector<2x8x8xf32>
    %136 = vector.shape_cast %135 : vector<2x8x8xf32> to vector<16x8xf32>
    %137 = vector.extract_strided_slice %134 {offsets = [2, 0, 0], sizes = [2, 8, 8], strides = [1, 1, 1]} : vector<32x8x8xf32> to vector<2x8x8xf32>
    %138 = vector.shape_cast %137 : vector<2x8x8xf32> to vector<16x8xf32>
    %139 = vector.extract_strided_slice %134 {offsets = [4, 0, 0], sizes = [2, 8, 8], strides = [1, 1, 1]} : vector<32x8x8xf32> to vector<2x8x8xf32>
    %140 = vector.shape_cast %139 : vector<2x8x8xf32> to vector<16x8xf32>
    %141 = vector.extract_strided_slice %134 {offsets = [6, 0, 0], sizes = [2, 8, 8], strides = [1, 1, 1]} : vector<32x8x8xf32> to vector<2x8x8xf32>
    %142 = vector.shape_cast %141 : vector<2x8x8xf32> to vector<16x8xf32>
    %143 = vector.extract_strided_slice %134 {offsets = [8, 0, 0], sizes = [2, 8, 8], strides = [1, 1, 1]} : vector<32x8x8xf32> to vector<2x8x8xf32>
    %144 = vector.shape_cast %143 : vector<2x8x8xf32> to vector<16x8xf32>
    %145 = vector.extract_strided_slice %134 {offsets = [10, 0, 0], sizes = [2, 8, 8], strides = [1, 1, 1]} : vector<32x8x8xf32> to vector<2x8x8xf32>
    %146 = vector.shape_cast %145 : vector<2x8x8xf32> to vector<16x8xf32>
    %147 = vector.extract_strided_slice %134 {offsets = [12, 0, 0], sizes = [2, 8, 8], strides = [1, 1, 1]} : vector<32x8x8xf32> to vector<2x8x8xf32>
    %148 = vector.shape_cast %147 : vector<2x8x8xf32> to vector<16x8xf32>
    %149 = vector.extract_strided_slice %134 {offsets = [14, 0, 0], sizes = [2, 8, 8], strides = [1, 1, 1]} : vector<32x8x8xf32> to vector<2x8x8xf32>
    %150 = vector.shape_cast %149 : vector<2x8x8xf32> to vector<16x8xf32>
    %151 = vector.extract_strided_slice %134 {offsets = [16, 0, 0], sizes = [2, 8, 8], strides = [1, 1, 1]} : vector<32x8x8xf32> to vector<2x8x8xf32>
    %152 = vector.shape_cast %151 : vector<2x8x8xf32> to vector<16x8xf32>
    %153 = vector.extract_strided_slice %134 {offsets = [18, 0, 0], sizes = [2, 8, 8], strides = [1, 1, 1]} : vector<32x8x8xf32> to vector<2x8x8xf32>
    %154 = vector.shape_cast %153 : vector<2x8x8xf32> to vector<16x8xf32>
    %155 = vector.extract_strided_slice %134 {offsets = [20, 0, 0], sizes = [2, 8, 8], strides = [1, 1, 1]} : vector<32x8x8xf32> to vector<2x8x8xf32>
    %156 = vector.shape_cast %155 : vector<2x8x8xf32> to vector<16x8xf32>
    %157 = vector.extract_strided_slice %134 {offsets = [22, 0, 0], sizes = [2, 8, 8], strides = [1, 1, 1]} : vector<32x8x8xf32> to vector<2x8x8xf32>
    %158 = vector.shape_cast %157 : vector<2x8x8xf32> to vector<16x8xf32>
    %159 = vector.extract_strided_slice %134 {offsets = [24, 0, 0], sizes = [2, 8, 8], strides = [1, 1, 1]} : vector<32x8x8xf32> to vector<2x8x8xf32>
    %160 = vector.shape_cast %159 : vector<2x8x8xf32> to vector<16x8xf32>
    %161 = vector.extract_strided_slice %134 {offsets = [26, 0, 0], sizes = [2, 8, 8], strides = [1, 1, 1]} : vector<32x8x8xf32> to vector<2x8x8xf32>
    %162 = vector.shape_cast %161 : vector<2x8x8xf32> to vector<16x8xf32>
    %163 = vector.extract_strided_slice %134 {offsets = [28, 0, 0], sizes = [2, 8, 8], strides = [1, 1, 1]} : vector<32x8x8xf32> to vector<2x8x8xf32>
    %164 = vector.shape_cast %163 : vector<2x8x8xf32> to vector<16x8xf32>
    %165 = vector.extract_strided_slice %134 {offsets = [30, 0, 0], sizes = [2, 8, 8], strides = [1, 1, 1]} : vector<32x8x8xf32> to vector<2x8x8xf32>
    %166 = vector.shape_cast %165 : vector<2x8x8xf32> to vector<16x8xf32>
    %167 = tpu.concatenate %136, %138, %140, %142, %144, %146, %148, %150, %152, %154, %156, %158, %160, %162, %164, %166 in 1 : vector<16x8xf32>, vector<16x8xf32>, vector<16x8xf32>, vector<16x8xf32>, vector<16x8xf32>, vector<16x8xf32>, vector<16x8xf32>, vector<16x8xf32>, vector<16x8xf32>, vector<16x8xf32>, vector<16x8xf32>, vector<16x8xf32>, vector<16x8xf32>, vector<16x8xf32>, vector<16x8xf32>, vector<16x8xf32> -> vector<16x128xf32>
    %168 = arith.truncf %167 : vector<16x128xf32> to vector<16x128xbf16>
    %c0_21 = arith.constant 0 : index
    %c0_22 = arith.constant 0 : index
    %169 = vector.load %arg8[%c0_21, %c0_22] : memref<128x128xbf16, #tpu.memory_space<vmem>>, vector<128x128xbf16>
    %cst_23 = arith.constant dense<0.000000e+00> : vector<16x128xf32>
    %170 = tpu.matmul %168, %169, %cst_23 {dimension_numbers = #tpu.dot_dimension_numbers<[1], [0], [0], [1], [0, 0, 1, 1], [], []>} : vector<16x128xbf16>, vector<128x128xbf16>, vector<16x128xf32> -> vector<16x128xf32>
    %c0_24 = arith.constant 0 : index
    %c0_25 = arith.constant 0 : index
    %171 = vector.load %arg9[%c0_24, %c0_25] : memref<1x128xf32, #tpu.memory_space<vmem>>, vector<1x128xf32>
    %172 = vector.broadcast %171 : vector<1x128xf32> to vector<16x128xf32>
    %173 = arith.addf %170, %172 : vector<16x128xf32>
    %174 = arith.addf %1, %173 : vector<16x128xf32>
    %cst_26 = arith.constant dense<0.000000e+00> : vector<16xf32>
    %175 = vector.multi_reduction <add>, %174, %cst_26 [1] : vector<16x128xf32> to vector<16xf32>
    %176 = vector.shape_cast %175 : vector<16xf32> to vector<16x1xf32>
    %cst_27 = arith.constant 1.280000e+02 : f32
    %177 = vector.broadcast %cst_27 : f32 to vector<16x1xf32>
    %178 = arith.divf %176, %177 : vector<16x1xf32>
    %179 = arith.mulf %174, %174 : vector<16x128xf32>
    %cst_28 = arith.constant dense<0.000000e+00> : vector<16xf32>
    %180 = vector.multi_reduction <add>, %179, %cst_28 [1] : vector<16x128xf32> to vector<16xf32>
    %181 = vector.shape_cast %180 : vector<16xf32> to vector<16x1xf32>
    %cst_29 = arith.constant 1.280000e+02 : f32
    %182 = vector.broadcast %cst_29 : f32 to vector<16x1xf32>
    %183 = arith.divf %181, %182 : vector<16x1xf32>
    %184 = arith.mulf %178, %178 : vector<16x1xf32>
    %185 = arith.subf %183, %184 : vector<16x1xf32>
    %cst_30 = arith.constant 9.99999996E-13 : f32
    %186 = vector.broadcast %cst_30 : f32 to vector<16x1xf32>
    %187 = arith.addf %185, %186 : vector<16x1xf32>
    %188 = math.rsqrt %187 : vector<16x1xf32>
    %189 = vector.broadcast %178 : vector<16x1xf32> to vector<16x128xf32>
    %190 = arith.subf %174, %189 : vector<16x128xf32>
    %191 = vector.broadcast %188 : vector<16x1xf32> to vector<16x128xf32>
    %192 = arith.mulf %190, %191 : vector<16x128xf32>
    %c0_31 = arith.constant 0 : index
    %c0_32 = arith.constant 0 : index
    %193 = vector.load %arg10[%c0_31, %c0_32] : memref<1x128xf32, #tpu.memory_space<vmem>>, vector<1x128xf32>
    %194 = vector.broadcast %193 : vector<1x128xf32> to vector<16x128xf32>
    %195 = arith.mulf %192, %194 : vector<16x128xf32>
    %c0_33 = arith.constant 0 : index
    %c0_34 = arith.constant 0 : index
    %196 = vector.load %arg11[%c0_33, %c0_34] : memref<1x128xf32, #tpu.memory_space<vmem>>, vector<1x128xf32>
    %197 = vector.broadcast %196 : vector<1x128xf32> to vector<16x128xf32>
    %198 = arith.addf %195, %197 : vector<16x128xf32>
    %199 = arith.truncf %198 : vector<16x128xf32> to vector<16x128xbf16>
    %c0_35 = arith.constant 0 : index
    %c0_36 = arith.constant 0 : index
    %200 = vector.load %arg12[%c0_35, %c0_36] : memref<128x256xbf16, #tpu.memory_space<vmem>>, vector<128x256xbf16>
    %cst_37 = arith.constant dense<0.000000e+00> : vector<16x256xf32>
    %201 = tpu.matmul %199, %200, %cst_37 {dimension_numbers = #tpu.dot_dimension_numbers<[1], [0], [0], [1], [0, 0, 1, 1], [], []>} : vector<16x128xbf16>, vector<128x256xbf16>, vector<16x256xf32> -> vector<16x256xf32>
    %c0_38 = arith.constant 0 : index
    %c0_39 = arith.constant 0 : index
    %202 = vector.load %arg13[%c0_38, %c0_39] : memref<1x256xf32, #tpu.memory_space<vmem>>, vector<1x256xf32>
    %203 = vector.broadcast %202 : vector<1x256xf32> to vector<16x256xf32>
    %204 = arith.addf %201, %203 : vector<16x256xf32>
    %cst_40 = arith.constant 5.000000e-01 : f32
    %205 = vector.broadcast %cst_40 : f32 to vector<16x256xf32>
    %206 = arith.mulf %205, %204 : vector<16x256xf32>
    %cst_41 = arith.constant 0.707106769 : f32
    %207 = vector.broadcast %cst_41 : f32 to vector<16x256xf32>
    %208 = arith.mulf %204, %207 : vector<16x256xf32>
    %209 = math.erf %208 : vector<16x256xf32>
    %cst_42 = arith.constant 1.000000e+00 : f32
    %210 = vector.broadcast %cst_42 : f32 to vector<16x256xf32>
    %211 = arith.addf %210, %209 : vector<16x256xf32>
    %212 = arith.mulf %206, %211 : vector<16x256xf32>
    %213 = arith.truncf %212 : vector<16x256xf32> to vector<16x256xbf16>
    %c0_43 = arith.constant 0 : index
    %c0_44 = arith.constant 0 : index
    %214 = vector.load %arg14[%c0_43, %c0_44] : memref<256x128xbf16, #tpu.memory_space<vmem>>, vector<256x128xbf16>
    %cst_45 = arith.constant dense<0.000000e+00> : vector<16x128xf32>
    %215 = tpu.matmul %213, %214, %cst_45 {dimension_numbers = #tpu.dot_dimension_numbers<[1], [0], [0], [1], [0, 0, 1, 1], [], []>} : vector<16x256xbf16>, vector<256x128xbf16>, vector<16x128xf32> -> vector<16x128xf32>
    %c0_46 = arith.constant 0 : index
    %c0_47 = arith.constant 0 : index
    %216 = vector.load %arg15[%c0_46, %c0_47] : memref<1x128xf32, #tpu.memory_space<vmem>>, vector<1x128xf32>
    %217 = vector.broadcast %216 : vector<1x128xf32> to vector<16x128xf32>
    %218 = arith.addf %215, %217 : vector<16x128xf32>
    %219 = arith.addf %198, %218 : vector<16x128xf32>
    %cst_48 = arith.constant dense<0.000000e+00> : vector<16xf32>
    %220 = vector.multi_reduction <add>, %219, %cst_48 [1] : vector<16x128xf32> to vector<16xf32>
    %221 = vector.shape_cast %220 : vector<16xf32> to vector<16x1xf32>
    %cst_49 = arith.constant 1.280000e+02 : f32
    %222 = vector.broadcast %cst_49 : f32 to vector<16x1xf32>
    %223 = arith.divf %221, %222 : vector<16x1xf32>
    %224 = arith.mulf %219, %219 : vector<16x128xf32>
    %cst_50 = arith.constant dense<0.000000e+00> : vector<16xf32>
    %225 = vector.multi_reduction <add>, %224, %cst_50 [1] : vector<16x128xf32> to vector<16xf32>
    %226 = vector.shape_cast %225 : vector<16xf32> to vector<16x1xf32>
    %cst_51 = arith.constant 1.280000e+02 : f32
    %227 = vector.broadcast %cst_51 : f32 to vector<16x1xf32>
    %228 = arith.divf %226, %227 : vector<16x1xf32>
    %229 = arith.mulf %223, %223 : vector<16x1xf32>
    %230 = arith.subf %228, %229 : vector<16x1xf32>
    %cst_52 = arith.constant 9.99999996E-13 : f32
    %231 = vector.broadcast %cst_52 : f32 to vector<16x1xf32>
    %232 = arith.addf %230, %231 : vector<16x1xf32>
    %233 = math.rsqrt %232 : vector<16x1xf32>
    %234 = vector.broadcast %223 : vector<16x1xf32> to vector<16x128xf32>
    %235 = arith.subf %219, %234 : vector<16x128xf32>
    %236 = vector.broadcast %233 : vector<16x1xf32> to vector<16x128xf32>
    %237 = arith.mulf %235, %236 : vector<16x128xf32>
    %c0_53 = arith.constant 0 : index
    %c0_54 = arith.constant 0 : index
    %238 = vector.load %arg16[%c0_53, %c0_54] : memref<1x128xf32, #tpu.memory_space<vmem>>, vector<1x128xf32>
    %239 = vector.broadcast %238 : vector<1x128xf32> to vector<16x128xf32>
    %240 = arith.mulf %237, %239 : vector<16x128xf32>
    %c0_55 = arith.constant 0 : index
    %c0_56 = arith.constant 0 : index
    %241 = vector.load %arg17[%c0_55, %c0_56] : memref<1x128xf32, #tpu.memory_space<vmem>>, vector<1x128xf32>
    %242 = vector.broadcast %241 : vector<1x128xf32> to vector<16x128xf32>
    %243 = arith.addf %240, %242 : vector<16x128xf32>
    %244 = vector.shape_cast %243 : vector<16x128xf32> to vector<2x8x128xf32>
    %c0_57 = arith.constant 0 : index
    %c0_58 = arith.constant 0 : index
    %c0_59 = arith.constant 0 : index
    %245 = vector.load %arg18[%c0_57, %c0_58, %c0_59] : memref<2x8x128xf32, #tpu.memory_space<vmem>>, vector<2x8x128xf32>
    tpu.vector_store %arg18[%c0_57, %c0_58, %c0_59], %244 {strides = array<i32>} : memref<2x8x128xf32, #tpu.memory_space<vmem>>, vector<2x8x128xf32>,
    return
  }
  func.func @transform_0(%arg0: i32) -> (i32, i32, i32) {
    %c0_i32 = arith.constant 0 : i32
    %c0_i32_0 = arith.constant 0 : i32
    %c0_i32_1 = arith.constant 0 : i32
    return %arg0, %c0_i32, %c0_i32_0 : i32, i32, i32
  }
  func.func @transform_1(%arg0: i32) -> (i32, i32) {
    %c0_i32 = arith.constant 0 : i32
    %c0_i32_0 = arith.constant 0 : i32
    %c0_i32_1 = arith.constant 0 : i32
    return %c0_i32, %c0_i32_0 : i32, i32
  }
  func.func @transform_2(%arg0: i32) -> (i32, i32) {
    %c0_i32 = arith.constant 0 : i32
    %c0_i32_0 = arith.constant 0 : i32
    %c0_i32_1 = arith.constant 0 : i32
    return %c0_i32, %c0_i32_0 : i32, i32
  }
  func.func @transform_3(%arg0: i32) -> (i32, i32) {
    %c0_i32 = arith.constant 0 : i32
    %c0_i32_0 = arith.constant 0 : i32
    %c0_i32_1 = arith.constant 0 : i32
    return %c0_i32, %c0_i32_0 : i32, i32
  }
  func.func @transform_4(%arg0: i32) -> (i32, i32) {
    %c0_i32 = arith.constant 0 : i32
    %c0_i32_0 = arith.constant 0 : i32
    %c0_i32_1 = arith.constant 0 : i32
    return %c0_i32, %c0_i32_0 : i32, i32
  }
  func.func @transform_5(%arg0: i32) -> (i32, i32) {
    %c0_i32 = arith.constant 0 : i32
    %c0_i32_0 = arith.constant 0 : i32
    %c0_i32_1 = arith.constant 0 : i32
    return %c0_i32, %c0_i32_0 : i32, i32
  }
  func.func @transform_6(%arg0: i32) -> (i32, i32) {
    %c0_i32 = arith.constant 0 : i32
    %c0_i32_0 = arith.constant 0 : i32
    %c0_i32_1 = arith.constant 0 : i32
    return %c0_i32, %c0_i32_0 : i32, i32
  }
  func.func @transform_7(%arg0: i32) -> (i32, i32) {
    %c0_i32 = arith.constant 0 : i32
    %c0_i32_0 = arith.constant 0 : i32
    %c0_i32_1 = arith.constant 0 : i32
    return %c0_i32, %c0_i32_0 : i32, i32
  }
  func.func @transform_8(%arg0: i32) -> (i32, i32) {
    %c0_i32 = arith.constant 0 : i32
    %c0_i32_0 = arith.constant 0 : i32
    %c0_i32_1 = arith.constant 0 : i32
    return %c0_i32, %c0_i32_0 : i32, i32
  }
  func.func @transform_9(%arg0: i32) -> (i32, i32) {
    %c0_i32 = arith.constant 0 : i32
    %c0_i32_0 = arith.constant 0 : i32
    %c0_i32_1 = arith.constant 0 : i32
    return %c0_i32, %c0_i32_0 : i32, i32
  }
  func.func @transform_10(%arg0: i32) -> (i32, i32) {
    %c0_i32 = arith.constant 0 : i32
    %c0_i32_0 = arith.constant 0 : i32
    %c0_i32_1 = arith.constant 0 : i32
    return %c0_i32, %c0_i32_0 : i32, i32
  }
  func.func @transform_11(%arg0: i32) -> (i32, i32) {
    %c0_i32 = arith.constant 0 : i32
    %c0_i32_0 = arith.constant 0 : i32
    %c0_i32_1 = arith.constant 0 : i32
    return %c0_i32, %c0_i32_0 : i32, i32
  }
  func.func @transform_12(%arg0: i32) -> (i32, i32) {
    %c0_i32 = arith.constant 0 : i32
    %c0_i32_0 = arith.constant 0 : i32
    %c0_i32_1 = arith.constant 0 : i32
    return %c0_i32, %c0_i32_0 : i32, i32
  }
  func.func @transform_13(%arg0: i32) -> (i32, i32) {
    %c0_i32 = arith.constant 0 : i32
    %c0_i32_0 = arith.constant 0 : i32
    %c0_i32_1 = arith.constant 0 : i32
    return %c0_i32, %c0_i32_0 : i32, i32
  }
  func.func @transform_14(%arg0: i32) -> (i32, i32) {
    %c0_i32 = arith.constant 0 : i32
    %c0_i32_0 = arith.constant 0 : i32
    %c0_i32_1 = arith.constant 0 : i32
    return %c0_i32, %c0_i32_0 : i32, i32
  }
  func.func @transform_15(%arg0: i32) -> (i32, i32) {
    %c0_i32 = arith.constant 0 : i32
    %c0_i32_0 = arith.constant 0 : i32
    %c0_i32_1 = arith.constant 0 : i32
    return %c0_i32, %c0_i32_0 : i32, i32
  }
  func.func @transform_16(%arg0: i32) -> (i32, i32) {
    %c0_i32 = arith.constant 0 : i32
    %c0_i32_0 = arith.constant 0 : i32
    %c0_i32_1 = arith.constant 0 : i32
    return %c0_i32, %c0_i32_0 : i32, i32
  }
  func.func @transform_17(%arg0: i32) -> (i32, i32, i32) {
    %c0_i32 = arith.constant 0 : i32
    %c0_i32_0 = arith.constant 0 : i32
    %c0_i32_1 = arith.constant 0 : i32
    return %arg0, %c0_i32, %c0_i32_0 : i32, i32, i32
  }
}

</mosaic_0001>

<bundles_post_ra>
// kernel: tpu_custom_call.1
= control target key start
LH: loop header
LB: loop body
LE: loop exit
PB: predicated region body
PF: predicated region fallthrough
CT: control target
= control target key end

     0   :  { %s7387_s0 = inlined_call_operand.hbm [shape: f32[2,8,128], index: 0, kind: input, shape index: {}]   ;;  %s7388_s1 = inlined_call_operand.hbm [shape: bf16[128,128], index: 1, kind: input, shape index: {}]   ;;  %s7389_s2 = inlined_call_operand.vmem [shape: f32[1,128], index: 2, kind: input, shape index: {}]   ;;  %s7390_s3 = inlined_call_operand.hbm [shape: bf16[128,128], index: 3, kind: input, shape index: {}]   ;;  %s7391_s4 = inlined_call_operand.vmem [shape: f32[1,128], index: 4, kind: input, shape index: {}]   ;;  %s7392_s5 = inlined_call_operand.hbm [shape: bf16[128,128], index: 5, kind: input, shape index: {}]   ;;  %s7393_s6 = inlined_call_operand.vmem [shape: f32[1,128], index: 6, kind: input, shape index: {}]   ;;  %s7394_s7 = inlined_call_operand.hbm [shape: bf16[128,128], index: 7, kind: input, shape index: {}]   ;;  %s7395_s8 = inlined_call_operand.vmem [shape: f32[1,128], index: 8, kind: input, shape index: {}]   ;;  %s7396_s9 = inlined_call_operand.vmem [shape: f32[1,128], index: 9, kind: input, shape index: {}]   ;;  %s7397_s10 = inlined_call_operand.vmem [shape: f32[1,128], index: 10, kind: input, shape index: {}]   ;;  %s7398_s11 = inlined_call_operand.hbm [shape: bf16[128,256], index: 11, kind: input, shape index: {}]   ;;  %s7399_s12 = inlined_call_operand.vmem [shape: f32[1,256], index: 12, kind: input, shape index: {}]   ;;  %s7400_s13 = inlined_call_operand.hbm [shape: bf16[256,128], index: 13, kind: input, shape index: {}]   ;;  %s7401_s14 = inlined_call_operand.vmem [shape: f32[1,128], index: 14, kind: input, shape index: {}]   ;;  %s7402_s15 = inlined_call_operand.vmem [shape: f32[1,128], index: 15, kind: input, shape index: {}]   ;;  %s7403_s16 = inlined_call_operand.vmem [shape: f32[1,128], index: 16, kind: input, shape index: {}]   ;;  %s7404_s17 = inlined_call_operand.hbm [shape: f32[2,8,128], index: 17, kind: output, shape index: {}]  }
   0x1   :  { %7413 = sst [smem:[#allocation33_spill]] %s7387_s0 }
   0x2   :  { %7414 = sst [smem:[#allocation34_spill]] %s7388_s1 }
   0x3   :  { %7415 = sst [smem:[#allocation35_spill]] %s7404_s17 }
   0x4   :  { %22 = vsyncpa [#allocation3], 0 }
   0x5   :  { %23 = vsyncpa [#allocation6], 0 }
   0x6   :  { %24 = vsyncpa [#allocation9], 0 }
   0x7   :  { %25 = vsyncpa [#allocation12], 0 }
   0x8   :  { %26 = vsyncpa [#allocation4], 0  ;;  %s6070_s24 = smov [#allocation5]   ;;  %s7416_s28 = sld [smem:[#allocation34_spill]] }
   0x9   :  { %s44_s25 = sshll.u32 %s6070_s24, 4  ;;  %s45_s25 = int_to_ptr.vmem [resolvable:$true] %s44_s25 }
   0xe   :  { %s5884_s29 = scalar_lea.hbm %s7416_s28, 1024 }
   0xf   :  { %p5885_p0 = scmp.ne.s32.totalorder %s7416_s28, %s5884_s29  ;;  %p5888_p1 = scmp.lt.u32.totalorder %s5884_s29, %s7416_s28 }
  0x11   :  { %p5890_p2 = pnand %p5888_p1, %p5885_p0 }
  0x13   :  { %5893 = shalt.err (!%p5890_p2)
}
  0x14   :  { %s5894_s1 = scalar_lea.vmem %s45_s25, 1024  ;;  %p5899_p4 = scmp.lt.s32.totalorder %s45_s25, %s45_s25 }
  0x15   :  { %p5895_p3 = scmp.ne.s32.totalorder %s45_s25, %s5894_s1  ;;  %p5900_p5 = scmp.lt.s32.totalorder %s5894_s1, %s5894_s1 }
  0x17   :  { %p5901_p6 = por %p5900_p5, %p5899_p4 }
  0x19   :  { %p5902_p7 = pnand %p5901_p6, %p5895_p3 }
  0x1b   :  { %5905 = shalt.err (!%p5902_p7)
}
  0x1c   :  { %s7408_s20 = smov 64   ;;  %s6072_s21 = smov 4  }
  0x1d   :  { %50 = dma.hbm_to_vmem [thread:$0]  %s7416_s28, 1024, %s45_s25, [#allocation6], %s7408_s20, %s7408_s20, %s6072_s21  }
  0x1e   :  { %s6073_s24 = smov [#allocation8]   ;;  %s5906_s0 = scalar_lea.hbm %s7392_s5, 1024 }
  0x1f   :  { %s72_s26 = sshll.u32 %s6073_s24, 4  ;;  %p5907_p8 = scmp.ne.s32.totalorder %s7392_s5, %s5906_s0  ;;  %s73_s26 = int_to_ptr.vmem [resolvable:$true] %s72_s26 }
  0x20   :  { %p5910_p9 = scmp.lt.u32.totalorder %s5906_s0, %s7392_s5 }
  0x22   :  { %p5912_p10 = pnand %p5910_p9, %p5907_p8 }
  0x24   :  { %5915 = shalt.err (!%p5912_p10)
}
  0x25   :  { %s5916_s17 = scalar_lea.vmem %s73_s26, 1024  ;;  %p5921_p12 = scmp.lt.s32.totalorder %s73_s26, %s73_s26 }
  0x26   :  { %p5917_p11 = scmp.ne.s32.totalorder %s73_s26, %s5916_s17  ;;  %p5922_p13 = scmp.lt.s32.totalorder %s5916_s17, %s5916_s17 }
  0x28   :  { %p5923_p0 = por %p5922_p13, %p5921_p12 }
  0x2a   :  { %p5924_p1 = pnand %p5923_p0, %p5917_p11 }
  0x2c   :  { %5927 = shalt.err (!%p5924_p1)
}
  0x2d   :  { %78 = dma.hbm_to_vmem [thread:$0]  %s7392_s5, 1024, %s73_s26, [#allocation9], %s7408_s20, %s7408_s20, %s6072_s21  }
  0x2e   :  { %s6074_s22 = smov [#allocation11]   ;;  %s6075_s24 = smov [#allocation2]  }
  0x2f   :  { %s104_s23 = sshll.u32 %s6074_s22, 4  ;;  %s32_s27 = sshll.u32 %s6075_s24, 4  ;;  %s105_s23 = int_to_ptr.vmem [resolvable:$true] %s104_s23  ;;  %s6218_s27 = int_to_ptr.vmem [resolvable:$true] %s32_s27 }
  0x30   :  { %s5928_s17 = scalar_lea.hbm %s7398_s11, 2048 }
  0x31   :  { %p5929_p2 = scmp.ne.s32.totalorder %s7398_s11, %s5928_s17  ;;  %p5932_p3 = scmp.lt.u32.totalorder %s5928_s17, %s7398_s11 }
  0x33   :  { %p5934_p4 = pnand %p5932_p3, %p5929_p2 }
  0x35   :  { %5937 = shalt.err (!%p5934_p4)
}
  0x36   :  { %s5938_s5 = scalar_lea.vmem %s105_s23, 2048  ;;  %p5943_p6 = scmp.lt.s32.totalorder %s105_s23, %s105_s23 }
  0x37   :  { %p5939_p5 = scmp.ne.s32.totalorder %s105_s23, %s5938_s5  ;;  %p5944_p7 = scmp.lt.s32.totalorder %s5938_s5, %s5938_s5 }
  0x39   :  { %p5945_p8 = por %p5944_p7, %p5943_p6 }
  0x3b   :  { %p5946_p9 = pnand %p5945_p8, %p5939_p5 }
  0x3d   :  { %5949 = shalt.err (!%p5946_p9)
}
  0x3e   :  { %s6076_s26 = smov 128   ;;  %s6077_s25 = smov 8  }
  0x3f   :  { %110 = dma.hbm_to_vmem [thread:$0]  %s7398_s11, 2048, %s105_s23, [#allocation12], %s6076_s26, %s6076_s26, %s6077_s25  }
  0x40   :  { %s7417_s0 = sld [smem:[#allocation33_spill]] }
  0x46   :  { %s5950_s17 = scalar_lea.hbm %s7417_s0, 256 }
  0x47   :  { %p5951_p10 = scmp.ne.s32.totalorder %s7417_s0, %s5950_s17  ;;  %p5954_p11 = scmp.lt.u32.totalorder %s5950_s17, %s7417_s0 }
  0x49   :  { %p5956_p12 = pnand %p5954_p11, %p5951_p10 }
  0x4b   :  { %5959 = shalt.err (!%p5956_p12)
}
  0x4c   :  { %s5960_s5 = scalar_lea.vmem %s6218_s27, 256  ;;  %p5965_p0 = scmp.lt.s32.totalorder %s6218_s27, %s6218_s27 }
  0x4d   :  { %p5961_p13 = scmp.ne.s32.totalorder %s6218_s27, %s5960_s5  ;;  %p5966_p1 = scmp.lt.s32.totalorder %s5960_s5, %s5960_s5 }
  0x4f   :  { %p5967_p2 = por %p5966_p1, %p5965_p0 }
  0x51   :  { %p5968_p3 = pnand %p5967_p2, %p5961_p13 }
  0x53   :  { %5971 = shalt.err (!%p5968_p3)
}
  0x54   :  { %38 = dma.hbm_to_vmem [thread:$0]  %s7417_s0, 256, %s6218_s27, [#allocation3], %s6076_s26, %s6076_s26, %s6077_s25  }
  0x55   :  { %s6078_s28 = smov [#allocation7]   ;;  %s6079_s24 = smov [#allocation10]  }
  0x56   :  { %s58_s22 = sshll.u32 %s6078_s28, 4  ;;  %s86_s29 = sshll.u32 %s6079_s24, 4  ;;  %s59_s22 = int_to_ptr.vmem [resolvable:$true] %s58_s22  ;;  %s6255_s29 = int_to_ptr.vmem [resolvable:$true] %s86_s29 }
  0x57   :  { %s5972_s18 = scalar_lea.hbm %s7390_s3, 1024 }
  0x58   :  { %p5973_p4 = scmp.ne.s32.totalorder %s7390_s3, %s5972_s18  ;;  %p5976_p5 = scmp.lt.u32.totalorder %s5972_s18, %s7390_s3 }
  0x5a   :  { %p5978_p6 = pnand %p5976_p5, %p5973_p4 }
  0x5c   :  { %5981 = shalt.err (!%p5978_p6)
}
  0x5d   :  { %s5982_s27 = scalar_lea.vmem %s59_s22, 1024  ;;  %p5987_p8 = scmp.lt.s32.totalorder %s59_s22, %s59_s22 }
  0x5e   :  { %p5983_p7 = scmp.ne.s32.totalorder %s59_s22, %s5982_s27  ;;  %p5988_p9 = scmp.lt.s32.totalorder %s5982_s27, %s5982_s27 }
  0x60   :  { %p5989_p10 = por %p5988_p9, %p5987_p8 }
  0x62   :  { %p5990_p11 = pnand %p5989_p10, %p5983_p7 }
  0x64   :  { %5993 = shalt.err (!%p5990_p11)
}
  0x65   :  { %s7418_s0 = smov 64   ;;  %s5994_s20 = scalar_lea.hbm %s7394_s7, 1024 }
  0x66   :  { %64 = dma.hbm_to_vmem [thread:$0]  %s7390_s3, 1024, %s59_s22, [#allocation6], %s7418_s0, %s7418_s0, %s6072_s21  }
  0x67   :  { %p5995_p12 = scmp.ne.s32.totalorder %s7394_s7, %s5994_s20  ;;  %p5998_p13 = scmp.lt.u32.totalorder %s5994_s20, %s7394_s7 }
  0x69   :  { %p6000_p0 = pnand %p5998_p13, %p5995_p12 }
  0x6b   :  { %6003 = shalt.err (!%p6000_p0)
}
  0x6c   :  { %s6004_s1 = scalar_lea.vmem %s6255_s29, 1024  ;;  %p6009_p2 = scmp.lt.s32.totalorder %s6255_s29, %s6255_s29 }
  0x6d   :  { %p6005_p1 = scmp.ne.s32.totalorder %s6255_s29, %s6004_s1  ;;  %p6010_p3 = scmp.lt.s32.totalorder %s6004_s1, %s6004_s1 }
  0x6f   :  { %p6011_p4 = por %p6010_p3, %p6009_p2 }
  0x71   :  { %p6012_p5 = pnand %p6011_p4, %p6005_p1 }
  0x73   :  { %6015 = shalt.err (!%p6012_p5)
}
  0x74   :  { %92 = dma.hbm_to_vmem [thread:$0]  %s7394_s7, 1024, %s6255_s29, [#allocation9], %s7418_s0, %s7418_s0, %s6072_s21  }
  0x75   :  { %s6080_s5 = smov [#allocation13]   ;;  %s6016_s28 = scalar_lea.hbm %s7400_s13, 2048 }
  0x76   :  { %s118_s27 = sshll.u32 %s6080_s5, 4  ;;  %p6017_p6 = scmp.ne.s32.totalorder %s7400_s13, %s6016_s28  ;;  %s119_s27 = int_to_ptr.vmem [resolvable:$true] %s118_s27 }
  0x77   :  { %p6020_p7 = scmp.lt.u32.totalorder %s6016_s28, %s7400_s13 }
  0x79   :  { %p6022_p8 = pnand %p6020_p7, %p6017_p6 }
  0x7b   :  { %6025 = shalt.err (!%p6022_p8)
}
  0x7c   :  { %s6026_s18 = scalar_lea.vmem %s119_s27, 2048  ;;  %p6031_p10 = scmp.lt.s32.totalorder %s119_s27, %s119_s27 }
  0x7d   :  { %p6027_p9 = scmp.ne.s32.totalorder %s119_s27, %s6026_s18  ;;  %p6032_p11 = scmp.lt.s32.totalorder %s6026_s18, %s6026_s18 }
  0x7f   :  { %p6033_p12 = por %p6032_p11, %p6031_p10 }
  0x81   :  { %p6034_p13 = pnand %p6033_p12, %p6027_p9 }
  0x83   :  { %6037 = shalt.err (!%p6034_p13)
}
  0x84   :  { %124 = dma.hbm_to_vmem [thread:$0]  %s7400_s13, 2048, %s119_s27, [#allocation12], %s7418_s0, %s7418_s0, %s6072_s21  }
  0x85   :  { %6060 = dma.done.wait [#allocation3], 256  }
  0x86   :  { %6061 = vsyncadd [#allocation3], 4294967040 }
  0x87   :  { %6062 = dma.done.wait [#allocation6], 2048  }
  0x88   :  { %6063 = vsyncadd [#allocation6], 4294965248 }
  0x89   :  { %6064 = dma.done.wait [#allocation9], 2048  }
  0x8a   :  { %6065 = vsyncadd [#allocation9], 4294965248 }
  0x8b   :  { %6066 = dma.done.wait [#allocation12], 4096  }
  0x8c   :  { %6067 = vsyncadd [#allocation12], 4294963200  ;;  %v7410_v0 = vmov 0.0   ;;  %vm6082_vm0 = vmmov 0   ;;  %v5666_v1 = vld [vmem:[#allocation5] sm:$0xff]   ;;  %v5668_v3 = vld [vmem:[#allocation5 + $0x8] sm:$0xff]  }
  0x8d   :  { %5099 = vmatprep.subr.bf16.mxu0 %v7410_v0  ;;  %5119 = vmatprep.subr.bf16.mxu1 %v7410_v0  ;;  %v5667_v2 = vld [vmem:[#allocation7] sm:$0xff]   ;;  %v5669_v4 = vld [vmem:[#allocation7 + $0x8] sm:$0xff]   ;;  %v5670_v5 = vld [vmem:[#allocation5 + $0x10] sm:$0xff]   ;;  %vm692_vm1 = vcmask 64512   ;;  %s6085_s3 = smov 104   ;;  %s6086_s22 = smov 96  }
  0x8e   :  { %5115 = vmatprep.mubr.msk.bf16.mxu0 %vm6082_vm0, %v7410_v0  ;;  %5135 = vmatprep.mubr.msk.bf16.mxu1 %vm6082_vm0, %v7410_v0  ;;  %v5671_v6 = vld [vmem:[#allocation7 + $0x10] sm:$0xff]   ;;  %v5672_v7 = vld [vmem:[#allocation5 + $0x18] sm:$0xff]   ;;  %v5674_v9 = vld [vmem:[#allocation5 + $0x20] sm:$0xff]   ;;  %s6087_s5 = smov 88   ;;  %s6088_s27 = smov 80   ;;  %vm2552_vm2 = vcmask 1043456  }
  0x8f   :  { %5100 = vmatpush3.bf16.msra.mxu0 %v5666_v1  ;;  %5120 = vmatpush3.bf16.msra.mxu1 %v5667_v2  ;;  %v5673_v8 = vld [vmem:[#allocation7 + $0x18] sm:$0xff]   ;;  %v5675_v10 = vld [vmem:[#allocation7 + $0x20] sm:$0xff]   ;;  %v5676_v11 = vld [vmem:[#allocation5 + $0x28] sm:$0xff]   ;;  %s6089_s11 = smov 72   ;;  %s6090_s23 = smov 56   ;;  %vm4144_vm3 = vcmask 130048  }
  0x90   :  { %5101 = vmatprep.subr.bf16.mxu0 %v7410_v0  ;;  %5121 = vmatprep.subr.bf16.mxu1 %v7410_v0  ;;  %v5677_v12 = vld [vmem:[#allocation7 + $0x28] sm:$0xff]   ;;  %v5678_v13 = vld [vmem:[#allocation5 + $0x30] sm:$0xff]   ;;  %v5680_v15 = vld [vmem:[#allocation5 + $0x38] sm:$0xff]   ;;  %s6091_s28 = smov 48   ;;  %s6092_s24 = smov 40   ;;  %vm4147_vm4 = vcmask 195584  }
  0x91   :  { %v5679_v14 = vld [vmem:[#allocation7 + $0x30] sm:$0xff]   ;;  %v154_v17 = vld [vmem:[#allocation2 + $0x8] sm:$0xff]  ;;  %v5682_v19 = vld [vmem:[#allocation8] sm:$0xff]   ;;  %s6093_s20 = smov 32   ;;  %s6094_s17 = smov 24   ;;  %vm4150_vm5 = vcmask 261120  }
  0x92   :  { %v153_v16 = vld [vmem:[#allocation2] sm:$0xff]  ;;  %v5681_v18 = vld [vmem:[#allocation7 + $0x38] sm:$0xff]   ;;  %v5683_v21 = vld [vmem:[#allocation8 + $0x8] sm:$0xff]   ;;  %s6095_s30 = smov 16   ;;  %vm4153_vm6 = vcmask 326656   ;;  %vm4156_vm7 = vcmask 392192  }
  0x93   :  { %5102 = vmatpush3.bf16.msra.mxu0 %v5668_v3  ;;  %5122 = vmatpush3.bf16.msra.mxu1 %v5669_v4  ;;  %v155_v20 = vpack.c.bf16 %v154_v17, %v153_v16  ;;  %v5684_v22 = vld [vmem:[#allocation8 + $0x10] sm:$0xff]   ;;  %v5685_v23 = vld [vmem:[#allocation8 + $0x18] sm:$0xff]   ;;  %v5686_v24 = vld [vmem:[#allocation8 + $0x20] sm:$0xff]   ;;  %vm4159_vm8 = vcmask 457728   ;;  %vm4162_vm9 = vcmask 523264   ;;  %vm4165_vm10 = vcmask 588800  }
  0x94   :  { %5103 = vmatprep.subr.bf16.mxu0 %v7410_v0  ;;  %5123 = vmatprep.subr.bf16.mxu1 %v7410_v0  ;;  %v5687_v25 = vld [vmem:[#allocation8 + $0x28] sm:$0xff]   ;;  %v5688_v26 = vld [vmem:[#allocation8 + $0x30] sm:$0xff]   ;;  %v5689_v27 = vld [vmem:[#allocation8 + $0x38] sm:$0xff]   ;;  %vm4168_vm11 = vcmask 654336   ;;  %vm4171_vm12 = vcmask 719872   ;;  %vm4174_vm13 = vcmask 785408  }
  0x95   :  { %v4764_v28 = vld [vmem:[%s7389_s2] ss:$0 sm:$0xff]  ;;  %s6083_s2 = smov 120   ;;  %vm4177_vm14 = vcmask 850944   ;;  %vm4180_vm15 = vcmask 916480  }
  0x96   :  { %v4773_v29 = vld [vmem:[%s7391_s4] ss:$0 sm:$0xff]  ;;  %s6084_s4 = smov 112  }
  0x97   :  { %5104 = vmatpush3.bf16.msra.mxu0 %v5670_v5  ;;  %5124 = vmatpush3.bf16.msra.mxu1 %v5671_v6  ;;  %v4782_v54 = vld [vmem:[%s7393_s6] ss:$0 sm:$0xff] }
  0x98   :  { %5105 = vmatprep.subr.bf16.mxu0 %v7410_v0  ;;  %5125 = vmatprep.subr.bf16.mxu1 %v7410_v0 }
  0x9b   :  { %5106 = vmatpush3.bf16.msra.mxu0 %v5672_v7  ;;  %5126 = vmatpush3.bf16.msra.mxu1 %v5673_v8 }
  0x9c   :  { %5107 = vmatprep.subr.bf16.mxu0 %v7410_v0  ;;  %5127 = vmatprep.subr.bf16.mxu1 %v7410_v0 }
  0x9f   :  { %5108 = vmatpush3.bf16.msra.mxu0 %v5674_v9  ;;  %5128 = vmatpush3.bf16.msra.mxu1 %v5675_v10 }
  0xa0   :  { %5109 = vmatprep.subr.bf16.mxu0 %v7410_v0  ;;  %5129 = vmatprep.subr.bf16.mxu1 %v7410_v0 }
  0xa3   :  { %5110 = vmatpush3.bf16.msra.mxu0 %v5676_v11  ;;  %5130 = vmatpush3.bf16.msra.mxu1 %v5677_v12 }
  0xa4   :  { %5111 = vmatprep.subr.bf16.mxu0 %v7410_v0  ;;  %5131 = vmatprep.subr.bf16.mxu1 %v7410_v0 }
  0xa7   :  { %5112 = vmatpush3.bf16.msra.mxu0 %v5678_v13  ;;  %5132 = vmatpush3.bf16.msra.mxu1 %v5679_v14 }
  0xa8   :  { %5113 = vmatprep.subr.bf16.mxu0 %v7410_v0  ;;  %5133 = vmatprep.subr.bf16.mxu1 %v7410_v0 }
  0xab   :  { %5114 = vmatpush3.bf16.msra.mxu0 %v5680_v15  ;;  %5134 = vmatpush3.bf16.msra.mxu1 %v5681_v18 }
  0xac   :  { %5139 = vmatprep.subr.bf16.mxu0 %v7410_v0  ;;  %5159 = vmatprep.subr.bf16.mxu1 %v7410_v0 }
  0xae   :  { %5116 = vmatmul.mubr.bf16.vlgmr.msra.gmra.mrb[0].mxu0 %v155_v20  ;;  %5136 = vmatmul.mubr.bf16.vlgmr.msra.gmra.mrb[0].mxu1 %v155_v20 }
  0xaf   :  { %5140 = vmatpush3.bf16.msra.mxu0 %v5682_v19  ;;  %5155 = vmatprep.mubr.msk.bf16.mxu0 %vm6082_vm0, %v7410_v0 }
  0xb0   :  { %5141 = vmatprep.subr.bf16.mxu0 %v7410_v0  ;;  %5161 = vmatprep.mubr.msk.bf16.mxu1 %vm6082_vm0, %v7410_v0 }
  0xb3   :  { %5142 = vmatpush3.bf16.msra.mxu0 %v5683_v21 }
  0xb4   :  { %5143 = vmatprep.subr.bf16.mxu0 %v7410_v0 }
  0xb7   :  { %5144 = vmatpush3.bf16.msra.mxu0 %v5684_v22 }
  0xb8   :  { %5145 = vmatprep.subr.bf16.mxu0 %v7410_v0 }
  0xbb   :  { %5146 = vmatpush3.bf16.msra.mxu0 %v5685_v23 }
  0xbc   :  { %5147 = vmatprep.subr.bf16.mxu0 %v7410_v0 }
  0xbf   :  { %5148 = vmatpush3.bf16.msra.mxu0 %v5686_v24 }
  0xc0   :  { %5149 = vmatprep.subr.bf16.mxu0 %v7410_v0 }
  0xc3   :  { %5150 = vmatpush3.bf16.msra.mxu0 %v5687_v25 }
  0xc4   :  { %5151 = vmatprep.subr.bf16.mxu0 %v7410_v0 }
  0xc7   :  { %5152 = vmatpush3.bf16.msra.mxu0 %v5688_v26 }
  0xc8   :  { %5153 = vmatprep.subr.bf16.mxu0 %v7410_v0 }
  0xcb   :  { %5154 = vmatpush3.bf16.msra.mxu0 %v5689_v27 }
  0xcc   :  { %5207 = vmatprep.subr.bf16.mxu0 %v7410_v0 }
  0xce   :  { %5156 = vmatmul.mubr.bf16.vlgmr.msra.gmra.mrb[4].mxu0 %v155_v20 }
  0xcf   :  { %5209 = vmatprep.mubr.msk.bf16.mxu0 %vm6082_vm0, %v7410_v0 }
 0x181   :  { %v261_v30 = vpop.f32.mrb[0].mxu0  ;;  %v376_v32 = vpop.f32.mrb[0].mxu1 }
 0x182   :  { %v262_v31 = vadd.f32 %v4764_v28, %v261_v30  ;;  %v5117_v33 = vpop.f32.mrb[1].mxu0  ;;  %v377_v34 = vadd.f32 %v4773_v29, %v376_v32  ;;  %v5137_v35 = vpop.f32.mrb[1].mxu1 }
 0x183   :  { %v264_v36 = vpop.f32.mrb[2].mxu0  ;;  %v379_v39 = vpop.f32.mrb[2].mxu1 }
 0x184   :  { %v268_v37 = vmul.f32 0.35355338, %v262_v31  ;;  %v265_v38 = vadd.f32 %v4764_v28, %v264_v36  ;;  %v5118_v40 = vpop.f32.mrb[3].mxu0  ;;  %v6349_v41 = vpack.c.bf16 %v377_v34, %v377_v34  ;;  %v380_v42 = vadd.f32 %v4773_v29, %v379_v39  ;;  %v5138_v43 = vpop.f32.mrb[3].mxu1 }
 0x186   :  { %v6351_v44 = vpack.c.bf16 %v268_v37, %v268_v37  ;;  %v269_v45 = vmul.f32 0.35355338, %v265_v38  ;;  %v6353_v46 = vpack.c.bf16 %v380_v42, %v380_v42  ;;  %567 = vrot.lane.b32.xlu0 %v6349_v41, %s6083_s2  ;;  %v697_v47 = vsel %vm692_vm1, %v6349_v41, 0 }
 0x187   :  { %5160 = vmatpush3.bf16.xpose.msra.mxu1 %v697_v47 }
 0x188   :  { %569 = vrot.lane.b32.xlu1 %v6353_v46, %s6083_s2  ;;  %5165 = vmatprep.subr.bf16.mxu1 %v7410_v0  ;;  %v6362_v48 = vpack.c.bf16 %v269_v45, %v269_v45  ;;  %v743_v49 = vsel %vm692_vm1, %v6353_v46, 0 }
 0x18a   :  { %502 = vrot.lane.b32.xlu0 %v6351_v44, %s6083_s2 }
 0x18c   :  { %504 = vrot.lane.b32.xlu1 %v6362_v48, %s6083_s2 }
 0x18e   :  { %571 = vrot.lane.b32.xlu0 %v6349_v41, %s6084_s4  ;;  %5162 = vmatmul.mubr.msk.bf16.vlgmr.msra.gmra.mrb[4].mxu1 %vm692_vm1, %v6351_v44 }
 0x18f   :  { %5166 = vmatpush3.bf16.xpose.msra.mxu1 %v743_v49  ;;  %5167 = vmatprep.mubr.msk.bf16.mxu1 %vm6082_vm0, %v7410_v0 }
 0x190   :  { %506 = vrot.lane.b32.xlu1 %v6351_v44, %s6084_s4  ;;  %5171 = vmatprep.subr.bf16.mxu1 %v7410_v0 }
 0x192   :  { %573 = vrot.lane.b32.xlu0 %v6353_v46, %s6084_s4 }
 0x194   :  { %508 = vrot.lane.b32.xlu1 %v6362_v48, %s6084_s4 }
 0x196   :  { %575 = vrot.lane.b32.xlu0 %v6349_v41, %s6085_s3  ;;  %5168 = vmatmul.mubr.msk.bf16.vlgmr.msra.gmra.mrb[8].mxu1 %vm692_vm1, %v6362_v48 }
 0x197   :  { %5173 = vmatprep.mubr.msk.bf16.mxu1 %vm6082_vm0, %v7410_v0 }
 0x198   :  { %510 = vrot.lane.b32.xlu1 %v6351_v44, %s6085_s3 }
 0x19a   :  { %577 = vrot.lane.b32.xlu0 %v6353_v46, %s6085_s3 }
 0x19c   :  { %581 = vrot.lane.b32.xlu1 %v6353_v46, %s6086_s22 }
 0x19e   :  { %579 = vrot.lane.b32.xlu0 %v6349_v41, %s6086_s22 }
 0x1a0   :  { %512 = vrot.lane.b32.xlu1 %v6362_v48, %s6085_s3 }
 0x1a1   :  { %v489_v50 = vpop.f32.mrb[4].mxu0 }
 0x1a2   :  { %v5157_v51 = vpop.f32.mrb[5].mxu0  ;;  %514 = vrot.lane.b32.xlu0 %v6351_v44, %s6086_s22  ;;  %v490_v57 = vadd.f32 %v4782_v54, %v489_v50 }
 0x1a3   :  { %v492_v52 = vpop.f32.mrb[6].mxu0 }
 0x1a4   :  { %v5158_v53 = vpop.f32.mrb[7].mxu0  ;;  %585 = vrot.lane.b32.xlu1 %v6353_v46, %s6087_s5  ;;  %v493_v55 = vadd.f32 %v4782_v54, %v492_v52  ;;  %v6498_v62 = vpack.c.bf16 %v490_v57, %v490_v57 }
 0x1a6   :  { %583 = vrot.lane.b32.xlu0 %v6349_v41, %s6087_s5  ;;  %v6493_v60 = vpack.c.bf16 %v493_v55, %v493_v55 }
 0x1a8   :  { %516 = vrot.lane.b32.xlu1 %v6362_v48, %s6086_s22 }
 0x1aa   :  { %518 = vrot.lane.b32.xlu0 %v6351_v44, %s6087_s5 }
 0x1ac   :  { %589 = vrot.lane.b32.xlu1 %v6353_v46, %s6088_s27 }
 0x1ae   :  { %587 = vrot.lane.b32.xlu0 %v6349_v41, %s6088_s27 }
 0x1b0   :  { %520 = vrot.lane.b32.xlu1 %v6362_v48, %s6087_s5 }
 0x1b2   :  { %522 = vrot.lane.b32.xlu0 %v6351_v44, %s6088_s27 }
 0x1b4   :  { %593 = vrot.lane.b32.xlu1 %v6353_v46, %s6089_s11 }
 0x1b6   :  { %591 = vrot.lane.b32.xlu0 %v6349_v41, %s6089_s11 }
 0x1b8   :  { %524 = vrot.lane.b32.xlu1 %v6362_v48, %s6088_s27 }
 0x1ba   :  { %526 = vrot.lane.b32.xlu0 %v6351_v44, %s6089_s11 }
 0x1bc   :  { %597 = vrot.lane.b32.xlu1 %v6353_v46, %s7418_s0 }
 0x1be   :  { %595 = vrot.lane.b32.xlu0 %v6349_v41, %s7418_s0 }
 0x1c0   :  { %528 = vrot.lane.b32.xlu1 %v6362_v48, %s6089_s11 }
 0x1c2   :  { %530 = vrot.lane.b32.xlu0 %v6351_v44, %s7418_s0 }
 0x1c4   :  { %601 = vrot.lane.b32.xlu1 %v6353_v46, %s6090_s23 }
 0x1c6   :  { %599 = vrot.lane.b32.xlu0 %v6349_v41, %s6090_s23 }
 0x1c8   :  { %532 = vrot.lane.b32.xlu1 %v6362_v48, %s7418_s0 }
 0x1ca   :  { %534 = vrot.lane.b32.xlu0 %v6351_v44, %s6090_s23 }
 0x1cc   :  { %605 = vrot.lane.b32.xlu1 %v6353_v46, %s6091_s28 }
 0x1ce   :  { %603 = vrot.lane.b32.xlu0 %v6349_v41, %s6091_s28 }
 0x1d0   :  { %536 = vrot.lane.b32.xlu1 %v6362_v48, %s6090_s23 }
 0x1d2   :  { %538 = vrot.lane.b32.xlu0 %v6351_v44, %s6091_s28 }
 0x1d4   :  { %609 = vrot.lane.b32.xlu1 %v6353_v46, %s6092_s24 }
 0x1d6   :  { %607 = vrot.lane.b32.xlu0 %v6349_v41, %s6092_s24 }
 0x1d8   :  { %540 = vrot.lane.b32.xlu1 %v6362_v48, %s6091_s28 }
 0x1da   :  { %542 = vrot.lane.b32.xlu0 %v6351_v44, %s6092_s24 }
 0x1dc   :  { %613 = vrot.lane.b32.xlu1 %v6353_v46, %s6093_s20 }
 0x1de   :  { %611 = vrot.lane.b32.xlu0 %v6349_v41, %s6093_s20 }
 0x1e0   :  { %544 = vrot.lane.b32.xlu1 %v6362_v48, %s6092_s24 }
 0x1e2   :  { %546 = vrot.lane.b32.xlu0 %v6351_v44, %s6093_s20 }
 0x1e4   :  { %617 = vrot.lane.b32.xlu1 %v6353_v46, %s6094_s17 }
 0x1e6   :  { %615 = vrot.lane.b32.xlu0 %v6349_v41, %s6094_s17 }
 0x1e8   :  { %548 = vrot.lane.b32.xlu1 %v6362_v48, %s6093_s20 }
 0x1ea   :  { %550 = vrot.lane.b32.xlu0 %v6351_v44, %s6094_s17 }
 0x1ec   :  { %621 = vrot.lane.b32.xlu1 %v6353_v46, %s6095_s30 }
 0x1ee   :  { %619 = vrot.lane.b32.xlu0 %v6349_v41, %s6095_s30 }
 0x1f0   :  { %552 = vrot.lane.b32.xlu1 %v6362_v48, %s6094_s17 }
 0x1f2   :  { %554 = vrot.lane.b32.xlu0 %v6351_v44, %s6095_s30 }
 0x1f4   :  { %556 = vrot.lane.b32.xlu1 %v6362_v48, %s6095_s30 }
 0x1f6   :  { %623 = vrot.lane.b32.xlu0 %v6349_v41, %s6077_s25 }
 0x1f8   :  { %v568_v56 = vpop.permute.xlu0 %567  ;;  %625 = vrot.lane.b32.xlu1 %v6353_v46, %s6077_s25 }
 0x1f9   :  { %v789_v58 = vsel %vm692_vm1, %v568_v56, 0 }
 0x1fa   :  { %v570_v59 = vpop.permute.xlu1 %569  ;;  %558 = vrot.lane.b32.xlu0 %v6351_v44, %s6077_s25  ;;  %5172 = vmatpush3.bf16.xpose.msra.mxu1 %v789_v58 }
 0x1fb   :  { %5177 = vmatprep.subr.bf16.mxu1 %v7410_v0  ;;  %v835_v2 = vsel %vm692_vm1, %v570_v59, 0 }
 0x1fc   :  { %v503_v61 = vpop.permute.xlu0 %502  ;;  %560 = vrot.lane.b32.xlu1 %v6362_v48, %s6077_s25 }
 0x1fe   :  { %v505_v63 = vpop.permute.xlu1 %504  ;;  %634 = vrot.lane.b32.xlu0 %v6493_v60, %s6083_s2 }
 0x200   :  { %v572_v1 = vpop.permute.xlu0 %571  ;;  %632 = vrot.lane.b32.xlu1 %v6498_v62, %s6083_s2 }
 0x201   :  { %5174 = vmatmul.mubr.msk.bf16.vlgmr.msra.gmra.mrb[12].mxu1 %vm692_vm1, %v503_v61  ;;  %v881_v7 = vsel %vm692_vm1, %v572_v1, 0 }
 0x202   :  { %v507_v3 = vpop.permute.xlu1 %506  ;;  %5178 = vmatpush3.bf16.xpose.msra.mxu1 %v835_v2  ;;  %5179 = vmatprep.mubr.msk.bf16.mxu1 %vm6082_vm0, %v7410_v0 }
 0x203   :  { %5183 = vmatprep.subr.bf16.mxu1 %v7410_v0  ;;  %638 = vrot.lane.b32.xlu0 %v6493_v60, %s6084_s4 }
 0x204   :  { %v574_v4 = vpop.permute.xlu0 %573  ;;  %636 = vrot.lane.b32.xlu1 %v6498_v62, %s6084_s4 }
 0x205   :  { %v927_v12 = vsel %vm692_vm1, %v574_v4, 0 }
 0x206   :  { %v509_v5 = vpop.permute.xlu1 %508 }
 0x207   :  { %642 = vrot.lane.b32.xlu0 %v6493_v60, %s6085_s3 }
 0x208   :  { %v576_v6 = vpop.permute.xlu0 %575  ;;  %640 = vrot.lane.b32.xlu1 %v6498_v62, %s6085_s3 }
 0x209   :  { %5180 = vmatmul.mubr.msk.bf16.vlgmr.msra.gmra.mrb[16].mxu1 %vm692_vm1, %v505_v63  ;;  %v973_v18 = vsel %vm692_vm1, %v576_v6, 0 }
 0x20a   :  { %v511_v8 = vpop.permute.xlu1 %510  ;;  %5184 = vmatpush3.bf16.xpose.msra.mxu1 %v881_v7  ;;  %5185 = vmatprep.mubr.msk.bf16.mxu1 %vm6082_vm0, %v7410_v0 }
 0x20b   :  { %5189 = vmatprep.subr.bf16.mxu1 %v7410_v0  ;;  %646 = vrot.lane.b32.xlu0 %v6493_v60, %s6086_s22 }
 0x20c   :  { %v578_v9 = vpop.permute.xlu0 %577  ;;  %644 = vrot.lane.b32.xlu1 %v6498_v62, %s6086_s22 }
 0x20d   :  { %v1019_v24 = vsel %vm692_vm1, %v578_v9, 0 }
 0x20e   :  { %v582_v10 = vpop.permute.xlu1 %581 }
 0x20f   :  { %650 = vrot.lane.b32.xlu0 %v6493_v60, %s6087_s5  ;;  %v1111_v30 = vsel %vm692_vm1, %v582_v10, 0 }
 0x210   :  { %v580_v11 = vpop.permute.xlu0 %579  ;;  %648 = vrot.lane.b32.xlu1 %v6498_v62, %s6087_s5 }
 0x211   :  { %v1065_v13 = vsel %vm692_vm1, %v580_v11, 0  ;;  %5186 = vmatmul.mubr.msk.bf16.vlgmr.msra.gmra.mrb[20].mxu1 %vm692_vm1, %v507_v3 }
 0x212   :  { %5208 = vmatpush3.bf16.xpose.msra.mxu0 %v1065_v13  ;;  %v513_v14 = vpop.permute.xlu1 %512  ;;  %5190 = vmatpush3.bf16.xpose.msra.mxu1 %v927_v12 }
 0x213   :  { %5191 = vmatprep.mubr.msk.bf16.mxu1 %vm6082_vm0, %v7410_v0  ;;  %5195 = vmatprep.subr.bf16.mxu1 %v7410_v0 }
 0x214   :  { %v515_v15 = vpop.permute.xlu0 %514  ;;  %5219 = vmatprep.subr.bf16.mxu0 %v7410_v0  ;;  %652 = vrot.lane.b32.xlu1 %v6498_v62, %s6088_s27 }
 0x215   :  { %654 = vrot.lane.b32.xlu0 %v6493_v60, %s6088_s27 }
 0x216   :  { %v586_v16 = vpop.permute.xlu1 %585 }
 0x217   :  { %v1203_v36 = vsel %vm692_vm1, %v586_v16, 0 }
 0x218   :  { %v584_v17 = vpop.permute.xlu0 %583  ;;  %656 = vrot.lane.b32.xlu1 %v6498_v62, %s6089_s11 }
 0x219   :  { %v1157_v19 = vsel %vm692_vm1, %v584_v17, 0  ;;  %5192 = vmatmul.mubr.msk.bf16.vlgmr.msra.gmra.mrb[24].mxu1 %vm692_vm1, %v509_v5  ;;  %5210 = vmatmul.mubr.msk.bf16.vlgmr.msra.gmra.mrb[8].mxu0 %vm692_vm1, %v515_v15 }
 0x21a   :  { %5220 = vmatpush3.bf16.xpose.msra.mxu0 %v1157_v19  ;;  %v517_v20 = vpop.permute.xlu1 %516  ;;  %5196 = vmatpush3.bf16.xpose.msra.mxu1 %v973_v18 }
 0x21b   :  { %5221 = vmatprep.mubr.msk.bf16.mxu0 %vm6082_vm0, %v7410_v0  ;;  %5197 = vmatprep.mubr.msk.bf16.mxu1 %vm6082_vm0, %v7410_v0 }
 0x21c   :  { %v519_v21 = vpop.permute.xlu0 %518  ;;  %5201 = vmatprep.subr.bf16.mxu1 %v7410_v0  ;;  %5231 = vmatprep.subr.bf16.mxu0 %v7410_v0 }
 0x21d   :  { %658 = vrot.lane.b32.xlu0 %v6493_v60, %s6089_s11  ;;  %660 = vrot.lane.b32.xlu1 %v6498_v62, %s7418_s0 }
 0x21e   :  { %v590_v22 = vpop.permute.xlu1 %589 }
 0x21f   :  { %v1295_v42 = vsel %vm692_vm1, %v590_v22, 0 }
 0x220   :  { %v588_v23 = vpop.permute.xlu0 %587 }
 0x221   :  { %v1249_v25 = vsel %vm692_vm1, %v588_v23, 0  ;;  %5198 = vmatmul.mubr.msk.bf16.vlgmr.msra.gmra.mrb[28].mxu1 %vm692_vm1, %v511_v8  ;;  %5222 = vmatmul.mubr.msk.bf16.vlgmr.msra.gmra.mrb[12].mxu0 %vm692_vm1, %v519_v21 }
 0x222   :  { %5232 = vmatpush3.bf16.xpose.msra.mxu0 %v1249_v25  ;;  %v521_v26 = vpop.permute.xlu1 %520  ;;  %5202 = vmatpush3.bf16.xpose.msra.mxu1 %v1019_v24 }
 0x223   :  { %5233 = vmatprep.mubr.msk.bf16.mxu0 %vm6082_vm0, %v7410_v0  ;;  %5203 = vmatprep.mubr.msk.bf16.mxu1 %vm6082_vm0, %v7410_v0 }
 0x224   :  { %v523_v27 = vpop.permute.xlu0 %522  ;;  %5213 = vmatprep.subr.bf16.mxu1 %v7410_v0  ;;  %5243 = vmatprep.subr.bf16.mxu0 %v7410_v0 }
 0x225   :  { %662 = vrot.lane.b32.xlu0 %v6493_v60, %s7418_s0  ;;  %664 = vrot.lane.b32.xlu1 %v6498_v62, %s6090_s23 }
 0x226   :  { %v594_v28 = vpop.permute.xlu1 %593 }
 0x227   :  { %v1387_v48 = vsel %vm692_vm1, %v594_v28, 0 }
 0x228   :  { %v592_v29 = vpop.permute.xlu0 %591 }
 0x229   :  { %v1341_v31 = vsel %vm692_vm1, %v592_v29, 0  ;;  %5204 = vmatmul.mubr.msk.bf16.vlgmr.msra.gmra.mrb[32].mxu1 %vm692_vm1, %v513_v14  ;;  %5234 = vmatmul.mubr.msk.bf16.vlgmr.msra.gmra.mrb[16].mxu0 %vm692_vm1, %v523_v27  ;;  %v2554_v29 = vsel %vm2552_vm2, %v6498_v62, 0 }
 0x22a   :  { %5244 = vmatpush3.bf16.xpose.msra.mxu0 %v1341_v31  ;;  %v525_v32 = vpop.permute.xlu1 %524  ;;  %5214 = vmatpush3.bf16.xpose.msra.mxu1 %v1111_v30 }
 0x22b   :  { %5245 = vmatprep.mubr.msk.bf16.mxu0 %vm6082_vm0, %v7410_v0  ;;  %5215 = vmatprep.mubr.msk.bf16.mxu1 %vm6082_vm0, %v7410_v0 }
 0x22c   :  { %v527_v33 = vpop.permute.xlu0 %526  ;;  %5225 = vmatprep.subr.bf16.mxu1 %v7410_v0  ;;  %5255 = vmatprep.subr.bf16.mxu0 %v7410_v0 }
 0x22d   :  { %666 = vrot.lane.b32.xlu0 %v6493_v60, %s6090_s23  ;;  %668 = vrot.lane.b32.xlu1 %v6498_v62, %s6091_s28 }
 0x22e   :  { %v598_v34 = vpop.permute.xlu1 %597 }
 0x22f   :  { %v1479_v54 = vsel %vm692_vm1, %v598_v34, 0 }
 0x230   :  { %v596_v35 = vpop.permute.xlu0 %595 }
 0x231   :  { %v1433_v37 = vsel %vm692_vm1, %v596_v35, 0  ;;  %5216 = vmatmul.mubr.msk.bf16.vlgmr.msra.gmra.mrb[36].mxu1 %vm692_vm1, %v517_v20  ;;  %5246 = vmatmul.mubr.msk.bf16.vlgmr.msra.gmra.mrb[20].mxu0 %vm692_vm1, %v527_v33 }
 0x232   :  { %5256 = vmatpush3.bf16.xpose.msra.mxu0 %v1433_v37  ;;  %v529_v38 = vpop.permute.xlu1 %528  ;;  %5226 = vmatpush3.bf16.xpose.msra.mxu1 %v1203_v36  ;;  %v2600_v36 = vsel %vm2552_vm2, %v6493_v60, 0 }
 0x233   :  { %5257 = vmatprep.mubr.msk.bf16.mxu0 %vm6082_vm0, %v7410_v0  ;;  %5227 = vmatprep.mubr.msk.bf16.mxu1 %vm6082_vm0, %v7410_v0 }
 0x234   :  { %v531_v39 = vpop.permute.xlu0 %530  ;;  %5237 = vmatprep.subr.bf16.mxu1 %v7410_v0  ;;  %5267 = vmatprep.subr.bf16.mxu0 %v7410_v0 }
 0x235   :  { %670 = vrot.lane.b32.xlu0 %v6493_v60, %s6091_s28  ;;  %672 = vrot.lane.b32.xlu1 %v6498_v62, %s6092_s24 }
 0x236   :  { %v602_v40 = vpop.permute.xlu1 %601 }
 0x237   :  { %v1571_v59 = vsel %vm692_vm1, %v602_v40, 0 }
 0x238   :  { %v600_v41 = vpop.permute.xlu0 %599 }
 0x239   :  { %v1525_v43 = vsel %vm692_vm1, %v600_v41, 0  ;;  %5228 = vmatmul.mubr.msk.bf16.vlgmr.msra.gmra.mrb[40].mxu1 %vm692_vm1, %v521_v26  ;;  %5258 = vmatmul.mubr.msk.bf16.vlgmr.msra.gmra.mrb[24].mxu0 %vm692_vm1, %v531_v39 }
 0x23a   :  { %5268 = vmatpush3.bf16.xpose.msra.mxu0 %v1525_v43  ;;  %v533_v44 = vpop.permute.xlu1 %532  ;;  %5238 = vmatpush3.bf16.xpose.msra.mxu1 %v1295_v42 }
 0x23b   :  { %5269 = vmatprep.mubr.msk.bf16.mxu0 %vm6082_vm0, %v7410_v0  ;;  %5239 = vmatprep.mubr.msk.bf16.mxu1 %vm6082_vm0, %v7410_v0 }
 0x23c   :  { %v535_v45 = vpop.permute.xlu0 %534  ;;  %5249 = vmatprep.subr.bf16.mxu1 %v7410_v0  ;;  %5279 = vmatprep.subr.bf16.mxu0 %v7410_v0 }
 0x23d   :  { %674 = vrot.lane.b32.xlu0 %v6493_v60, %s6092_s24  ;;  %676 = vrot.lane.b32.xlu1 %v6498_v62, %s6093_s20 }
 0x23e   :  { %v606_v46 = vpop.permute.xlu1 %605 }
 0x23f   :  { %v1663_v3 = vsel %vm692_vm1, %v606_v46, 0 }
 0x240   :  { %v604_v47 = vpop.permute.xlu0 %603 }
 0x241   :  { %v1617_v49 = vsel %vm692_vm1, %v604_v47, 0  ;;  %5240 = vmatmul.mubr.msk.bf16.vlgmr.msra.gmra.mrb[44].mxu1 %vm692_vm1, %v525_v32  ;;  %5270 = vmatmul.mubr.msk.bf16.vlgmr.msra.gmra.mrb[28].mxu0 %vm692_vm1, %v535_v45 }
 0x242   :  { %5280 = vmatpush3.bf16.xpose.msra.mxu0 %v1617_v49  ;;  %v537_v50 = vpop.permute.xlu1 %536  ;;  %5250 = vmatpush3.bf16.xpose.msra.mxu1 %v1387_v48 }
 0x243   :  { %5281 = vmatprep.mubr.msk.bf16.mxu0 %vm6082_vm0, %v7410_v0  ;;  %5251 = vmatprep.mubr.msk.bf16.mxu1 %vm6082_vm0, %v7410_v0 }
 0x244   :  { %v539_v51 = vpop.permute.xlu0 %538  ;;  %5261 = vmatprep.subr.bf16.mxu1 %v7410_v0  ;;  %5291 = vmatprep.subr.bf16.mxu0 %v7410_v0 }
 0x246   :  { %v610_v52 = vpop.permute.xlu1 %609 }
 0x247   :  { %v1755_v9 = vsel %vm692_vm1, %v610_v52, 0 }
 0x248   :  { %v608_v53 = vpop.permute.xlu0 %607 }
 0x249   :  { %v1709_v55 = vsel %vm692_vm1, %v608_v53, 0  ;;  %5252 = vmatmul.mubr.msk.bf16.vlgmr.msra.gmra.mrb[48].mxu1 %vm692_vm1, %v529_v38  ;;  %5282 = vmatmul.mubr.msk.bf16.vlgmr.msra.gmra.mrb[32].mxu0 %vm692_vm1, %v539_v51 }
 0x24a   :  { %5292 = vmatpush3.bf16.xpose.msra.mxu0 %v1709_v55  ;;  %5262 = vmatpush3.bf16.xpose.msra.mxu1 %v1479_v54  ;;  %v541_v57 = vpop.permute.xlu1 %540 }
 0x24b   :  { %5293 = vmatprep.mubr.msk.bf16.mxu0 %vm6082_vm0, %v7410_v0  ;;  %5263 = vmatprep.mubr.msk.bf16.mxu1 %vm6082_vm0, %v7410_v0 }
 0x24c   :  { %v543_v56 = vpop.permute.xlu0 %542  ;;  %5273 = vmatprep.subr.bf16.mxu1 %v7410_v0  ;;  %5303 = vmatprep.subr.bf16.mxu0 %v7410_v0 }
 0x24e   :  { %v614_v63 = vpop.permute.xlu1 %613 }
 0x24f   :  { %v1847_v19 = vsel %vm692_vm1, %v614_v63, 0 }
 0x250   :  { %v612_v58 = vpop.permute.xlu0 %611 }
 0x251   :  { %v1801_v61 = vsel %vm692_vm1, %v612_v58, 0  ;;  %5264 = vmatmul.mubr.msk.bf16.vlgmr.msra.gmra.mrb[52].mxu1 %vm692_vm1, %v533_v44  ;;  %5294 = vmatmul.mubr.msk.bf16.vlgmr.msra.gmra.mrb[36].mxu0 %vm692_vm1, %v543_v56 }
 0x252   :  { %5304 = vmatpush3.bf16.xpose.msra.mxu0 %v1801_v61  ;;  %5274 = vmatpush3.bf16.xpose.msra.mxu1 %v1571_v59  ;;  %v545_v5 = vpop.permute.xlu1 %544 }
 0x253   :  { %5305 = vmatprep.mubr.msk.bf16.mxu0 %vm6082_vm0, %v7410_v0  ;;  %5275 = vmatprep.mubr.msk.bf16.mxu1 %vm6082_vm0, %v7410_v0 }
 0x254   :  { %v547_v1 = vpop.permute.xlu0 %546  ;;  %5285 = vmatprep.subr.bf16.mxu1 %v7410_v0  ;;  %5315 = vmatprep.subr.bf16.mxu0 %v7410_v0 }
 0x256   :  { %v618_v7 = vpop.permute.xlu1 %617 }
 0x257   :  { %v1939_v28 = vsel %vm692_vm1, %v618_v7, 0 }
 0x258   :  { %v616_v2 = vpop.permute.xlu0 %615 }
 0x259   :  { %v1893_v4 = vsel %vm692_vm1, %v616_v2, 0  ;;  %5276 = vmatmul.mubr.msk.bf16.vlgmr.msra.gmra.mrb[56].mxu1 %vm692_vm1, %v537_v50  ;;  %5306 = vmatmul.mubr.msk.bf16.vlgmr.msra.gmra.mrb[40].mxu0 %vm692_vm1, %v547_v1 }
 0x25a   :  { %5316 = vmatpush3.bf16.xpose.msra.mxu0 %v1893_v4  ;;  %5286 = vmatpush3.bf16.xpose.msra.mxu1 %v1663_v3  ;;  %v549_v17 = vpop.permute.xlu1 %548 }
 0x25b   :  { %5317 = vmatprep.mubr.msk.bf16.mxu0 %vm6082_vm0, %v7410_v0  ;;  %5287 = vmatprep.mubr.msk.bf16.mxu1 %vm6082_vm0, %v7410_v0 }
 0x25c   :  { %v551_v6 = vpop.permute.xlu0 %550  ;;  %5297 = vmatprep.subr.bf16.mxu1 %v7410_v0  ;;  %5327 = vmatprep.subr.bf16.mxu0 %v7410_v0 }
 0x25e   :  { %v622_v25 = vpop.permute.xlu1 %621 }
 0x25f   :  { %v2031_v32 = vsel %vm692_vm1, %v622_v25, 0 }
 0x260   :  { %v620_v8 = vpop.permute.xlu0 %619 }
 0x261   :  { %v1985_v10 = vsel %vm692_vm1, %v620_v8, 0  ;;  %v6655_v11 = vpop.f32.mrb[4].mxu1  ;;  %5288 = vmatmul.mubr.msk.bf16.vlgmr.msra.gmra.mrb[60].mxu1 %vm692_vm1, %v541_v57  ;;  %5318 = vmatmul.mubr.msk.bf16.vlgmr.msra.gmra.mrb[44].mxu0 %vm692_vm1, %v551_v6 }
 0x262   :  { %v5163_v12 = vpop.f32.mrb[5].mxu1  ;;  %5328 = vmatpush3.bf16.xpose.msra.mxu0 %v1985_v10  ;;  %5298 = vmatpush3.bf16.xpose.msra.mxu1 %v1755_v9  ;;  %v2165_v13 = vsel %vm692_vm1, %v6655_v11, -inf  ;;  %v553_v30 = vpop.permute.xlu1 %552 }
 0x263   :  { %v736_v14 = vpop.f32.mrb[6].mxu1  ;;  %2166 = vmax.xlane.f32.xlu0 %v2165_v13  ;;  %5329 = vmatprep.mubr.msk.bf16.mxu0 %vm6082_vm0, %v7410_v0 }
 0x264   :  { %v555_v15 = vpop.permute.xlu0 %554  ;;  %v5164_v16 = vpop.f32.mrb[7].mxu1  ;;  %5299 = vmatprep.mubr.msk.bf16.mxu1 %vm6082_vm0, %v7410_v0  ;;  %5309 = vmatprep.subr.bf16.mxu1 %v7410_v0 }
 0x265   :  { %5339 = vmatprep.subr.bf16.mxu0 %v7410_v0 }
 0x266   :  { %v557_v31 = vpop.permute.xlu1 %556 }
 0x268   :  { %v624_v18 = vpop.permute.xlu0 %623 }
 0x269   :  { %v2077_v20 = vsel %vm692_vm1, %v624_v18, 0  ;;  %v6669_v21 = vpop.f32.mrb[8].mxu1  ;;  %5300 = vmatmul.mubr.msk.bf16.vlgmr.msra.gmra.mrb[64].mxu1 %vm692_vm1, %v545_v5  ;;  %5330 = vmatmul.mubr.msk.bf16.vlgmr.msra.gmra.mrb[48].mxu0 %vm692_vm1, %v555_v15 }
 0x26a   :  { %5340 = vmatpush3.bf16.xpose.msra.mxu0 %v2077_v20  ;;  %v5169_v22 = vpop.f32.mrb[9].mxu1  ;;  %5310 = vmatpush3.bf16.xpose.msra.mxu1 %v1847_v19  ;;  %v2168_v23 = vsel %vm692_vm1, %v6669_v21, -inf  ;;  %v626_v33 = vpop.permute.xlu1 %625 }
 0x26b   :  { %v782_v24 = vpop.f32.mrb[10].mxu1  ;;  %2169 = vmax.xlane.f32.xlu1 %v2168_v23  ;;  %5311 = vmatprep.mubr.msk.bf16.mxu1 %vm6082_vm0, %v7410_v0  ;;  %v2123_v34 = vsel %vm692_vm1, %v626_v33, 0 }
 0x26c   :  { %v5170_v26 = vpop.f32.mrb[11].mxu1  ;;  %5341 = vmatprep.mubr.msk.bf16.mxu0 %vm6082_vm0, %v7410_v0  ;;  %5321 = vmatprep.subr.bf16.mxu1 %v7410_v0  ;;  %v559_v27 = vpop.permute.xlu0 %558 }
 0x26d   :  { %5351 = vmatprep.subr.bf16.mxu0 %v7410_v0 }
 0x26e   :  { %v561_v35 = vpop.permute.xlu1 %560 }
 0x270   :  { %v6712_v39 = vpop.permute.xlu0 %634 }
 0x271   :  { %5312 = vmatmul.mubr.msk.bf16.vlgmr.msra.gmra.mrb[68].mxu1 %vm692_vm1, %v549_v17  ;;  %5342 = vmatmul.mubr.msk.bf16.vlgmr.msra.gmra.mrb[52].mxu0 %vm692_vm1, %v559_v27 }
 0x272   :  { %5322 = vmatpush3.bf16.xpose.msra.mxu1 %v1939_v28  ;;  %5352 = vmatpush3.bf16.msra.mxu0 %v2554_v29  ;;  %v6708_v37 = vpop.permute.xlu1 %632 }
 0x273   :  { %5323 = vmatprep.mubr.msk.bf16.mxu1 %vm6082_vm0, %v7410_v0  ;;  %5333 = vmatprep.subr.bf16.mxu1 %v7410_v0 }
 0x274   :  { %5353 = vmatprep.mubr.msk.bf16.mxu0 %vm6082_vm0, %v7410_v0  ;;  %5363 = vmatprep.subr.bf16.mxu0 %v7410_v0 }
 0x275   :  { %v6716_v41 = vpop.permute.xlu0 %638 }
 0x276   :  { %v6710_v38 = vpop.permute.xlu1 %636 }
 0x279   :  { %5324 = vmatmul.mubr.msk.bf16.vlgmr.msra.gmra.mrb[72].mxu1 %vm692_vm1, %v553_v30  ;;  %v6720_v43 = vpop.permute.xlu0 %642 }
 0x27a   :  { %5334 = vmatpush3.bf16.xpose.msra.mxu1 %v2031_v32  ;;  %5335 = vmatprep.mubr.msk.bf16.mxu1 %vm6082_vm0, %v7410_v0  ;;  %v6714_v40 = vpop.permute.xlu1 %640 }
 0x27b   :  { %5345 = vmatprep.subr.bf16.mxu1 %v7410_v0 }
 0x27d   :  { %v6724_v45 = vpop.permute.xlu0 %646 }
 0x27e   :  { %v6718_v42 = vpop.permute.xlu1 %644 }
 0x281   :  { %5336 = vmatmul.mubr.msk.bf16.vlgmr.msra.gmra.mrb[76].mxu1 %vm692_vm1, %v557_v31  ;;  %v6728_v47 = vpop.permute.xlu0 %650 }
 0x282   :  { %5346 = vmatpush3.bf16.xpose.msra.mxu1 %v2123_v34  ;;  %5347 = vmatprep.mubr.msk.bf16.mxu1 %vm6082_vm0, %v7410_v0  ;;  %v6722_v44 = vpop.permute.xlu1 %648 }
 0x283   :  { %5357 = vmatprep.subr.bf16.mxu1 %v7410_v0  ;;  %7419 = vst [vmem:[#allocation20_spill] sm:$0xff] %v6722_v44 }
 0x286   :  { %v6726_v46 = vpop.permute.xlu1 %652 }
 0x287   :  { %7420 = vst [vmem:[#allocation21_spill] sm:$0xff] %v6726_v46  ;;  %v6736_v54 = vpop.permute.xlu0 %654 }
 0x289   :  { %5348 = vmatmul.mubr.msk.bf16.vlgmr.msra.gmra.mrb[80].mxu1 %vm692_vm1, %v561_v35 }
 0x28a   :  { %5358 = vmatpush3.bf16.msra.mxu1 %v2600_v36  ;;  %5359 = vmatprep.mubr.msk.bf16.mxu1 %vm6082_vm0, %v7410_v0  ;;  %v6730_v48 = vpop.permute.xlu1 %656 }
 0x28b   :  { %5369 = vmatprep.subr.bf16.mxu1 %v7410_v0  ;;  %7421 = vst [vmem:[#allocation22_spill] sm:$0xff] %v6730_v48 }
 0x28f   :  { %v6738_v55 = vpop.permute.xlu1 %660  ;;  %v6744_v59 = vpop.permute.xlu0 %658 }
 0x290   :  { %7422 = vst [vmem:[#allocation23_spill] sm:$0xff] %v6738_v55 }
 0x297   :  { %v6746_v63 = vpop.permute.xlu1 %664  ;;  %v6748_v2 = vpop.permute.xlu0 %662 }
 0x298   :  { %7423 = vst [vmem:[#allocation24_spill] sm:$0xff] %v6746_v63  ;;  %7424 = vst [vmem:[#allocation25_spill] sm:$0xff] %v6748_v2 }
 0x29f   :  { %v6752_v4 = vpop.permute.xlu1 %668  ;;  %v6754_v8 = vpop.permute.xlu0 %666 }
 0x2a0   :  { %7425 = vst [vmem:[#allocation26_spill] sm:$0xff] %v6752_v4  ;;  %7426 = vst [vmem:[#allocation27_spill] sm:$0xff] %v6754_v8 }
 0x2a7   :  { %v6756_v9 = vpop.permute.xlu1 %672  ;;  %v6766_v22 = vpop.permute.xlu0 %670 }
 0x2a8   :  { %7427 = vst [vmem:[#allocation28_spill] sm:$0xff] %v6756_v9  ;;  %7428 = vst [vmem:[#allocation29_spill] sm:$0xff] %v6766_v22 }
 0x2af   :  { %v6768_v23 = vpop.permute.xlu1 %676  ;;  %v6779_v36 = vpop.permute.xlu0 %674 }
 0x2b0   :  { %7429 = vst [vmem:[#allocation30_spill] sm:$0xff] %v6768_v23  ;;  %7430 = vst [vmem:[#allocation31_spill] sm:$0xff] %v6779_v36 }
 0x2d4   :  { %v6732_v49 = vpop.f32.mrb[12].mxu1 }
 0x2d5   :  { %v5175_v50 = vpop.f32.mrb[13].mxu1  ;;  %v2171_v51 = vsel %vm692_vm1, %v6732_v49, -inf }
 0x2d6   :  { %v828_v52 = vpop.f32.mrb[14].mxu1  ;;  %2172 = vmax.xlane.f32.xlu0 %v2171_v51 }
 0x2d7   :  { %v5176_v53 = vpop.f32.mrb[15].mxu1 }
 0x2dc   :  { %v6740_v56 = vpop.f32.mrb[16].mxu1 }
 0x2dd   :  { %v5181_v57 = vpop.f32.mrb[17].mxu1  ;;  %v2174_v58 = vsel %vm692_vm1, %v6740_v56, -inf }
 0x2de   :  { %v874_v61 = vpop.f32.mrb[18].mxu1  ;;  %2175 = vmax.xlane.f32.xlu0 %v2174_v58 }
 0x2df   :  { %v5182_v1 = vpop.f32.mrb[19].mxu1 }
 0x2e4   :  { %v6750_v3 = vpop.f32.mrb[20].mxu1 }
 0x2e5   :  { %v5187_v5 = vpop.f32.mrb[21].mxu1  ;;  %v2177_v35 = vsel %vm692_vm1, %v6750_v3, -inf }
 0x2e6   :  { %v920_v6 = vpop.f32.mrb[22].mxu1 }
 0x2e7   :  { %v5188_v7 = vpop.f32.mrb[23].mxu1 }
 0x2ec   :  { %v6758_v10 = vpop.f32.mrb[24].mxu1  ;;  %v6760_v12 = vpop.f32.mrb[8].mxu0 }
 0x2ed   :  { %v5193_v13 = vpop.f32.mrb[25].mxu1  ;;  %v5211_v14 = vpop.f32.mrb[9].mxu0  ;;  %v2180_v15 = vsel %vm692_vm1, %v6758_v10, -inf  ;;  %v2189_v16 = vsel %vm692_vm1, %v6760_v12, -inf }
 0x2ee   :  { %v966_v17 = vpop.f32.mrb[26].mxu1  ;;  %2181 = vmax.xlane.f32.xlu0 %v2180_v15  ;;  %2190 = vmax.xlane.f32.xlu1 %v2189_v16  ;;  %v1104_v18 = vpop.f32.mrb[10].mxu0 }
 0x2ef   :  { %v5194_v19 = vpop.f32.mrb[27].mxu1  ;;  %v5212_v20 = vpop.f32.mrb[11].mxu0 }
 0x2f0   :  { %v2167_v7 = vpop.xlane.xlu0 %2166 }
 0x2f1   :  { %v2261_v13 = vsub.f32 %v6655_v11, %v2167_v7 }
 0x2f4   :  { %v6770_v24 = vpop.f32.mrb[28].mxu1  ;;  %v6772_v25 = vpop.f32.mrb[12].mxu0 }
 0x2f5   :  { %v5199_v26 = vpop.f32.mrb[29].mxu1  ;;  %v5223_v27 = vpop.f32.mrb[13].mxu0  ;;  %v2195_v28 = vsel %vm692_vm1, %v6772_v25, -inf }
 0x2f6   :  { %v1012_v29 = vpop.f32.mrb[30].mxu1  ;;  %2196 = vmax.xlane.f32.xlu1 %v2195_v28  ;;  %v1196_v30 = vpop.f32.mrb[14].mxu0 }
 0x2f7   :  { %v5200_v31 = vpop.f32.mrb[31].mxu1  ;;  %v5224_v32 = vpop.f32.mrb[15].mxu0  ;;  %v2293_v29 = vmul.f32 1.442695, %v2261_v13 }
 0x2f8   :  { %v2170_v33 = vpop.xlane.xlu1 %2169  ;;  %v2183_v31 = vsel %vm692_vm1, %v6770_v24, -inf }
 0x2f9   :  { %v2262_v34 = vsub.f32 %v6669_v21, %v2170_v33 }
 0x2fa   :  { %2178 = vmax.xlane.f32.xlu1 %v2177_v35 }
 0x2fb   :  { %v2295_v50 = vmul.f32 1.442695, %v2262_v34 }
 0x2fc   :  { %v6781_v51 = vpop.f32.mrb[32].mxu1  ;;  %v6783_v52 = vpop.f32.mrb[16].mxu0 }
 0x2fd   :  { %5738 = vpow2.f32 %v2295_v50  ;;  %v5205_v53 = vpop.f32.mrb[33].mxu1  ;;  %v5235_v57 = vpop.f32.mrb[17].mxu0  ;;  %v2186_v58 = vsel %vm692_vm1, %v6781_v51, -inf  ;;  %v2201_v21 = vsel %vm692_vm1, %v6783_v52, -inf }
 0x2fe   :  { %v1058_v61 = vpop.f32.mrb[34].mxu1  ;;  %2187 = vmax.xlane.f32.xlu0 %v2186_v58  ;;  %2202 = vmax.xlane.f32.xlu1 %v2201_v21  ;;  %v1288_v1 = vpop.f32.mrb[18].mxu0  ;;  %5740 = vpow2.f32 %v2293_v29 }
 0x2ff   :  { %v5206_v5 = vpop.f32.mrb[35].mxu1  ;;  %v5236_v6 = vpop.f32.mrb[19].mxu0 }
 0x304   :  { %v6790_v14 = vpop.f32.mrb[36].mxu1  ;;  %v6792_v15 = vpop.f32.mrb[20].mxu0 }
 0x305   :  { %v5217_v16 = vpop.f32.mrb[37].mxu1  ;;  %v5247_v17 = vpop.f32.mrb[21].mxu0  ;;  %v2192_v18 = vsel %vm692_vm1, %v6790_v14, -inf  ;;  %v2207_v19 = vsel %vm692_vm1, %v6792_v15, -inf }
 0x306   :  { %v1150_v20 = vpop.f32.mrb[38].mxu1  ;;  %2193 = vmax.xlane.f32.xlu0 %v2192_v18  ;;  %2208 = vmax.xlane.f32.xlu1 %v2207_v19  ;;  %v1380_v26 = vpop.f32.mrb[22].mxu0 }
 0x307   :  { %v6798_v27 = vpop.eup %5738  ;;  %v5218_v28 = vpop.f32.mrb[39].mxu1 }
 0x308   :  { %v5248_v11 = vpop.f32.mrb[23].mxu0  ;;  %v2360_v30 = vsel %vm692_vm1, %v6798_v27, 0.0  ;;  %v6820_v17 = vpop.eup %5740 }
 0x309   :  { %v2357_v28 = vsel %vm692_vm1, %v6820_v17, 0.0 }
 0x30a   :  { %2361 = vadd.xlane.f32.xlu0 %v2360_v30  ;;  %2184 = vmax.xlane.f32.xlu1 %v2183_v31 }
 0x30c   :  { %v6804_v32 = vpop.f32.mrb[40].mxu1  ;;  %v6806_v33 = vpop.f32.mrb[24].mxu0 }
 0x30d   :  { %v5229_v34 = vpop.f32.mrb[41].mxu1  ;;  %v5259_v35 = vpop.f32.mrb[25].mxu0  ;;  %v2198_v50 = vsel %vm692_vm1, %v6804_v32, -inf  ;;  %v2213_v53 = vsel %vm692_vm1, %v6806_v33, -inf }
 0x30e   :  { %v1242_v57 = vpop.f32.mrb[42].mxu1  ;;  %2199 = vmax.xlane.f32.xlu0 %v2198_v50  ;;  %2214 = vmax.xlane.f32.xlu1 %v2213_v53  ;;  %v1472_v58 = vpop.f32.mrb[26].mxu0 }
 0x30f   :  { %v5230_v21 = vpop.f32.mrb[43].mxu1  ;;  %v5260_v61 = vpop.f32.mrb[27].mxu0 }
 0x314   :  { %v6812_v1 = vpop.f32.mrb[44].mxu1  ;;  %v6814_v5 = vpop.f32.mrb[28].mxu0 }
 0x315   :  { %v5241_v6 = vpop.f32.mrb[45].mxu1  ;;  %v5271_v7 = vpop.f32.mrb[29].mxu0  ;;  %v2204_v13 = vsel %vm692_vm1, %v6812_v1, -inf  ;;  %v2219_v16 = vsel %vm692_vm1, %v6814_v5, -inf }
 0x316   :  { %v1334_v18 = vpop.f32.mrb[46].mxu1  ;;  %2205 = vmax.xlane.f32.xlu0 %v2204_v13  ;;  %2220 = vmax.xlane.f32.xlu1 %v2219_v16  ;;  %v1564_v19 = vpop.f32.mrb[30].mxu0 }
 0x317   :  { %v5242_v20 = vpop.f32.mrb[47].mxu1  ;;  %v5272_v26 = vpop.f32.mrb[31].mxu0 }
 0x31a   :  { %2358 = vadd.xlane.f32.xlu1 %v2357_v28 }
 0x31c   :  { %v6824_v11 = vpop.f32.mrb[48].mxu1  ;;  %v6826_v29 = vpop.f32.mrb[32].mxu0 }
 0x31d   :  { %v5253_v30 = vpop.f32.mrb[49].mxu1  ;;  %v5283_v31 = vpop.f32.mrb[33].mxu0  ;;  %v2210_v34 = vsel %vm692_vm1, %v6824_v11, -inf  ;;  %v2225_v35 = vsel %vm692_vm1, %v6826_v29, -inf }
 0x31e   :  { %v1426_v50 = vpop.f32.mrb[50].mxu1  ;;  %2211 = vmax.xlane.f32.xlu0 %v2210_v34  ;;  %2226 = vmax.xlane.f32.xlu1 %v2225_v35  ;;  %v1656_v53 = vpop.f32.mrb[34].mxu0 }
 0x31f   :  { %v5254_v57 = vpop.f32.mrb[51].mxu1  ;;  %v5284_v58 = vpop.f32.mrb[35].mxu0 }
 0x324   :  { %v6832_v21 = vpop.f32.mrb[52].mxu1  ;;  %v6834_v61 = vpop.f32.mrb[36].mxu0 }
 0x325   :  { %v5265_v6 = vpop.f32.mrb[53].mxu1  ;;  %v5295_v7 = vpop.f32.mrb[37].mxu0  ;;  %v2216_v13 = vsel %vm692_vm1, %v6832_v21, -inf  ;;  %v2231_v16 = vsel %vm692_vm1, %v6834_v61, -inf }
 0x326   :  { %v1518_v18 = vpop.f32.mrb[54].mxu1  ;;  %2217 = vmax.xlane.f32.xlu0 %v2216_v13  ;;  %2232 = vmax.xlane.f32.xlu1 %v2231_v16  ;;  %v1748_v19 = vpop.f32.mrb[38].mxu0 }
 0x327   :  { %v5266_v20 = vpop.f32.mrb[55].mxu1  ;;  %v5296_v26 = vpop.f32.mrb[39].mxu0 }
 0x32c   :  { %v6840_v28 = vpop.f32.mrb[56].mxu1  ;;  %v6842_v30 = vpop.f32.mrb[40].mxu0 }
 0x32d   :  { %v5277_v31 = vpop.f32.mrb[57].mxu1  ;;  %v5307_v34 = vpop.f32.mrb[41].mxu0  ;;  %v2222_v35 = vsel %vm692_vm1, %v6840_v28, -inf  ;;  %v2237_v50 = vsel %vm692_vm1, %v6842_v30, -inf }
 0x32e   :  { %v1610_v53 = vpop.f32.mrb[58].mxu1  ;;  %2223 = vmax.xlane.f32.xlu0 %v2222_v35  ;;  %2238 = vmax.xlane.f32.xlu1 %v2237_v50  ;;  %v1840_v57 = vpop.f32.mrb[42].mxu0 }
 0x32f   :  { %v5278_v58 = vpop.f32.mrb[59].mxu1  ;;  %v5308_v6 = vpop.f32.mrb[43].mxu0 }
 0x334   :  { %v6848_v7 = vpop.f32.mrb[60].mxu1  ;;  %v6850_v13 = vpop.f32.mrb[44].mxu0 }
 0x335   :  { %v5289_v16 = vpop.f32.mrb[61].mxu1  ;;  %v5319_v18 = vpop.f32.mrb[45].mxu0  ;;  %v2228_v19 = vsel %vm692_vm1, %v6848_v7, -inf  ;;  %v2243_v20 = vsel %vm692_vm1, %v6850_v13, -inf }
 0x336   :  { %v1702_v26 = vpop.f32.mrb[62].mxu1  ;;  %2229 = vmax.xlane.f32.xlu0 %v2228_v19  ;;  %2244 = vmax.xlane.f32.xlu1 %v2243_v20  ;;  %v1932_v31 = vpop.f32.mrb[46].mxu0 }
 0x337   :  { %v5290_v34 = vpop.f32.mrb[63].mxu1  ;;  %v5320_v35 = vpop.f32.mrb[47].mxu0 }
 0x33c   :  { %v6856_v50 = vpop.f32.mrb[64].mxu1  ;;  %v6858_v53 = vpop.f32.mrb[48].mxu0 }
 0x33d   :  { %v5301_v57 = vpop.f32.mrb[65].mxu1  ;;  %v5331_v58 = vpop.f32.mrb[49].mxu0  ;;  %v2234_v6 = vsel %vm692_vm1, %v6856_v50, -inf  ;;  %v2249_v16 = vsel %vm692_vm1, %v6858_v53, -inf }
 0x33e   :  { %v1794_v18 = vpop.f32.mrb[66].mxu1  ;;  %2235 = vmax.xlane.f32.xlu0 %v2234_v6  ;;  %2250 = vmax.xlane.f32.xlu1 %v2249_v16  ;;  %v2024_v19 = vpop.f32.mrb[50].mxu0 }
 0x33f   :  { %v5302_v20 = vpop.f32.mrb[67].mxu1  ;;  %v5332_v26 = vpop.f32.mrb[51].mxu0 }
 0x344   :  { %v6864_v31 = vpop.f32.mrb[68].mxu1  ;;  %v6866_v34 = vpop.f32.mrb[52].mxu0 }
 0x345   :  { %v5313_v35 = vpop.f32.mrb[69].mxu1  ;;  %v5343_v0 = vpop.f32.mrb[53].mxu0  ;;  %v2240_v57 = vsel %vm692_vm1, %v6864_v31, -inf  ;;  %v2255_v58 = vsel %vm692_vm1, %v6866_v34, -inf }
 0x346   :  { %v1886_v23 = vpop.f32.mrb[70].mxu1  ;;  %2241 = vmax.xlane.f32.xlu0 %v2240_v57  ;;  %2256 = vmax.xlane.f32.xlu1 %v2255_v58  ;;  %v2116_v6 = vpop.f32.mrb[54].mxu0 }
 0x347   :  { %v5314_v16 = vpop.f32.mrb[71].mxu1  ;;  %v5344_v18 = vpop.f32.mrb[55].mxu0 }
 0x34c   :  { %v6872_v19 = vpop.f32.mrb[72].mxu1 }
 0x34d   :  { %v5325_v20 = vpop.f32.mrb[73].mxu1  ;;  %v2246_v26 = vsel %vm692_vm1, %v6872_v19, -inf }
 0x34e   :  { %v1978_v35 = vpop.f32.mrb[74].mxu1  ;;  %2247 = vmax.xlane.f32.xlu0 %v2246_v26 }
 0x34f   :  { %v5326_v0 = vpop.f32.mrb[75].mxu1 }
 0x354   :  { %v6876_v9 = vpop.f32.mrb[76].mxu1 }
 0x355   :  { %v5337_v4 = vpop.f32.mrb[77].mxu1  ;;  %v2252_v23 = vsel %vm692_vm1, %v6876_v9, -inf }
 0x356   :  { %v2070_v57 = vpop.f32.mrb[78].mxu1  ;;  %2253 = vmax.xlane.f32.xlu0 %v2252_v23 }
 0x357   :  { %v5338_v58 = vpop.f32.mrb[79].mxu1 }
 0x35c   :  { %v6880_v6 = vpop.f32.mrb[80].mxu1 }
 0x35d   :  { %v5349_v16 = vpop.f32.mrb[81].mxu1  ;;  %v2258_v18 = vsel %vm692_vm1, %v6880_v6, -inf }
 0x35e   :  { %v2162_v20 = vpop.f32.mrb[82].mxu1  ;;  %2259 = vmax.xlane.f32.xlu0 %v2258_v18 }
 0x35f   :  { %v5350_v35 = vpop.f32.mrb[83].mxu1 }
 0x363   :  { %v2173_v26 = vpop.xlane.xlu0 %2172 }
 0x364   :  { %v2263_v0 = vsub.f32 %v6732_v49, %v2173_v26 }
 0x366   :  { %v2297_v63 = vmul.f32 1.442695, %v2263_v0 }
 0x368   :  { %5742 = vpow2.f32 %v2297_v63 }
 0x36b   :  { %v2176_v4 = vpop.xlane.xlu0 %2175 }
 0x36c   :  { %v2264_v55 = vsub.f32 %v6740_v56, %v2176_v4 }
 0x36e   :  { %v2299_v57 = vmul.f32 1.442695, %v2264_v55 }
 0x370   :  { %5744 = vpow2.f32 %v2299_v57 }
 0x372   :  { %v6886_v23 = vpop.eup %5742 }
 0x373   :  { %v2363_v58 = vsel %vm692_vm1, %v6886_v23, 0.0 }
 0x374   :  { %2364 = vadd.xlane.f32.xlu1 %v2363_v58 }
 0x37a   :  { %v6890_v16 = vpop.eup %5744 }
 0x37b   :  { %v2191_v18 = vpop.xlane.xlu1 %2190  ;;  %v2366_v20 = vsel %vm692_vm1, %v6890_v16, 0.0  ;;  %v2182_v26 = vpop.xlane.xlu0 %2181 }
 0x37c   :  { %v2269_v49 = vsub.f32 %v6760_v12, %v2191_v18  ;;  %2367 = vadd.xlane.f32.xlu0 %v2366_v20  ;;  %v2266_v20 = vsub.f32 %v6758_v10, %v2182_v26 }
 0x37e   :  { %v2309_v63 = vmul.f32 1.442695, %v2269_v49  ;;  %v2303_v49 = vmul.f32 1.442695, %v2266_v20 }
 0x380   :  { %5746 = vpow2.f32 %v2309_v63 }
 0x383   :  { %v2197_v56 = vpop.xlane.xlu1 %2196 }
 0x387   :  { %v2179_v55 = vpop.xlane.xlu1 %2178 }
 0x38a   :  { %v6895_v35 = vpop.eup %5746 }
 0x38b   :  { %7431 = vst [vmem:[#allocation32_spill] sm:$0xff] %v6895_v35  ;;  %v2381_v0 = vsel %vm692_vm1, %v6895_v35, 0.0  ;;  %v2188_v4 = vpop.xlane.xlu0 %2187  ;;  %v2203_v57 = vpop.xlane.xlu1 %2202 }
 0x38c   :  { %2382 = vadd.xlane.f32.xlu1 %v2381_v0  ;;  %v2268_v63 = vsub.f32 %v6781_v51, %v2188_v4  ;;  %v2692_v51 = vsel %vm2552_vm2, %v6712_v39, 0  ;;  %v7432_v4 = vmov 0.0  }
 0x38e   :  { %v2307_v48 = vmul.f32 1.442695, %v2268_v63  ;;  %v2273_v63 = vsub.f32 %v6783_v52, %v2203_v57  ;;  %v2646_v57 = vsel %vm2552_vm2, %v6708_v37, 0 }
 0x392   :  { %678 = vrot.lane.b32.xlu0 %v6493_v60, %s6093_s20 }
 0x393   :  { %v2194_v58 = vpop.xlane.xlu0 %2193  ;;  %v6901_v36 = vpop.xlane.xlu1 %2208 }
 0x394   :  { %v2270_v22 = vsub.f32 %v6790_v14, %v2194_v58  ;;  %v2271_v14 = vsub.f32 %v6772_v25, %v2197_v56  ;;  %v2265_v25 = vsub.f32 %v6750_v3, %v2179_v55 }
 0x396   :  { %v2311_v10 = vmul.f32 1.442695, %v2270_v22 }
 0x397   :  { %v2362_v12 = vpop.xlane.xlu0 %2361  ;;  %v6903_v18 = vpop.xlane.xlu1 %2184 }
 0x398   :  { %5748 = vrcp.f32 %v2362_v12 }
 0x399   :  { %5750 = vpow2.f32 %v2303_v49  ;;  %v2301_v49 = vmul.f32 1.442695, %v2265_v25 }
 0x39a   :  { %5752 = vpow2.f32 %v2307_v48 }
 0x39b   :  { %v6909_v0 = vpop.xlane.xlu1 %2214  ;;  %v2200_v44 = vpop.xlane.xlu0 %2199 }
 0x39c   :  { %v2272_v26 = vsub.f32 %v6804_v32, %v2200_v44 }
 0x39d   :  { %680 = vrot.lane.b32.xlu1 %v6498_v62, %s6094_s17 }
 0x39e   :  { %v2315_v48 = vmul.f32 1.442695, %v2272_v26 }
 0x3a2   :  { %v5749_v8 = vpop.eup %5748 }
 0x3a3   :  { %v6912_v46 = vpop.xlane.xlu1 %2220  ;;  %v2486_v12 = vmul.f32 %v5749_v8, %v6798_v27  ;;  %v2206_v35 = vpop.xlane.xlu0 %2205  ;;  %v2313_v27 = vmul.f32 1.442695, %v2271_v14  ;;  %v2267_v14 = vsub.f32 %v6770_v24, %v6903_v18 }
 0x3a4   :  { %v2274_v8 = vsub.f32 %v6812_v1, %v2206_v35  ;;  %v6924_v22 = vpop.eup %5750 }
 0x3a5   :  { %v2518_v2 = vpack.c.bf16 %v2486_v12, %v2486_v12  ;;  %v2372_v32 = vsel %vm692_vm1, %v6924_v22, 0.0  ;;  %v6930_v56 = vpop.eup %5752 }
 0x3a6   :  { %v2319_v39 = vmul.f32 1.442695, %v2274_v8 }
 0x3a7   :  { %v2359_v20 = vpop.xlane.xlu1 %2358  ;;  %5360 = vmatmul.mubr.msk.bf16.vlgmr.msra.gmra.mrb[84].mxu1 %vm692_vm1, %v2518_v2 }
 0x3a8   :  { %5370 = vmatpush3.bf16.msra.mxu1 %v2692_v51  ;;  %5754 = vrcp.f32 %v2359_v20  ;;  %5371 = vmatprep.mubr.msk.bf16.mxu1 %vm6082_vm0, %v7432_v4  ;;  %v2317_v51 = vmul.f32 1.442695, %v2273_v63 }
 0x3a9   :  { %5756 = vpow2.f32 %v2311_v10  ;;  %5381 = vmatprep.subr.bf16.mxu1 %v7432_v4  ;;  %v2275_v10 = vsub.f32 %v6792_v15, %v6901_v36 }
 0x3aa   :  { %5758 = vpow2.f32 %v2315_v48 }
 0x3ab   :  { %v2212_v44 = vpop.xlane.xlu0 %2211  ;;  %5760 = vpow2.f32 %v2313_v27  ;;  %v2321_v36 = vmul.f32 1.442695, %v2275_v10  ;;  %v2277_v27 = vsub.f32 %v6806_v33, %v6909_v0  ;;  %v2279_v33 = vsub.f32 %v6814_v5, %v6912_v46  ;;  %v2227_v0 = vpop.xlane.xlu1 %2226 }
 0x3ac   :  { %v2276_v2 = vsub.f32 %v6824_v11, %v2212_v44  ;;  %5762 = vpow2.f32 %v2319_v39  ;;  %v2378_v11 = vsel %vm692_vm1, %v6930_v56, 0.0  ;;  %v2305_v39 = vmul.f32 1.442695, %v2267_v14 }
 0x3ad   :  { %v2325_v18 = vmul.f32 1.442695, %v2277_v27  ;;  %v2329_v46 = vmul.f32 1.442695, %v2279_v33 }
 0x3ae   :  { %v2323_v1 = vmul.f32 1.442695, %v2276_v2 }
 0x3b0   :  { %5764 = vpow2.f32 %v2323_v1 }
 0x3b1   :  { %2373 = vadd.xlane.f32.xlu0 %v2372_v32  ;;  %5766 = vpow2.f32 %v2301_v49 }
 0x3b2   :  { %v5755_v58 = vpop.eup %5754 }
 0x3b3   :  { %v2218_v35 = vpop.xlane.xlu0 %2217  ;;  %v6936_v3 = vpop.eup %5756  ;;  %v2485_v55 = vmul.f32 %v5755_v58, %v6820_v17 }
 0x3b4   :  { %v2278_v12 = vsub.f32 %v6832_v21, %v2218_v35  ;;  %v2384_v52 = vsel %vm692_vm1, %v6936_v3, 0.0  ;;  %v6943_v21 = vpop.eup %5758 }
 0x3b5   :  { %2379 = vadd.xlane.f32.xlu0 %v2378_v11  ;;  %v2517_v20 = vpack.c.bf16 %v2485_v55, %v2485_v55  ;;  %v6951_v17 = vpop.eup %5760  ;;  %v2390_v48 = vsel %vm692_vm1, %v6943_v21, 0.0  ;;  %v2281_v11 = vsub.f32 %v6826_v29, %v2227_v0 }
 0x3b6   :  { %v2327_v26 = vmul.f32 1.442695, %v2278_v12  ;;  %v6958_v8 = vpop.eup %5762  ;;  %v2387_v24 = vsel %vm692_vm1, %v6951_v17, 0.0 }
 0x3b7   :  { %5354 = vmatmul.mubr.msk.bf16.vlgmr.msra.gmra.mrb[56].mxu0 %vm692_vm1, %v2517_v20  ;;  %v2396_v2 = vsel %vm692_vm1, %v6958_v8, 0.0 }
 0x3b8   :  { %5364 = vmatpush3.bf16.msra.mxu0 %v2646_v57  ;;  %5365 = vmatprep.mubr.msk.bf16.mxu0 %vm6082_vm0, %v7432_v4  ;;  %5768 = vpow2.f32 %v2327_v26  ;;  %v2333_v26 = vmul.f32 1.442695, %v2281_v11 }
 0x3b9   :  { %2385 = vadd.xlane.f32.xlu0 %v2384_v52  ;;  %5375 = vmatprep.subr.bf16.mxu0 %v7432_v4  ;;  %5770 = vpow2.f32 %v2317_v51 }
 0x3ba   :  { %5772 = vpow2.f32 %v2321_v36  ;;  %v6964_v25 = vpop.eup %5764 }
 0x3bb   :  { %v2224_v15 = vpop.xlane.xlu0 %2223  ;;  %v2402_v35 = vsel %vm692_vm1, %v6964_v25, 0.0 }
 0x3bc   :  { %v2280_v37 = vsub.f32 %v6840_v28, %v2224_v15  ;;  %v6968_v28 = vpop.eup %5766 }
 0x3bd   :  { %2391 = vadd.xlane.f32.xlu0 %v2390_v48  ;;  %v2369_v49 = vsel %vm692_vm1, %v6968_v28, 0.0 }
 0x3be   :  { %v2331_v44 = vmul.f32 1.442695, %v2280_v37 }
 0x3c0   :  { %5774 = vpow2.f32 %v2331_v44 }
 0x3c1   :  { %2397 = vadd.xlane.f32.xlu0 %v2396_v2  ;;  %2388 = vadd.xlane.f32.xlu1 %v2387_v24  ;;  %5776 = vpow2.f32 %v2305_v39 }
 0x3c2   :  { %v6975_v58 = vpop.eup %5768  ;;  %5778 = vpow2.f32 %v2325_v18 }
 0x3c3   :  { %v2230_v32 = vpop.xlane.xlu0 %2229  ;;  %v6979_v63 = vpop.eup %5770  ;;  %v2408_v5 = vsel %vm692_vm1, %v6975_v58, 0.0 }
 0x3c4   :  { %v2282_v1 = vsub.f32 %v6848_v7, %v2230_v32  ;;  %v6984_v7 = vpop.eup %5772  ;;  %v2393_v55 = vsel %vm692_vm1, %v6979_v63, 0.0 }
 0x3c5   :  { %2403 = vadd.xlane.f32.xlu0 %v2402_v35  ;;  %2370 = vadd.xlane.f32.xlu1 %v2369_v49  ;;  %v2399_v52 = vsel %vm692_vm1, %v6984_v7, 0.0 }
 0x3c6   :  { %v2335_v12 = vmul.f32 1.442695, %v2282_v1 }
 0x3c8   :  { %5780 = vpow2.f32 %v2335_v12 }
 0x3c9   :  { %2409 = vadd.xlane.f32.xlu0 %v2408_v5  ;;  %2394 = vadd.xlane.f32.xlu1 %v2393_v55  ;;  %5782 = vpow2.f32 %v2329_v46 }
 0x3ca   :  { %v6988_v10 = vpop.eup %5774  ;;  %5784 = vpow2.f32 %v2333_v26 }
 0x3cb   :  { %v2236_v20 = vpop.xlane.xlu0 %2235  ;;  %v2414_v51 = vsel %vm692_vm1, %v6988_v10, 0.0  ;;  %v6995_v57 = vpop.eup %5776 }
 0x3cc   :  { %v2284_v29 = vsub.f32 %v6856_v50, %v2236_v20  ;;  %v6997_v15 = vpop.eup %5778  ;;  %v2375_v14 = vsel %vm692_vm1, %v6995_v57, 0.0 }
 0x3cd   :  { %2415 = vadd.xlane.f32.xlu0 %v2414_v51  ;;  %2400 = vadd.xlane.f32.xlu1 %v2399_v52  ;;  %v2405_v27 = vsel %vm692_vm1, %v6997_v15, 0.0 }
 0x3ce   :  { %v2339_v36 = vmul.f32 1.442695, %v2284_v29 }
 0x3d0   :  { %5786 = vpow2.f32 %v2339_v36 }
 0x3d1   :  { %2376 = vadd.xlane.f32.xlu1 %v2375_v14 }
 0x3d2   :  { %v7001_v37 = vpop.eup %5780 }
 0x3d3   :  { %v2242_v48 = vpop.xlane.xlu0 %2241  ;;  %v2420_v50 = vsel %vm692_vm1, %v7001_v37, 0.0  ;;  %v7008_v39 = vpop.eup %5782 }
 0x3d4   :  { %v2286_v44 = vsub.f32 %v6864_v31, %v2242_v48  ;;  %2421 = vadd.xlane.f32.xlu0 %v2420_v50  ;;  %v7010_v24 = vpop.eup %5784  ;;  %v2411_v18 = vsel %vm692_vm1, %v7008_v39, 0.0 }
 0x3d5   :  { %2406 = vadd.xlane.f32.xlu1 %v2405_v27  ;;  %v2417_v1 = vsel %vm692_vm1, %v7010_v24, 0.0 }
 0x3d6   :  { %v2343_v2 = vmul.f32 1.442695, %v2286_v44 }
 0x3d8   :  { %5788 = vpow2.f32 %v2343_v2 }
 0x3d9   :  { %2412 = vadd.xlane.f32.xlu1 %v2411_v18 }
 0x3da   :  { %v7014_v32 = vpop.eup %5786 }
 0x3db   :  { %v2248_v33 = vpop.xlane.xlu0 %2247  ;;  %v2426_v31 = vsel %vm692_vm1, %v7014_v32, 0.0 }
 0x3dc   :  { %v2288_v0 = vsub.f32 %v6872_v19, %v2248_v33  ;;  %2427 = vadd.xlane.f32.xlu0 %v2426_v31  ;;  %v2233_v19 = vpop.xlane.xlu1 %2232 }
 0x3dd   :  { %2418 = vadd.xlane.f32.xlu1 %v2417_v1  ;;  %v2283_v20 = vsub.f32 %v6834_v61, %v2233_v19 }
 0x3de   :  { %v2347_v35 = vmul.f32 1.442695, %v2288_v0 }
 0x3df   :  { %v2337_v29 = vmul.f32 1.442695, %v2283_v20 }
 0x3e0   :  { %5790 = vpow2.f32 %v2347_v35  ;;  %v2239_v5 = vpop.xlane.xlu1 %2238 }
 0x3e1   :  { %v2285_v52 = vsub.f32 %v6842_v30, %v2239_v5 }
 0x3e2   :  { %v7021_v49 = vpop.eup %5788 }
 0x3e3   :  { %v2432_v12 = vsel %vm692_vm1, %v7021_v49, 0.0  ;;  %v2254_v36 = vpop.xlane.xlu0 %2253  ;;  %v2341_v48 = vmul.f32 1.442695, %v2285_v52 }
 0x3e4   :  { %2433 = vadd.xlane.f32.xlu0 %v2432_v12  ;;  %v2245_v55 = vpop.xlane.xlu1 %2244  ;;  %v2290_v18 = vsub.f32 %v6876_v9, %v2254_v36 }
 0x3e5   :  { %v2287_v50 = vsub.f32 %v6850_v13, %v2245_v55 }
 0x3e6   :  { %v2351_v35 = vmul.f32 1.442695, %v2290_v18 }
 0x3e7   :  { %v2345_v27 = vmul.f32 1.442695, %v2287_v50 }
 0x3e8   :  { %v2251_v26 = vpop.xlane.xlu1 %2250 }
 0x3e9   :  { %v2289_v2 = vsub.f32 %v6858_v53, %v2251_v26  ;;  %v2738_v53 = vsel %vm2552_vm2, %v6710_v38, 0  ;;  %v2784_v26 = vsel %vm2552_vm2, %v6716_v41, 0 }
 0x3ea   :  { %v7025_v11 = vpop.eup %5790 }
 0x3eb   :  { %v2438_v46 = vsel %vm692_vm1, %v7025_v11, 0.0  ;;  %v2260_v44 = vpop.xlane.xlu0 %2259  ;;  %v2349_v33 = vmul.f32 1.442695, %v2289_v2 }
 0x3ec   :  { %2439 = vadd.xlane.f32.xlu0 %v2438_v46  ;;  %v2257_v51 = vpop.xlane.xlu1 %2256  ;;  %v2292_v13 = vsub.f32 %v6880_v6, %v2260_v44 }
 0x3ed   :  { %v2291_v31 = vsub.f32 %v6866_v34, %v2257_v51 }
 0x3ee   :  { %682 = vrot.lane.b32.xlu1 %v6493_v60, %s6094_s17 }
 0x3ef   :  { %v2353_v46 = vmul.f32 1.442695, %v2291_v31 }
 0x401   :  { %v2365_v14 = vpop.xlane.xlu1 %2364 }
 0x402   :  { %5792 = vrcp.f32 %v2365_v14  ;;  %684 = vrot.lane.b32.xlu0 %v6498_v62, %s6095_s30 }
 0x403   :  { %5794 = vpow2.f32 %v2337_v29 }
 0x404   :  { %5796 = vpow2.f32 %v2341_v48 }
 0x409   :  { %v2368_v61 = vpop.xlane.xlu0 %2367 }
 0x40a   :  { %5798 = vrcp.f32 %v2368_v61 }
 0x40b   :  { %5800 = vpow2.f32 %v2345_v27 }
 0x40c   :  { %v5793_v30 = vpop.eup %5792  ;;  %5802 = vpow2.f32 %v2349_v33 }
 0x40d   :  { %v2487_v0 = vmul.f32 %v5793_v30, %v6886_v23  ;;  %v7040_v1 = vpop.eup %5794  ;;  %5804 = vpow2.f32 %v2351_v35  ;;  %v2355_v23 = vmul.f32 1.442695, %v2292_v13  ;;  %v7086_v50 = vpop.permute.xlu0 %678 }
 0x40e   :  { %v2423_v9 = vsel %vm692_vm1, %v7040_v1, 0.0  ;;  %v7050_v34 = vpop.eup %5796  ;;  %5806 = vpow2.f32 %v2353_v46 }
 0x40f   :  { %v2519_v12 = vpack.c.bf16 %v2487_v0, %v2487_v0  ;;  %v2429_v19 = vsel %vm692_vm1, %v7050_v34, 0.0  ;;  %5808 = vpow2.f32 %v2355_v23 }
 0x411   :  { %5366 = vmatmul.mubr.msk.bf16.vlgmr.msra.gmra.mrb[60].mxu0 %vm692_vm1, %v2519_v12 }
 0x412   :  { %5376 = vmatpush3.bf16.msra.mxu0 %v2738_v53  ;;  %5377 = vmatprep.mubr.msk.bf16.mxu0 %vm6082_vm0, %v7432_v4 }
 0x413   :  { %2424 = vadd.xlane.f32.xlu1 %v2423_v9  ;;  %5387 = vmatprep.subr.bf16.mxu0 %v7432_v4 }
 0x414   :  { %v5799_v6 = vpop.eup %5798 }
 0x415   :  { %v2488_v38 = vmul.f32 %v5799_v6, %v6890_v16  ;;  %v7056_v5 = vpop.eup %5800 }
 0x416   :  { %v2435_v20 = vsel %vm692_vm1, %v7056_v5, 0.0  ;;  %v7065_v16 = vpop.eup %5802 }
 0x417   :  { %2430 = vadd.xlane.f32.xlu1 %v2429_v19  ;;  %v2520_v55 = vpack.c.bf16 %v2488_v38, %v2488_v38  ;;  %v7068_v51 = vpop.eup %5804  ;;  %v2441_v29 = vsel %vm692_vm1, %v7065_v16, 0.0 }
 0x418   :  { %v7072_v41 = vpop.eup %5806  ;;  %v2444_v52 = vsel %vm692_vm1, %v7068_v51, 0.0 }
 0x419   :  { %5372 = vmatmul.mubr.msk.bf16.vlgmr.msra.gmra.mrb[88].mxu1 %vm692_vm1, %v2520_v55  ;;  %v7076_v36 = vpop.eup %5808  ;;  %v2447_v14 = vsel %vm692_vm1, %v7072_v41, 0.0  ;;  %v2383_v2 = vpop.xlane.xlu1 %2382 }
 0x41a   :  { %5382 = vmatpush3.bf16.msra.mxu1 %v2784_v26  ;;  %5383 = vmatprep.mubr.msk.bf16.mxu1 %vm6082_vm0, %v7432_v4  ;;  %v2450_v48 = vsel %vm692_vm1, %v7076_v36, 0.0 }
 0x41b   :  { %2436 = vadd.xlane.f32.xlu1 %v2435_v20  ;;  %5393 = vmatprep.subr.bf16.mxu1 %v7432_v4 }
 0x41d   :  { %v7091_v33 = vpop.permute.xlu1 %680 }
 0x41f   :  { %2442 = vadd.xlane.f32.xlu1 %v2441_v29 }
 0x421   :  { %2445 = vadd.xlane.f32.xlu0 %v2444_v52  ;;  %v2830_v52 = vsel %vm2552_vm2, %v6714_v40, 0 }
 0x423   :  { %2448 = vadd.xlane.f32.xlu1 %v2447_v14 }
 0x425   :  { %2451 = vadd.xlane.f32.xlu0 %v2450_v48 }
 0x434   :  { %686 = vrot.lane.b32.xlu1 %v6493_v60, %s6095_s30 }
 0x438   :  { %690 = vrot.lane.b32.xlu1 %v6493_v60, %s6077_s25  ;;  %v2876_v60 = vsel %vm2552_vm2, %v6720_v43, 0  ;;  %v2968_v43 = vsel %vm2552_vm2, %v6724_v45, 0  ;;  %v3060_v45 = vsel %vm2552_vm2, %v6728_v47, 0 }
 0x43b   :  { %688 = vrot.lane.b32.xlu0 %v6498_v62, %s6077_s25 }
 0x43e   :  { %v2374_v44 = vpop.xlane.xlu0 %2373 }
 0x43f   :  { %5810 = vrcp.f32 %v2374_v44 }
 0x442   :  { %v2380_v27 = vpop.xlane.xlu0 %2379 }
 0x443   :  { %5812 = vrcp.f32 %v2380_v27 }
 0x446   :  { %v2386_v61 = vpop.xlane.xlu0 %2385 }
 0x447   :  { %5814 = vrcp.f32 %v2386_v61 }
 0x449   :  { %v5811_v18 = vpop.eup %5810 }
 0x44a   :  { %v2490_v30 = vmul.f32 %v5811_v18, %v6924_v22  ;;  %v2392_v13 = vpop.xlane.xlu0 %2391  ;;  %v3244_v18 = vsel %vm2552_vm2, %v6744_v59, 0 }
 0x44b   :  { %5816 = vrcp.f32 %v2392_v13  ;;  %v7435_v13 = vld [vmem:[#allocation20_spill] sm:$0xff] }
 0x44c   :  { %v2522_v31 = vpack.c.bf16 %v2490_v30, %v2490_v30 }
 0x44d   :  { %v5813_v0 = vpop.eup %5812 }
 0x44e   :  { %5384 = vmatmul.mubr.msk.bf16.vlgmr.msra.gmra.mrb[92].mxu1 %vm692_vm1, %v2522_v31  ;;  %v2389_v62 = vpop.xlane.xlu1 %2388  ;;  %v2492_v35 = vmul.f32 %v5813_v0, %v6930_v56  ;;  %v2398_v9 = vpop.xlane.xlu0 %2397 }
 0x44f   :  { %5394 = vmatpush3.bf16.msra.mxu1 %v2876_v60  ;;  %5395 = vmatprep.mubr.msk.bf16.mxu1 %vm6082_vm0, %v7432_v4 }
 0x450   :  { %5405 = vmatprep.subr.bf16.mxu1 %v7432_v4  ;;  %v2524_v12 = vpack.c.bf16 %v2492_v35, %v2492_v35 }
 0x451   :  { %v5815_v53 = vpop.eup %5814 }
 0x452   :  { %v2371_v22 = vpop.xlane.xlu1 %2370  ;;  %v2494_v56 = vmul.f32 %v5815_v53, %v6936_v3  ;;  %v2404_v20 = vpop.xlane.xlu0 %2403 }
 0x453   :  { %5818 = vrcp.f32 %v2371_v22  ;;  %v3014_v22 = vsel %vm2552_vm2, %v7435_v13, 0 }
 0x454   :  { %5820 = vrcp.f32 %v2398_v9  ;;  %v2526_v6 = vpack.c.bf16 %v2494_v56, %v2494_v56 }
 0x455   :  { %v5817_v38 = vpop.eup %5816 }
 0x456   :  { %5396 = vmatmul.mubr.msk.bf16.vlgmr.msra.gmra.mrb[96].mxu1 %vm692_vm1, %v2524_v12  ;;  %v2395_v46 = vpop.xlane.xlu1 %2394  ;;  %v2496_v3 = vmul.f32 %v5817_v38, %v6943_v21  ;;  %v3152_v21 = vsel %vm2552_vm2, %v6736_v54, 0  ;;  %v2410_v14 = vpop.xlane.xlu0 %2409 }
 0x457   :  { %5406 = vmatpush3.bf16.msra.mxu1 %v2968_v43  ;;  %5407 = vmatprep.mubr.msk.bf16.mxu1 %vm6082_vm0, %v7432_v4 }
 0x458   :  { %5417 = vmatprep.subr.bf16.mxu1 %v7432_v4  ;;  %v2528_v47 = vpack.c.bf16 %v2496_v3, %v2496_v3 }
 0x45a   :  { %v7107_v23 = vpop.xlane.xlu1 %2400  ;;  %v2416_v31 = vpop.xlane.xlu0 %2415 }
 0x45d   :  { %v5819_v19 = vpop.eup %5818 }
 0x45e   :  { %5408 = vmatmul.mubr.msk.bf16.vlgmr.msra.gmra.mrb[100].mxu1 %vm692_vm1, %v2526_v6  ;;  %v2489_v55 = vmul.f32 %v5819_v19, %v6968_v28  ;;  %v2377_v26 = vpop.xlane.xlu1 %2376  ;;  %v5821_v28 = vpop.eup %5820  ;;  %v7436_v19 = vld [vmem:[#allocation27_spill] sm:$0xff] }
 0x45f   :  { %5418 = vmatpush3.bf16.msra.mxu1 %v3060_v45  ;;  %5419 = vmatprep.mubr.msk.bf16.mxu1 %vm6082_vm0, %v7432_v4  ;;  %5822 = vrcp.f32 %v2377_v26  ;;  %v2498_v40 = vmul.f32 %v5821_v28, %v6958_v8  ;;  %v2922_v8 = vsel %vm2552_vm2, %v6718_v42, 0 }
 0x460   :  { %5429 = vmatprep.subr.bf16.mxu1 %v7432_v4  ;;  %v2521_v29 = vpack.c.bf16 %v2489_v55, %v2489_v55  ;;  %5824 = vrcp.f32 %v2404_v20  ;;  %v7437_v55 = vld [vmem:[#allocation21_spill] sm:$0xff] }
 0x461   :  { %5826 = vrcp.f32 %v2383_v2  ;;  %v2530_v27 = vpack.c.bf16 %v2498_v40, %v2498_v40  ;;  %v2422_v53 = vpop.xlane.xlu0 %2421  ;;  %v3106_v26 = vsel %vm2552_vm2, %v7437_v55, 0  ;;  %v7438_v40 = vld [vmem:[#allocation29_spill] sm:$0xff] }
 0x462   :  { %5378 = vmatmul.mubr.msk.bf16.vlgmr.msra.gmra.mrb[64].mxu0 %vm692_vm1, %v2521_v29  ;;  %5828 = vrcp.f32 %v2410_v14  ;;  %v3520_v14 = vsel %vm2552_vm2, %v7438_v40, 0 }
 0x463   :  { %5388 = vmatpush3.bf16.msra.mxu0 %v2830_v52  ;;  %5389 = vmatprep.mubr.msk.bf16.mxu0 %vm6082_vm0, %v7432_v4  ;;  %5830 = vrcp.f32 %v2389_v62  ;;  %v7434_v62 = vld [vmem:[#allocation25_spill] sm:$0xff]  ;;  %v2407_v52 = vpop.xlane.xlu1 %2406 }
 0x464   :  { %5399 = vmatprep.subr.bf16.mxu0 %v7432_v4  ;;  %5832 = vrcp.f32 %v2416_v31  ;;  %v3336_v35 = vsel %vm2552_vm2, %v7434_v62, 0 }
 0x465   :  { %5834 = vrcp.f32 %v2395_v46 }
 0x466   :  { %5420 = vmatmul.mubr.msk.bf16.vlgmr.msra.gmra.mrb[104].mxu1 %vm692_vm1, %v2528_v47  ;;  %5836 = vrcp.f32 %v2422_v53 }
 0x467   :  { %5430 = vmatpush3.bf16.msra.mxu1 %v3152_v21  ;;  %5431 = vmatprep.mubr.msk.bf16.mxu1 %vm6082_vm0, %v7432_v4  ;;  %5838 = vrcp.f32 %v7107_v23 }
 0x468   :  { %5441 = vmatprep.subr.bf16.mxu1 %v7432_v4 }
 0x469   :  { %v5823_v48 = vpop.eup %5822  ;;  %v2428_v20 = vpop.xlane.xlu0 %2427 }
 0x46a   :  { %v2491_v44 = vmul.f32 %v5823_v48, %v6995_v57  ;;  %v5825_v2 = vpop.eup %5824  ;;  %v7433_v57 = vld [vmem:[#allocation32_spill] sm:$0xff]  ;;  %5840 = vrcp.f32 %v2428_v20 }
 0x46b   :  { %v5827_v54 = vpop.eup %5826  ;;  %v2500_v30 = vmul.f32 %v5825_v2, %v6964_v25  ;;  %5842 = vrcp.f32 %v2407_v52 }
 0x46c   :  { %v2523_v61 = vpack.c.bf16 %v2491_v44, %v2491_v44  ;;  %v2493_v0 = vmul.f32 %v5827_v54, %v7433_v57  ;;  %v5829_v59 = vpop.eup %5828  ;;  %v7440_v57 = vld [vmem:[#allocation31_spill] sm:$0xff] }
 0x46d   :  { %v2532_v42 = vpack.c.bf16 %v2500_v30, %v2500_v30  ;;  %v5831_v25 = vpop.eup %5830  ;;  %v2502_v12 = vmul.f32 %v5829_v59, %v6975_v58 }
 0x46e   :  { %5432 = vmatmul.mubr.msk.bf16.vlgmr.msra.gmra.mrb[108].mxu1 %vm692_vm1, %v2530_v27  ;;  %5390 = vmatmul.mubr.msk.bf16.vlgmr.msra.gmra.mrb[68].mxu0 %vm692_vm1, %v2523_v61  ;;  %v2525_v60 = vpack.c.bf16 %v2493_v0, %v2493_v0  ;;  %v2495_v43 = vmul.f32 %v5831_v25, %v6951_v17  ;;  %v5833_v56 = vpop.eup %5832  ;;  %v3428_v17 = vsel %vm2552_vm2, %v7436_v19, 0  ;;  %v2413_v61 = vpop.xlane.xlu1 %2412 }
 0x46f   :  { %5442 = vmatpush3.bf16.msra.mxu1 %v3244_v18  ;;  %5400 = vmatpush3.bf16.msra.mxu0 %v2922_v8  ;;  %v2534_v58 = vpack.c.bf16 %v2502_v12, %v2502_v12  ;;  %v5835_v38 = vpop.eup %5834  ;;  %v2504_v23 = vmul.f32 %v5833_v56, %v6988_v10 }
 0x470   :  { %5401 = vmatprep.mubr.msk.bf16.mxu0 %vm6082_vm0, %v7432_v4  ;;  %5411 = vmatprep.subr.bf16.mxu0 %v7432_v4  ;;  %v2527_v6 = vpack.c.bf16 %v2495_v43, %v2495_v43  ;;  %v2497_v29 = vmul.f32 %v5835_v38, %v6979_v63  ;;  %v5837_v28 = vpop.eup %5836  ;;  %v7439_v63 = vld [vmem:[#allocation22_spill] sm:$0xff]  ;;  %v3704_v43 = vsel %vm2552_vm2, %v7086_v50, 0 }
 0x471   :  { %5443 = vmatprep.mubr.msk.bf16.mxu1 %vm6082_vm0, %v7432_v4  ;;  %5453 = vmatprep.subr.bf16.mxu1 %v7432_v4  ;;  %v2536_v47 = vpack.c.bf16 %v2504_v23, %v2504_v23  ;;  %v5839_v21 = vpop.eup %5838  ;;  %v3198_v48 = vsel %vm2552_vm2, %v7439_v63, 0  ;;  %v2506_v44 = vmul.f32 %v5837_v28, %v7001_v37  ;;  %v2434_v27 = vpop.xlane.xlu0 %2433 }
 0x472   :  { %v2529_v10 = vpack.c.bf16 %v2497_v29, %v2497_v29  ;;  %v2499_v2 = vmul.f32 %v5839_v21, %v6984_v7  ;;  %5844 = vrcp.f32 %v2434_v27  ;;  %v3612_v7 = vsel %vm2552_vm2, %v7440_v57, 0  ;;  %v2419_v13 = vpop.xlane.xlu1 %2418 }
 0x473   :  { %5846 = vrcp.f32 %v2413_v61  ;;  %v2538_v37 = vpack.c.bf16 %v2506_v44, %v2506_v44 }
 0x474   :  { %v5841_v18 = vpop.eup %5840  ;;  %v2531_v30 = vpack.c.bf16 %v2499_v2, %v2499_v2 }
 0x475   :  { %v5843_v31 = vpop.eup %5842  ;;  %v2508_v25 = vmul.f32 %v5841_v18, %v7014_v32 }
 0x476   :  { %5444 = vmatmul.mubr.msk.bf16.vlgmr.msra.gmra.mrb[112].mxu1 %vm692_vm1, %v2532_v42  ;;  %5402 = vmatmul.mubr.msk.bf16.vlgmr.msra.gmra.mrb[72].mxu0 %vm692_vm1, %v2525_v60  ;;  %v7441_v42 = vld [vmem:[#allocation23_spill] sm:$0xff]  ;;  %v683_v50 = vpop.permute.xlu1 %682 }
 0x477   :  { %5454 = vmatpush3.bf16.msra.mxu1 %v3336_v35  ;;  %5412 = vmatpush3.bf16.msra.mxu0 %v3014_v22  ;;  %v3290_v59 = vsel %vm2552_vm2, %v7441_v42, 0  ;;  %v2501_v35 = vmul.f32 %v5843_v31, %v6997_v15  ;;  %v2540_v22 = vpack.c.bf16 %v2508_v25, %v2508_v25  ;;  %v7442_v15 = vld [vmem:[#allocation24_spill] sm:$0xff] }
 0x478   :  { %5413 = vmatprep.mubr.msk.bf16.mxu0 %vm6082_vm0, %v7432_v4  ;;  %5423 = vmatprep.subr.bf16.mxu0 %v7432_v4 }
 0x479   :  { %5455 = vmatprep.mubr.msk.bf16.mxu1 %vm6082_vm0, %v7432_v4  ;;  %5465 = vmatprep.subr.bf16.mxu1 %v7432_v4  ;;  %v2440_v62 = vpop.xlane.xlu0 %2439  ;;  %v2533_v32 = vpack.c.bf16 %v2501_v35, %v2501_v35 }
 0x47a   :  { %v7160_v46 = vpop.f32.mrb[84].mxu1  ;;  %5848 = vrcp.f32 %v2440_v62 }
 0x47b   :  { %v5361_v9 = vpop.f32.mrb[85].mxu1  ;;  %5850 = vrcp.f32 %v2419_v13 }
 0x47c   :  { %v2639_v45 = vpop.f32.mrb[86].mxu1  ;;  %v5845_v12 = vpop.eup %5844 }
 0x47d   :  { %v5362_v3 = vpop.f32.mrb[87].mxu1  ;;  %v5847_v53 = vpop.eup %5846  ;;  %v2510_v56 = vmul.f32 %v5845_v12, %v7021_v49  ;;  %v3796_v49 = vsel %vm2552_vm2, %v683_v50, 0  ;;  %v7443_v45 = vld [vmem:[#allocation26_spill] sm:$0xff] }
 0x47e   :  { %5456 = vmatmul.mubr.msk.bf16.vlgmr.msra.gmra.mrb[116].mxu1 %vm692_vm1, %v2534_v58  ;;  %5414 = vmatmul.mubr.msk.bf16.vlgmr.msra.gmra.mrb[76].mxu0 %vm692_vm1, %v2527_v6  ;;  %v3382_v58 = vsel %vm2552_vm2, %v7442_v15, 0  ;;  %v2503_v9 = vmul.f32 %v5847_v53, %v7008_v39  ;;  %v3474_v55 = vsel %vm2552_vm2, %v7443_v45, 0 }
 0x47f   :  { %5466 = vmatpush3.bf16.msra.mxu1 %v3428_v17  ;;  %5424 = vmatpush3.bf16.msra.mxu0 %v3106_v26  ;;  %v2542_v6 = vpack.c.bf16 %v2510_v56, %v2510_v56 }
 0x480   :  { %5425 = vmatprep.mubr.msk.bf16.mxu0 %vm6082_vm0, %v7432_v4  ;;  %5435 = vmatprep.subr.bf16.mxu0 %v7432_v4  ;;  %v2535_v19 = vpack.c.bf16 %v2503_v9, %v2503_v9 }
 0x481   :  { %5467 = vmatprep.mubr.msk.bf16.mxu1 %vm6082_vm0, %v7432_v4  ;;  %5477 = vmatprep.subr.bf16.mxu1 %v7432_v4 }
 0x484   :  { %v5849_v38 = vpop.eup %5848 }
 0x485   :  { %v5851_v17 = vpop.eup %5850  ;;  %v2512_v39 = vmul.f32 %v5849_v38, %v7025_v11  ;;  %v7444_v11 = vld [vmem:[#allocation28_spill] sm:$0xff] }
 0x486   :  { %5468 = vmatmul.mubr.msk.bf16.vlgmr.msra.gmra.mrb[120].mxu1 %vm692_vm1, %v2536_v47  ;;  %5426 = vmatmul.mubr.msk.bf16.vlgmr.msra.gmra.mrb[80].mxu0 %vm692_vm1, %v2529_v10  ;;  %v2505_v3 = vmul.f32 %v5851_v17, %v7010_v24  ;;  %v3566_v52 = vsel %vm2552_vm2, %v7444_v11, 0  ;;  %v685_v47 = vpop.permute.xlu0 %684 }
 0x487   :  { %5478 = vmatpush3.bf16.msra.mxu1 %v3520_v14  ;;  %5436 = vmatpush3.bf16.msra.mxu0 %v3198_v48  ;;  %v2544_v20 = vpack.c.bf16 %v2512_v39, %v2512_v39  ;;  %v7445_v48 = vld [vmem:[#allocation30_spill] sm:$0xff] }
 0x488   :  { %5437 = vmatprep.mubr.msk.bf16.mxu0 %vm6082_vm0, %v7432_v4  ;;  %5447 = vmatprep.subr.bf16.mxu0 %v7432_v4  ;;  %v2537_v29 = vpack.c.bf16 %v2505_v3, %v2505_v3  ;;  %v3658_v44 = vsel %vm2552_vm2, %v7445_v48, 0 }
 0x489   :  { %5479 = vmatprep.mubr.msk.bf16.mxu1 %vm6082_vm0, %v7432_v4  ;;  %5489 = vmatprep.subr.bf16.mxu1 %v7432_v4 }
 0x48a   :  { %v7190_v54 = vpop.f32.mrb[56].mxu0 }
 0x48b   :  { %v5355_v8 = vpop.f32.mrb[57].mxu0 }
 0x48c   :  { %v2593_v0 = vpop.f32.mrb[58].mxu0 }
 0x48d   :  { %v5356_v60 = vpop.f32.mrb[59].mxu0 }
 0x48e   :  { %5480 = vmatmul.mubr.msk.bf16.vlgmr.msra.gmra.mrb[124].mxu1 %vm692_vm1, %v2538_v37  ;;  %5438 = vmatmul.mubr.msk.bf16.vlgmr.msra.gmra.mrb[84].mxu0 %vm692_vm1, %v2531_v30  ;;  %v3750_v30 = vsel %vm2552_vm2, %v7091_v33, 0 }
 0x48f   :  { %5490 = vmatpush3.bf16.msra.mxu1 %v3612_v7  ;;  %5448 = vmatpush3.bf16.msra.mxu0 %v3290_v59 }
 0x490   :  { %5449 = vmatprep.mubr.msk.bf16.mxu0 %vm6082_vm0, %v7432_v4  ;;  %5459 = vmatprep.subr.bf16.mxu0 %v7432_v4 }
 0x491   :  { %5491 = vmatprep.mubr.msk.bf16.mxu1 %vm6082_vm0, %v7432_v4  ;;  %5501 = vmatprep.subr.bf16.mxu1 %v7432_v4 }
 0x496   :  { %5492 = vmatmul.mubr.msk.bf16.vlgmr.msra.gmra.mrb[128].mxu1 %vm692_vm1, %v2540_v22  ;;  %5450 = vmatmul.mubr.msk.bf16.vlgmr.msra.gmra.mrb[88].mxu0 %vm692_vm1, %v2533_v32 }
 0x497   :  { %5502 = vmatpush3.bf16.msra.mxu1 %v3704_v43  ;;  %5460 = vmatpush3.bf16.msra.mxu0 %v3382_v58 }
 0x498   :  { %5461 = vmatprep.mubr.msk.bf16.mxu0 %vm6082_vm0, %v7432_v4  ;;  %5471 = vmatprep.subr.bf16.mxu0 %v7432_v4 }
 0x499   :  { %5503 = vmatprep.mubr.msk.bf16.mxu1 %vm6082_vm0, %v7432_v4  ;;  %5513 = vmatprep.subr.bf16.mxu1 %v7432_v4 }
 0x49e   :  { %5504 = vmatmul.mubr.msk.bf16.vlgmr.msra.gmra.mrb[132].mxu1 %vm692_vm1, %v2542_v6  ;;  %5462 = vmatmul.mubr.msk.bf16.vlgmr.msra.gmra.mrb[92].mxu0 %vm692_vm1, %v2535_v19 }
 0x49f   :  { %5514 = vmatpush3.bf16.msra.mxu1 %v3796_v49  ;;  %5472 = vmatpush3.bf16.msra.mxu0 %v3474_v55 }
 0x4a0   :  { %v2425_v26 = vpop.xlane.xlu1 %2424  ;;  %5473 = vmatprep.mubr.msk.bf16.mxu0 %vm6082_vm0, %v7432_v4  ;;  %5483 = vmatprep.subr.bf16.mxu0 %v7432_v4 }
 0x4a1   :  { %5852 = vrcp.f32 %v2425_v26  ;;  %5515 = vmatprep.mubr.msk.bf16.mxu1 %vm6082_vm0, %v7432_v4  ;;  %5525 = vmatprep.subr.bf16.mxu1 %v7432_v4 }
 0x4a4   :  { %v2431_v23 = vpop.xlane.xlu1 %2430 }
 0x4a5   :  { %5854 = vrcp.f32 %v2431_v23 }
 0x4a6   :  { %5516 = vmatmul.mubr.msk.bf16.vlgmr.msra.gmra.mrb[136].mxu1 %vm692_vm1, %v2544_v20  ;;  %5474 = vmatmul.mubr.msk.bf16.vlgmr.msra.gmra.mrb[96].mxu0 %vm692_vm1, %v2537_v29 }
 0x4a7   :  { %5527 = vmatprep.mubr.msk.bf16.mxu1 %vm6082_vm0, %v7432_v4  ;;  %5484 = vmatpush3.bf16.msra.mxu0 %v3566_v52 }
 0x4a8   :  { %v2437_v24 = vpop.xlane.xlu1 %2436  ;;  %5485 = vmatprep.mubr.msk.bf16.mxu0 %vm6082_vm0, %v7432_v4  ;;  %5495 = vmatprep.subr.bf16.mxu0 %v7432_v4 }
 0x4a9   :  { %5856 = vrcp.f32 %v2437_v24 }
 0x4ab   :  { %v5853_v28 = vpop.eup %5852 }
 0x4ac   :  { %v2507_v10 = vmul.f32 %v5853_v28, %v7040_v1  ;;  %v2443_v21 = vpop.xlane.xlu1 %2442 }
 0x4ae   :  { %v2446_v40 = vpop.xlane.xlu0 %2445  ;;  %v2539_v14 = vpack.c.bf16 %v2507_v10, %v2507_v10 }
 0x4af   :  { %v5855_v63 = vpop.eup %5854  ;;  %5858 = vrcp.f32 %v2446_v40 }
 0x4b0   :  { %5486 = vmatmul.mubr.msk.bf16.vlgmr.msra.gmra.mrb[100].mxu0 %vm692_vm1, %v2539_v14  ;;  %v2449_v27 = vpop.xlane.xlu1 %2448  ;;  %v2509_v2 = vmul.f32 %v5855_v63, %v7050_v34 }
 0x4b1   :  { %5496 = vmatpush3.bf16.msra.mxu0 %v3658_v44  ;;  %5497 = vmatprep.mubr.msk.bf16.mxu0 %vm6082_vm0, %v7432_v4 }
 0x4b2   :  { %v2452_v61 = vpop.xlane.xlu0 %2451  ;;  %5507 = vmatprep.subr.bf16.mxu0 %v7432_v4  ;;  %v2541_v18 = vpack.c.bf16 %v2509_v2, %v2509_v2 }
 0x4b3   :  { %5860 = vrcp.f32 %v2452_v61  ;;  %v5857_v8 = vpop.eup %5856 }
 0x4b4   :  { %v687_v1 = vpop.permute.xlu1 %686  ;;  %5862 = vrcp.f32 %v2443_v21  ;;  %v2511_v34 = vmul.f32 %v5857_v8, %v7056_v5  ;;  %v3842_v5 = vsel %vm2552_vm2, %v685_v47, 0 }
 0x4b5   :  { %v3888_v37 = vsel %vm2552_vm2, %v687_v1, 0  ;;  %5864 = vrcp.f32 %v2449_v27 }
 0x4b6   :  { %5526 = vmatpush3.bf16.msra.mxu1 %v3888_v37  ;;  %v2543_v33 = vpack.c.bf16 %v2511_v34, %v2511_v34  ;;  %v689_v35 = vpop.permute.xlu0 %688 }
 0x4b7   :  { %5537 = vmatprep.subr.bf16.mxu1 %v7432_v4  ;;  %v3934_v12 = vsel %vm2552_vm2, %v689_v35, 0 }
 0x4b8   :  { %5498 = vmatmul.mubr.msk.bf16.vlgmr.msra.gmra.mrb[104].mxu0 %vm692_vm1, %v2541_v18  ;;  %v691_v7 = vpop.permute.xlu1 %690 }
 0x4b9   :  { %v5859_v31 = vpop.eup %5858  ;;  %5508 = vmatpush3.bf16.msra.mxu0 %v3750_v30  ;;  %5509 = vmatprep.mubr.msk.bf16.mxu0 %vm6082_vm0, %v7432_v4  ;;  %v3980_v59 = vsel %vm2552_vm2, %v691_v7, 0 }
 0x4ba   :  { %v2514_v57 = vmul.f32 %v5859_v31, %v7068_v51  ;;  %5519 = vmatprep.subr.bf16.mxu0 %v7432_v4 }
 0x4bc   :  { %v2546_v0 = vpack.c.bf16 %v2514_v57, %v2514_v57 }
 0x4bd   :  { %v5861_v42 = vpop.eup %5860 }
 0x4be   :  { %5528 = vmatmul.mubr.msk.bf16.vlgmr.msra.gmra.mrb[140].mxu1 %vm692_vm1, %v2546_v0  ;;  %v5863_v60 = vpop.eup %5862  ;;  %v2516_v51 = vmul.f32 %v5861_v42, %v7076_v36 }
 0x4bf   :  { %5538 = vmatpush3.bf16.msra.mxu1 %v3980_v59  ;;  %5539 = vmatprep.mubr.msk.bf16.mxu1 %vm6082_vm0, %v7432_v4  ;;  %v2513_v25 = vmul.f32 %v5863_v60, %v7065_v16  ;;  %v5865_v22 = vpop.eup %5864 }
 0x4c0   :  { %5510 = vmatmul.mubr.msk.bf16.vlgmr.msra.gmra.mrb[108].mxu0 %vm692_vm1, %v2543_v33  ;;  %v2548_v62 = vpack.c.bf16 %v2516_v51, %v2516_v51  ;;  %v2515_v36 = vmul.f32 %v5865_v22, %v7072_v41 }
 0x4c1   :  { %5520 = vmatpush3.bf16.msra.mxu0 %v3842_v5  ;;  %5521 = vmatprep.mubr.msk.bf16.mxu0 %vm6082_vm0, %v7432_v4  ;;  %v2545_v13 = vpack.c.bf16 %v2513_v25, %v2513_v25 }
 0x4c2   :  { %5531 = vmatprep.subr.bf16.mxu0 %v7432_v4  ;;  %v2547_v16 = vpack.c.bf16 %v2515_v36, %v2515_v36 }
 0x4c6   :  { %5540 = vmatmul.mubr.msk.bf16.vlgmr.msra.gmra.mrb[144].mxu1 %vm692_vm1, %v2548_v62 }
 0x4c8   :  { %5522 = vmatmul.mubr.msk.bf16.vlgmr.msra.gmra.mrb[112].mxu0 %vm692_vm1, %v2545_v13 }
 0x4c9   :  { %5532 = vmatpush3.bf16.msra.mxu0 %v3934_v12  ;;  %5533 = vmatprep.mubr.msk.bf16.mxu0 %vm6082_vm0, %v7432_v4 }
 0x4ca   :  { %5543 = vmatprep.subr.bf16.mxu0 %v7432_v4 }
 0x4d0   :  { %5534 = vmatmul.mubr.msk.bf16.vlgmr.msra.gmra.mrb[116].mxu0 %vm692_vm1, %v2547_v16 }
 0x4d1   :  { %5559 = vmatprep.mubr.msk.bf16.mxu0 %vm6082_vm0, %v7432_v4  ;;  %vm4183_vm0 = vcmask 982016  }
 0x4e4   :  { %v2682_v32 = vpop.f32.mrb[60].mxu0 }
 0x4e5   :  { %v5367_v53 = vpop.f32.mrb[61].mxu0 }
 0x4e6   :  { %v2685_v43 = vpop.f32.mrb[62].mxu0 }
 0x4e7   :  { %v5368_v15 = vpop.f32.mrb[63].mxu0 }
 0x4ec   :  { %v2728_v58 = vpop.f32.mrb[88].mxu1 }
 0x4ed   :  { %v5591_v56 = vpack.i.bf16 %v2728_v58, %v2682_v32  ;;  %v5373_v9 = vpop.f32.mrb[89].mxu1 }
 0x4ee   :  { %v2731_v50 = vpop.f32.mrb[90].mxu1 }
 0x4ef   :  { %v5374_v6 = vpop.f32.mrb[91].mxu1  ;;  %5592 = vrot.lane.b32.xlu0 %v5591_v56, %s6077_s25 }
 0x521   :  { %v2820_v41 = vpop.f32.mrb[92].mxu1 }
 0x522   :  { %v5385_v38 = vpop.f32.mrb[93].mxu1 }
 0x523   :  { %v2823_v19 = vpop.f32.mrb[94].mxu1 }
 0x524   :  { %v5386_v17 = vpop.f32.mrb[95].mxu1 }
 0x529   :  { %v2912_v49 = vpop.f32.mrb[96].mxu1 }
 0x52a   :  { %v5397_v45 = vpop.f32.mrb[97].mxu1 }
 0x52b   :  { %v2915_v55 = vpop.f32.mrb[98].mxu1 }
 0x52c   :  { %v5398_v39 = vpop.f32.mrb[99].mxu1 }
 0x531   :  { %v3004_v26 = vpop.f32.mrb[100].mxu1 }
 0x532   :  { %v5409_v3 = vpop.f32.mrb[101].mxu1 }
 0x533   :  { %v3007_v23 = vpop.f32.mrb[102].mxu1 }
 0x534   :  { %v5410_v20 = vpop.f32.mrb[103].mxu1 }
 0x535   :  { %v2774_v29 = vpop.f32.mrb[64].mxu0 }
 0x536   :  { %v5596_v11 = vpack.i.bf16 %v2820_v41, %v2774_v29  ;;  %v5379_v52 = vpop.f32.mrb[65].mxu0 }
 0x537   :  { %v2777_v24 = vpop.f32.mrb[66].mxu0 }
 0x538   :  { %5597 = vrot.lane.b32.xlu1 %v5596_v11, %s6095_s30  ;;  %v5380_v47 = vpop.f32.mrb[67].mxu0 }
 0x539   :  { %v3096_v28 = vpop.f32.mrb[104].mxu1 }
 0x53a   :  { %v5421_v10 = vpop.f32.mrb[105].mxu1 }
 0x53b   :  { %v3099_v21 = vpop.f32.mrb[106].mxu1 }
 0x53c   :  { %v5422_v40 = vpop.f32.mrb[107].mxu1 }
 0x541   :  { %v3188_v14 = vpop.f32.mrb[108].mxu1  ;;  %v2866_v63 = vpop.f32.mrb[68].mxu0 }
 0x542   :  { %v5433_v48 = vpop.f32.mrb[109].mxu1  ;;  %v5601_v44 = vpack.i.bf16 %v2912_v49, %v2866_v63  ;;  %v5391_v27 = vpop.f32.mrb[69].mxu0 }
 0x543   :  { %v3191_v2 = vpop.f32.mrb[110].mxu1  ;;  %v2869_v61 = vpop.f32.mrb[70].mxu0 }
 0x544   :  { %v5434_v1 = vpop.f32.mrb[111].mxu1  ;;  %5602 = vrot.lane.b32.xlu0 %v5601_v44, %s6094_s17  ;;  %v5392_v37 = vpop.f32.mrb[71].mxu0 }
 0x545   :  { %v5690_v37 = vld [vmem:[#allocation10] sm:$0xff]  }
 0x546   :  { %5544 = vmatpush3.bf16.msra.mxu0 %v5690_v37 }
 0x547   :  { %5545 = vmatprep.subr.bf16.mxu0 %v7432_v4 }
 0x549   :  { %v3280_v18 = vpop.f32.mrb[112].mxu1  ;;  %v2958_v8 = vpop.f32.mrb[72].mxu0 }
 0x54a   :  { %v5445_v30 = vpop.f32.mrb[113].mxu1  ;;  %v5606_v31 = vpack.i.bf16 %v3004_v26, %v2958_v8  ;;  %v5403_v34 = vpop.f32.mrb[73].mxu0 }
 0x54b   :  { %v3283_v57 = vpop.f32.mrb[114].mxu1  ;;  %v2961_v7 = vpop.f32.mrb[74].mxu0  ;;  %v5691_v34 = vld [vmem:[#allocation10 + $0x8] sm:$0xff]  }
 0x54c   :  { %v5446_v0 = vpop.f32.mrb[115].mxu1  ;;  %5607 = vrot.lane.b32.xlu1 %v5606_v31, %s6093_s20  ;;  %v5404_v42 = vpop.f32.mrb[75].mxu0  ;;  %5546 = vmatpush3.bf16.msra.mxu0 %v5691_v34 }
 0x54d   :  { %v5692_v42 = vld [vmem:[#allocation10 + $0x10] sm:$0xff]   ;;  %5547 = vmatprep.subr.bf16.mxu0 %v7432_v4 }
 0x550   :  { %5548 = vmatpush3.bf16.msra.mxu0 %v5692_v42 }
 0x551   :  { %v3372_v59 = vpop.f32.mrb[116].mxu1  ;;  %v3050_v33 = vpop.f32.mrb[76].mxu0  ;;  %5549 = vmatprep.subr.bf16.mxu0 %v7432_v4 }
 0x552   :  { %v5457_v60 = vpop.f32.mrb[117].mxu1  ;;  %v5611_v5 = vpack.i.bf16 %v3096_v28, %v3050_v33  ;;  %v5415_v51 = vpop.f32.mrb[77].mxu0 }
 0x553   :  { %v3375_v25 = vpop.f32.mrb[118].mxu1  ;;  %v3053_v62 = vpop.f32.mrb[78].mxu0  ;;  %v5693_v60 = vld [vmem:[#allocation10 + $0x18] sm:$0xff]  }
 0x554   :  { %v5458_v35 = vpop.f32.mrb[119].mxu1  ;;  %5612 = vrot.lane.b32.xlu0 %v5611_v5, %s6092_s24  ;;  %v5416_v13 = vpop.f32.mrb[79].mxu0  ;;  %5550 = vmatpush3.bf16.msra.mxu0 %v5693_v60  ;;  %v5694_v62 = vld [vmem:[#allocation10 + $0x20] sm:$0xff]  }
 0x555   :  { %5551 = vmatprep.subr.bf16.mxu0 %v7432_v4 }
 0x558   :  { %5552 = vmatpush3.bf16.msra.mxu0 %v5694_v62 }
 0x559   :  { %v3464_v22 = vpop.f32.mrb[120].mxu1  ;;  %v3142_v12 = vpop.f32.mrb[80].mxu0  ;;  %5553 = vmatprep.subr.bf16.mxu0 %v7432_v4 }
 0x55a   :  { %v5469_v36 = vpop.f32.mrb[121].mxu1  ;;  %v5616_v16 = vpack.i.bf16 %v3188_v14, %v3142_v12  ;;  %v5427_v32 = vpop.f32.mrb[81].mxu0 }
 0x55b   :  { %v3467_v53 = vpop.f32.mrb[122].mxu1  ;;  %v3145_v43 = vpop.f32.mrb[82].mxu0 }
 0x55c   :  { %v5470_v15 = vpop.f32.mrb[123].mxu1  ;;  %5617 = vrot.lane.b32.xlu1 %v5616_v16, %s6091_s28  ;;  %v5428_v58 = vpop.f32.mrb[83].mxu0  ;;  %v5695_v16 = vld [vmem:[#allocation10 + $0x28] sm:$0xff]  }
 0x55d   :  { %5554 = vmatpush3.bf16.msra.mxu0 %v5695_v16  ;;  %v5696_v58 = vld [vmem:[#allocation10 + $0x30] sm:$0xff]  }
 0x55e   :  { %5555 = vmatprep.subr.bf16.mxu0 %v7432_v4 }
 0x561   :  { %v3556_v56 = vpop.f32.mrb[124].mxu1  ;;  %v3234_v9 = vpop.f32.mrb[84].mxu0  ;;  %5556 = vmatpush3.bf16.msra.mxu0 %v5696_v58 }
 0x562   :  { %v5481_v50 = vpop.f32.mrb[125].mxu1  ;;  %v5621_v6 = vpack.i.bf16 %v3280_v18, %v3234_v9  ;;  %v5439_v41 = vpop.f32.mrb[85].mxu0  ;;  %5557 = vmatprep.subr.bf16.mxu0 %v7432_v4 }
 0x563   :  { %v3559_v38 = vpop.f32.mrb[126].mxu1  ;;  %v3237_v19 = vpop.f32.mrb[86].mxu0 }
 0x564   :  { %v5482_v17 = vpop.f32.mrb[127].mxu1  ;;  %5622 = vrot.lane.b32.xlu0 %v5621_v6, %s6090_s23  ;;  %v5440_v49 = vpop.f32.mrb[87].mxu0  ;;  %v5697_v38 = vld [vmem:[#allocation10 + $0x38] sm:$0xff]  }
 0x565   :  { %5558 = vmatpush3.bf16.msra.mxu0 %v5697_v38 }
 0x569   :  { %v3648_v45 = vpop.f32.mrb[128].mxu1  ;;  %v3326_v55 = vpop.f32.mrb[88].mxu0 }
 0x56a   :  { %v5493_v39 = vpop.f32.mrb[129].mxu1  ;;  %v5626_v26 = vpack.i.bf16 %v3372_v59, %v3326_v55  ;;  %v5451_v3 = vpop.f32.mrb[89].mxu0 }
 0x56b   :  { %v3651_v23 = vpop.f32.mrb[130].mxu1  ;;  %v3329_v20 = vpop.f32.mrb[90].mxu0 }
 0x56c   :  { %v5494_v29 = vpop.f32.mrb[131].mxu1  ;;  %5627 = vrot.lane.b32.xlu1 %v5626_v26, %s7418_s0  ;;  %v5452_v11 = vpop.f32.mrb[91].mxu0 }
 0x56d   :  { %v5593_v29 = vpop.permute.xlu0 %5592 }
 0x571   :  { %v3740_v52 = vpop.f32.mrb[132].mxu1  ;;  %v3418_v24 = vpop.f32.mrb[92].mxu0 }
 0x572   :  { %v5505_v47 = vpop.f32.mrb[133].mxu1  ;;  %v5631_v28 = vpack.i.bf16 %v3464_v22, %v3418_v24  ;;  %v5463_v10 = vpop.f32.mrb[93].mxu0 }
 0x573   :  { %v3743_v21 = vpop.f32.mrb[134].mxu1  ;;  %v3421_v40 = vpop.f32.mrb[94].mxu0  ;;  %v5595_v10 = vunpack.i.h.bf16 %v5593_v29 }
 0x574   :  { %v5506_v14 = vpop.f32.mrb[135].mxu1  ;;  %5632 = vrot.lane.b32.xlu0 %v5631_v28, %s6089_s11  ;;  %v5464_v63 = vpop.f32.mrb[95].mxu0  ;;  %v5594_v40 = vunpack.i.l.bf16 %v5593_v29 }
 0x579   :  { %v3832_v48 = vpop.f32.mrb[136].mxu1  ;;  %v3510_v44 = vpop.f32.mrb[96].mxu0 }
 0x57a   :  { %v5517_v27 = vpop.f32.mrb[137].mxu1  ;;  %v5636_v2 = vpack.i.bf16 %v3556_v56, %v3510_v44  ;;  %v5475_v61 = vpop.f32.mrb[97].mxu0  ;;  %v4143_v44 = vsel %vm692_vm1, %v7160_v46, %v5595_v10 }
 0x57b   :  { %v3835_v1 = vpop.f32.mrb[138].mxu1  ;;  %v3513_v18 = vpop.f32.mrb[98].mxu0 }
 0x57c   :  { %v5518_v8 = vpop.f32.mrb[139].mxu1  ;;  %5637 = vrot.lane.b32.xlu1 %v5636_v2, %s6088_s27  ;;  %v5476_v30 = vpop.f32.mrb[99].mxu0  ;;  %v4142_v1 = vsel %vm692_vm1, %v7190_v54, %v5594_v40 }
 0x583   :  { %v3602_v31 = vpop.f32.mrb[100].mxu0 }
 0x584   :  { %v5641_v57 = vpack.i.bf16 %v3648_v45, %v3602_v31  ;;  %v5487_v7 = vpop.f32.mrb[101].mxu0 }
 0x585   :  { %v3605_v0 = vpop.f32.mrb[102].mxu0 }
 0x586   :  { %5642 = vrot.lane.b32.xlu0 %v5641_v57, %s6087_s5  ;;  %v5488_v59 = vpop.f32.mrb[103].mxu0 }
 0x58b   :  { %v3694_v33 = vpop.f32.mrb[104].mxu0 }
 0x58c   :  { %v5646_v5 = vpack.i.bf16 %v3740_v52, %v3694_v33  ;;  %v5499_v51 = vpop.f32.mrb[105].mxu0 }
 0x58d   :  { %v3697_v25 = vpop.f32.mrb[106].mxu0 }
 0x58e   :  { %5647 = vrot.lane.b32.xlu1 %v5646_v5, %s6086_s22  ;;  %v5500_v35 = vpop.f32.mrb[107].mxu0 }
 0x591   :  { %v3924_v13 = vpop.f32.mrb[140].mxu1 }
 0x592   :  { %v5529_v22 = vpop.f32.mrb[141].mxu1 }
 0x593   :  { %v3786_v12 = vpop.f32.mrb[108].mxu0  ;;  %v3927_v36 = vpop.f32.mrb[142].mxu1 }
 0x594   :  { %v5651_v32 = vpack.i.bf16 %v3832_v48, %v3786_v12  ;;  %v5511_v53 = vpop.f32.mrb[109].mxu0  ;;  %v5530_v43 = vpop.f32.mrb[143].mxu1 }
 0x595   :  { %v3789_v15 = vpop.f32.mrb[110].mxu0 }
 0x596   :  { %5652 = vrot.lane.b32.xlu0 %v5651_v32, %s6085_s3  ;;  %v5512_v56 = vpop.f32.mrb[111].mxu0  ;;  %s6097_s3 = smov [#allocation14]  }
 0x597   :  { %s4749_s22 = sshll.u32 %s6097_s3, 4  ;;  %s4750_s22 = int_to_ptr.vmem [resolvable:$true] %s4749_s22 }
 0x598   :  { %s6038_s5 = scalar_lea.vmem %s4750_s22, 256  ;;  %p6043_p1 = scmp.lt.s32.totalorder %s4750_s22, %s4750_s22 }
 0x599   :  { %v4016_v9 = vpop.f32.mrb[144].mxu1  ;;  %p6039_p0 = scmp.ne.s32.totalorder %s4750_s22, %s6038_s5  ;;  %p6044_p2 = scmp.lt.s32.totalorder %s6038_s5, %s6038_s5 }
 0x59a   :  { %v5541_v50 = vpop.f32.mrb[145].mxu1 }
 0x59b   :  { %v3878_v6 = vpop.f32.mrb[112].mxu0  ;;  %v4019_v41 = vpop.f32.mrb[146].mxu1  ;;  %p6045_p3 = por %p6044_p2, %p6043_p1 }
 0x59c   :  { %v5656_v19 = vpack.i.bf16 %v3924_v13, %v3878_v6  ;;  %v5523_v17 = vpop.f32.mrb[113].mxu0  ;;  %v5542_v49 = vpop.f32.mrb[147].mxu1 }
 0x59d   :  { %v3881_v45 = vpop.f32.mrb[114].mxu0  ;;  %p6046_p4 = pnand %p6045_p3, %p6039_p0 }
 0x59e   :  { %5657 = vrot.lane.b32.xlu1 %v5656_v19, %s6084_s4  ;;  %v5524_v55 = vpop.f32.mrb[115].mxu0 }
 0x5a3   :  { %v3970_v39 = vpop.f32.mrb[116].mxu0 }
 0x5a4   :  { %v5661_v26 = vpack.i.bf16 %v4016_v9, %v3970_v39  ;;  %v5535_v3 = vpop.f32.mrb[117].mxu0 }
 0x5a5   :  { %v3973_v23 = vpop.f32.mrb[118].mxu0 }
 0x5a6   :  { %5662 = vrot.lane.b32.xlu0 %v5661_v26, %s6083_s2  ;;  %v5536_v20 = vpop.f32.mrb[119].mxu0 }
 0x5aa   :  { %v5598_v4 = vpop.permute.xlu1 %5597 }
 0x5ab   :  { %v5600_v14 = vunpack.i.h.bf16 %v5598_v4  ;;  %v5599_v63 = vunpack.i.l.bf16 %v5598_v4 }
 0x5ad   :  { %v4146_v31 = vsel %vm4144_vm3, %v4143_v44, %v5600_v14  ;;  %v4145_v34 = vsel %vm4144_vm3, %v4142_v1, %v5599_v63  ;;  %v5700_v44 = vld [vmem:[#allocation11 + $0x4] ss:$8 sps:$4 sm:$0xff]  }
 0x5ae   :  { %4455 = vmatprep.subr.bf16.mxu1 %v5700_v44  ;;  %v5730_v44 = vld [vmem:[#allocation13 + $0x60] sm:$0xff]  }
 0x5b6   :  { %v5603_v11 = vpop.permute.xlu0 %5602 }
 0x5b7   :  { %v5605_v27 = vunpack.i.h.bf16 %v5603_v11  ;;  %v5604_v2 = vunpack.i.l.bf16 %v5603_v11 }
 0x5b9   :  { %v4149_v0 = vsel %vm4147_vm4, %v4146_v31, %v5605_v27  ;;  %v4148_v42 = vsel %vm4147_vm4, %v4145_v34, %v5604_v2  ;;  %v4861_v27 = vld [vmem:[%s7395_s8] ss:$0 sm:$0xff]  ;;  %v5883_v34 = vld [vmem:[#allocation2 + $0x8] sm:$0xff] }
 0x5be   :  { %v5608_v52 = vpop.permute.xlu1 %5607 }
 0x5bf   :  { %v5610_v37 = vunpack.i.h.bf16 %v5608_v52  ;;  %v5609_v18 = vunpack.i.l.bf16 %v5608_v52 }
 0x5c1   :  { %v4152_v60 = vsel %vm4150_vm5, %v4149_v0, %v5610_v37  ;;  %v4151_v5 = vsel %vm4150_vm5, %v4148_v42, %v5609_v18  ;;  %v5882_v18 = vld [vmem:[#allocation2] sm:$0xff] }
 0x5c2   :  { %v5703_v0 = vld [vmem:[#allocation11 + $0x14] ss:$8 sps:$4 sm:$0xff]   ;;  %v5701_v42 = vld [vmem:[#allocation11 + $0x10] ss:$8 sps:$4 sm:$0xff]  }
 0x5c6   :  { %v5613_v24 = vpop.permute.xlu0 %5612 }
 0x5c7   :  { %v5615_v8 = vunpack.i.h.bf16 %v5613_v24  ;;  %v5614_v30 = vunpack.i.l.bf16 %v5613_v24 }
 0x5c9   :  { %v4155_v62 = vsel %vm4153_vm6, %v4152_v60, %v5615_v8  ;;  %v4154_v35 = vsel %vm4153_vm6, %v4151_v5, %v5614_v30  ;;  %v5707_v60 = vld [vmem:[#allocation11 + $0x30] ss:$8 sps:$4 sm:$0xff]   ;;  %v5712_v5 = vld [vmem:[#allocation11 + $0x44] ss:$8 sps:$4 sm:$0xff]  }
 0x5ce   :  { %v5618_v47 = vpop.permute.xlu1 %5617 }
 0x5cf   :  { %v5620_v57 = vunpack.i.h.bf16 %v5618_v47  ;;  %v5619_v46 = vunpack.i.l.bf16 %v5618_v47 }
 0x5d1   :  { %v4158_v12 = vsel %vm4156_vm7, %v4155_v62, %v5620_v57  ;;  %v4157_v36 = vsel %vm4156_vm7, %v4154_v35, %v5619_v46  ;;  %v6096_v62 = vmov 0   ;;  %v5713_v35 = vld [vmem:[#allocation11 + $0x50] ss:$8 sps:$4 sm:$0xff]  }
 0x5d2   :  { %4487 = vmatprep.mubr.bf16.mxu1 %v6096_v62 }
 0x5d6   :  { %v5623_v28 = vpop.permute.xlu0 %5622 }
 0x5d7   :  { %v5625_v54 = vunpack.i.h.bf16 %v5623_v28  ;;  %v5624_v59 = vunpack.i.l.bf16 %v5623_v28 }
 0x5d9   :  { %v4161_v43 = vsel %vm4159_vm8, %v4158_v12, %v5625_v54  ;;  %v4160_v15 = vsel %vm4159_vm8, %v4157_v36, %v5624_v59  ;;  %v5706_v54 = vld [vmem:[#allocation11 + $0x24] ss:$8 sps:$4 sm:$0xff]   ;;  %v5704_v59 = vld [vmem:[#allocation11 + $0x20] ss:$8 sps:$4 sm:$0xff]   ;;  %v5721_v12 = vld [vmem:[#allocation11 + $0x74] ss:$8 sps:$4 sm:$0xff]  }
 0x5da   :  { %v5719_v36 = vld [vmem:[#allocation11 + $0x70] ss:$8 sps:$4 sm:$0xff]  }
 0x5de   :  { %v5628_v21 = vpop.permute.xlu1 %5627 }
 0x5df   :  { %v5630_v51 = vunpack.i.h.bf16 %v5628_v21  ;;  %v5629_v25 = vunpack.i.l.bf16 %v5628_v21 }
 0x5e1   :  { %v4164_v50 = vsel %vm4162_vm9, %v4161_v43, %v5630_v51  ;;  %v4163_v6 = vsel %vm4162_vm9, %v4160_v15, %v5629_v25  ;;  %v5710_v51 = vld [vmem:[#allocation11 + $0x40] ss:$8 sps:$4 sm:$0xff]   ;;  %v5715_v25 = vld [vmem:[#allocation11 + $0x54] ss:$8 sps:$4 sm:$0xff]  }
 0x5e2   :  { %v5725_v43 = vld [vmem:[#allocation13 + $0x8] sm:$0xff]  }
 0x5e6   :  { %v5633_v48 = vpop.permute.xlu0 %5632 }
 0x5e7   :  { %v5635_v13 = vunpack.i.h.bf16 %v5633_v48  ;;  %v5634_v22 = vunpack.i.l.bf16 %v5633_v48  ;;  %v5698_v48 = vld [vmem:[#allocation11] ss:$8 sps:$4 sm:$0xff]  }
 0x5e8   :  { %4456 = vmatpush1.bf16.msra.mxu1 %v5698_v48  ;;  %v5729_v48 = vld [vmem:[#allocation13 + $0x18] sm:$0xff]  }
 0x5e9   :  { %v4167_v19 = vsel %vm4165_vm10, %v4164_v50, %v5635_v13  ;;  %v4166_v17 = vsel %vm4165_vm10, %v4163_v6, %v5634_v22  ;;  %4457 = vmatprep.subr.bf16.mxu1 %v5703_v0  ;;  %v5718_v13 = vld [vmem:[#allocation11 + $0x64] ss:$8 sps:$4 sm:$0xff]   ;;  %v5716_v22 = vld [vmem:[#allocation11 + $0x60] ss:$8 sps:$4 sm:$0xff]  }
 0x5ec   :  { %4458 = vmatpush1.bf16.msra.mxu1 %v5701_v42 }
 0x5ed   :  { %4459 = vmatprep.subr.bf16.mxu1 %v5706_v54 }
 0x5ee   :  { %v5638_v61 = vpop.permute.xlu1 %5637 }
 0x5ef   :  { %v5640_v16 = vunpack.i.h.bf16 %v5638_v61  ;;  %v5639_v32 = vunpack.i.l.bf16 %v5638_v61 }
 0x5f0   :  { %4460 = vmatpush1.bf16.msra.mxu1 %v5704_v59 }
 0x5f1   :  { %v4170_v55 = vsel %vm4168_vm11, %v4167_v19, %v5640_v16  ;;  %v4169_v39 = vsel %vm4168_vm11, %v4166_v17, %v5639_v32  ;;  %v5722_v16 = vld [vmem:[#allocation13 + $0x40] sm:$0xff]  }
 0x5f2   :  { %v5723_v32 = vld [vmem:[#allocation13] sm:$0xff]   ;;  %5077 = vmatprep.subr.bf16.mxu0 %v5722_v16 }
 0x5f8   :  { %v5643_v7 = vpop.permute.xlu0 %5642 }
 0x5f9   :  { %v5645_v58 = vunpack.i.h.bf16 %v5643_v7  ;;  %v5644_v56 = vunpack.i.l.bf16 %v5643_v7 }
 0x5fb   :  { %v4173_v23 = vsel %vm4171_vm12, %v4170_v55, %v5645_v58  ;;  %v4172_v20 = vsel %vm4171_vm12, %v4169_v39, %v5644_v56 }
 0x600   :  { %v5648_v33 = vpop.permute.xlu1 %5647 }
 0x601   :  { %v5650_v41 = vunpack.i.h.bf16 %v5648_v33  ;;  %v5649_v38 = vunpack.i.l.bf16 %v5648_v33  ;;  %v5709_v33 = vld [vmem:[#allocation11 + $0x34] ss:$8 sps:$4 sm:$0xff]  }
 0x602   :  { %4461 = vmatprep.subr.bf16.mxu1 %v5709_v33 }
 0x603   :  { %v4176_v29 = vsel %vm4174_vm13, %v4173_v23, %v5650_v41  ;;  %v4175_v4 = vsel %vm4174_vm13, %v4172_v20, %v5649_v38  ;;  %4462 = vmatpush1.bf16.msra.mxu1 %v5707_v60  ;;  %v4870_v23 = vld [vmem:[%s7396_s9] ss:$0 sm:$0xff] }
 0x604   :  { %4463 = vmatprep.subr.bf16.mxu1 %v5712_v5 }
 0x607   :  { %4464 = vmatpush1.bf16.msra.mxu1 %v5710_v51 }
 0x608   :  { %v5653_v53 = vpop.permute.xlu0 %5652  ;;  %4465 = vmatprep.subr.bf16.mxu1 %v5715_v25 }
 0x609   :  { %v5655_v49 = vunpack.i.h.bf16 %v5653_v53  ;;  %v5654_v45 = vunpack.i.l.bf16 %v5653_v53  ;;  %v5724_v53 = vld [vmem:[#allocation13 + $0x48] sm:$0xff]  }
 0x60b   :  { %v4179_v52 = vsel %vm4177_vm14, %v4176_v29, %v5655_v49  ;;  %v4178_v24 = vsel %vm4177_vm14, %v4175_v4, %v5654_v45  ;;  %4466 = vmatpush1.bf16.msra.mxu1 %v5713_v35 }
 0x60c   :  { %4467 = vmatprep.subr.bf16.mxu1 %v5718_v13 }
 0x60f   :  { %4468 = vmatpush1.bf16.msra.mxu1 %v5716_v22 }
 0x610   :  { %v5658_v9 = vpop.permute.xlu1 %5657  ;;  %4469 = vmatprep.subr.bf16.mxu1 %v5721_v12 }
 0x611   :  { %v5660_v26 = vunpack.i.h.bf16 %v5658_v9  ;;  %v5659_v3 = vunpack.i.l.bf16 %v5658_v9 }
 0x613   :  { %v4182_v10 = vsel %vm4180_vm15, %v4179_v52, %v5660_v26  ;;  %v4181_v21 = vsel %vm4180_vm15, %v4178_v24, %v5659_v3  ;;  %4470 = vmatpush1.bf16.msra.mxu1 %v5719_v36  ;;  %v4871_v24 = vld [vmem:[%s7397_s10] ss:$0 sm:$0xff] }
 0x618   :  { %v5663_v11 = vpop.permute.xlu0 %5662 }
 0x619   :  { %v5665_v47 = vunpack.i.h.bf16 %v5663_v11  ;;  %v5664_v28 = vunpack.i.l.bf16 %v5663_v11 }
 0x61b   :  { %v4185_v40 = vsel %vm4183_vm0, %v4182_v10, %v5665_v47  ;;  %v4184_v14 = vsel %vm4183_vm0, %v4181_v21, %v5664_v28 }
 0x61c   :  { %v4186_v63 = vpack.c.bf16 %v4185_v40, %v4184_v14  ;;  %v5726_v40 = vld [vmem:[#allocation13 + $0x50] sm:$0xff]  }
 0x61d   :  { %v5727_v14 = vld [vmem:[#allocation13 + $0x10] sm:$0xff]  }
 0x61e   :  { %5560 = vmatmul.mubr.bf16.vlgmr.msra.gmra.mrb[120].mxu0 %v4186_v63  ;;  %v5728_v63 = vld [vmem:[#allocation13 + $0x58] sm:$0xff]  }
 0x61f   :  { %5078 = vmatpush3.bf16.msra.mxu0 %v5723_v32 }
 0x620   :  { %5079 = vmatprep.subr.bf16.mxu0 %v5724_v53 }
 0x623   :  { %5080 = vmatpush3.bf16.msra.mxu0 %v5725_v43 }
 0x624   :  { %5081 = vmatprep.subr.bf16.mxu0 %v5726_v40 }
 0x627   :  { %5082 = vmatpush3.bf16.msra.mxu0 %v5727_v14 }
 0x628   :  { %5083 = vmatprep.subr.bf16.mxu0 %v5728_v63 }
 0x62b   :  { %5084 = vmatpush3.bf16.msra.mxu0 %v5729_v48 }
 0x62c   :  { %5085 = vmatprep.subr.bf16.mxu0 %v5730_v44 }
 0x6f1   :  { %v4292_v2 = vpop.f32.mrb[120].mxu0 }
 0x6f2   :  { %v4293_v61 = vadd.f32 %v4861_v27, %v4292_v2  ;;  %v5561_v1 = vpop.f32.mrb[121].mxu0  ;;  %v5732_v2 = vld [vmem:[#allocation13 + $0x68] sm:$0xff]  }
 0x6f3   :  { %v4295_v37 = vpop.f32.mrb[122].mxu0  ;;  %v5734_v1 = vld [vmem:[#allocation13 + $0x70] sm:$0xff]  }
 0x6f4   :  { %v7334_v8 = vadd.f32 %v5882_v18, %v4293_v61  ;;  %v4296_v30 = vadd.f32 %v4861_v27, %v4295_v37  ;;  %v5562_v31 = vpop.f32.mrb[123].mxu0  ;;  %v5731_v27 = vld [vmem:[#allocation13 + $0x20] sm:$0xff]   ;;  %v5733_v61 = vld [vmem:[#allocation13 + $0x28] sm:$0xff]   ;;  %v5735_v37 = vld [vmem:[#allocation13 + $0x30] sm:$0xff]  }
 0x6f5   :  { %5086 = vmatpush3.bf16.msra.mxu0 %v5731_v27  ;;  %v5736_v18 = vld [vmem:[#allocation13 + $0x78] sm:$0xff]  }
 0x6f6   :  { %v7336_v57 = vadd.f32 %v5883_v34, %v4296_v30  ;;  %4301 = vadd.xlane.f32.xlu1 %v7334_v8  ;;  %v4308_v7 = vmul.f32 %v7334_v8, %v7334_v8  ;;  %5087 = vmatprep.subr.bf16.mxu0 %v5732_v2  ;;  %v4365_v30 = vlaneseq }
 0x6f8   :  { %4303 = vadd.xlane.f32.xlu0 %v7336_v57  ;;  %v4309_v46 = vmul.f32 %v7336_v57, %v7336_v57  ;;  %v4366_v31 = vshrl.u32 %v4365_v30, 7 }
 0x6f9   :  { %5088 = vmatpush3.bf16.msra.mxu0 %v5733_v61 }
 0x6fa   :  { %4312 = vadd.xlane.f32.xlu1 %v4309_v46  ;;  %5089 = vmatprep.subr.bf16.mxu0 %v5734_v1  ;;  %v4367_v34 = vsub.s32 0, %v4366_v31  ;;  %v4371_v46 = vsub.s32 1, %v4366_v31 }
 0x6fc   :  { %4310 = vadd.xlane.f32.xlu0 %v4308_v7 }
 0x6fd   :  { %5090 = vmatpush3.bf16.msra.mxu0 %v5735_v37 }
 0x6fe   :  { %5091 = vmatprep.subr.bf16.mxu0 %v5736_v18 }
 0x783   :  { %v4302_v15 = vpop.xlane.xlu1 %4301 }
 0x784   :  { %v4306_v56 = vmul.f32 0.0078125, %v4302_v15 }
 0x785   :  { %v4304_v58 = vpop.xlane.xlu0 %4303 }
 0x786   :  { %v4307_v9 = vmul.f32 0.0078125, %v4304_v58  ;;  %v4316_v19 = vmul.f32 %v4306_v56, %v4306_v56  ;;  %v4324_v20 = vsub.f32 %v7334_v8, %v4306_v56  ;;  %v5737_v8 = vld [vmem:[#allocation13 + $0x38] sm:$0xff]  }
 0x787   :  { %v4313_v50 = vpop.xlane.xlu1 %4312  ;;  %5092 = vmatpush3.bf16.msra.mxu0 %v5737_v8 }
 0x788   :  { %v4317_v6 = vmul.f32 %v4307_v9, %v4307_v9  ;;  %v4315_v41 = vmul.f32 0.0078125, %v4313_v50  ;;  %v4325_v26 = vsub.f32 %v7336_v57, %v4307_v9  ;;  %v4363_v57 = vld [vmem:[%s7399_s12] sm:$0x3] }
 0x789   :  { %v4311_v38 = vpop.xlane.xlu0 %4310  ;;  %v4368_v7 = vrot.slane %v4363_v57, %v4367_v34  ;;  %v4372_v0 = vrot.slane %v4363_v57, %v4371_v46  ;;  %v4905_v34 = vld [vmem:[%s7402_s15] ss:$0 sm:$0xff] }
 0x78a   :  { %v4319_v17 = vsub.f32 %v4315_v41, %v4317_v6  ;;  %v4314_v49 = vmul.f32 0.0078125, %v4311_v38 }
 0x78c   :  { %v4321_v45 = vadd.f32 1e-12, %v4319_v17  ;;  %v4318_v55 = vsub.f32 %v4314_v49, %v4316_v19 }
 0x78e   :  { %5866 = vrsqrt.f32 %v4321_v45  ;;  %v4320_v39 = vadd.f32 1e-12, %v4318_v55 }
 0x790   :  { %5868 = vrsqrt.f32 %v4320_v39  ;;  %v4888_v39 = vld [vmem:[%s7401_s14] ss:$0 sm:$0xff] }
 0x798   :  { %v5867_v3 = vpop.eup %5866 }
 0x799   :  { %v4327_v29 = vmul.f32 %v5867_v3, %v4325_v26 }
 0x79a   :  { %v5869_v4 = vpop.eup %5868 }
 0x79b   :  { %v4326_v11 = vmul.f32 %v5869_v4, %v4324_v20  ;;  %v4336_v52 = vmul.f32 %v4870_v23, %v4327_v29 }
 0x79d   :  { %v4335_v47 = vmul.f32 %v4870_v23, %v4326_v11  ;;  %v7354_v10 = vadd.f32 %v4871_v24, %v4336_v52 }
 0x79f   :  { %v7352_v28 = vadd.f32 %v4871_v24, %v4335_v47 }
 0x7a1   :  { %v4346_v21 = vpack.c.bf16 %v7354_v10, %v7352_v28 }
 0x7a3   :  { %4488 = vmatmul.mubr.bf16.vlgmr.msra.gmra.mrb[148].mxu1 %v4346_v21 }
 0x876   :  { %v4489_v42 = vpop.f32.mrb[148].mxu1 }
 0x877   :  { %v4490_v54 = vadd.f32 %v4489_v42, %v4368_v7  ;;  %v4491_v59 = vpop.f32.mrb[149].mxu1 }
 0x878   :  { %v4492_v33 = vadd.f32 %v4491_v59, %v4372_v0  ;;  %v4493_v60 = vpop.f32.mrb[150].mxu1 }
 0x879   :  { %v4502_v5 = vmul.f32 0.70710677, %v4490_v54  ;;  %v4494_v51 = vadd.f32 %v4493_v60, %v4368_v7  ;;  %v4495_v25 = vpop.f32.mrb[151].mxu1  ;;  %v4498_v15 = vmul.f32 0.5, %v4490_v54 }
 0x87a   :  { %v4503_v62 = vmul.f32 0.70710677, %v4492_v33  ;;  %v4496_v35 = vadd.f32 %v4495_v25, %v4372_v0  ;;  %v4499_v9 = vmul.f32 0.5, %v4492_v33  ;;  %v4906_v0 = vld [vmem:[%s7403_s16] ss:$0 sm:$0xff] }
 0x87b   :  { %5870 = verf.f32 %v4502_v5  ;;  %v4504_v13 = vmul.f32 0.70710677, %v4494_v51  ;;  %v4500_v58 = vmul.f32 0.5, %v4494_v51 }
 0x87c   :  { %5872 = verf.f32 %v4503_v62  ;;  %v4505_v22 = vmul.f32 0.70710677, %v4496_v35  ;;  %v4501_v50 = vmul.f32 0.5, %v4496_v35 }
 0x87d   :  { %5874 = verf.f32 %v4504_v13 }
 0x87e   :  { %5876 = verf.f32 %v4505_v22 }
 0x885   :  { %v5871_v12 = vpop.eup %5870 }
 0x886   :  { %v5873_v36 = vpop.eup %5872  ;;  %v4510_v16 = vadd.f32 1.0, %v5871_v12 }
 0x887   :  { %v5875_v32 = vpop.eup %5874  ;;  %v4511_v53 = vadd.f32 1.0, %v5873_v36 }
 0x888   :  { %v5877_v43 = vpop.eup %5876  ;;  %v4512_v56 = vadd.f32 1.0, %v5875_v32  ;;  %v4514_v41 = vmul.f32 %v4510_v16, %v4498_v15 }
 0x889   :  { %v4513_v6 = vadd.f32 1.0, %v5877_v43  ;;  %v4515_v19 = vmul.f32 %v4511_v53, %v4499_v9 }
 0x88a   :  { %v4516_v38 = vmul.f32 %v4512_v56, %v4500_v58 }
 0x88b   :  { %v4517_v17 = vmul.f32 %v4513_v6, %v4501_v50 }
 0x88c   :  { %v4518_v49 = vpack.c.bf16 %v4516_v38, %v4514_v41 }
 0x88d   :  { %v4519_v45 = vpack.c.bf16 %v4517_v17, %v4515_v19 }
 0x88f   :  { %4687 = vmatprep.mubr.bf16.mxu0 %v4519_v45 }
 0x890   :  { %4688 = vmatmul.mubr.bf16.vlgmr.msra.gmra.mrb[124].mxu0 %v4518_v49 }
 0x963   :  { %v5093_v55 = vpop.f32.mrb[124].mxu0 }
 0x964   :  { %v5094_v26 = vpop.f32.mrb[125].mxu0 }
 0x965   :  { %v5095_v3 = vadd.f32 %v5094_v26, %v5093_v55  ;;  %v5096_v23 = vpop.f32.mrb[126].mxu0 }
 0x966   :  { %v5097_v20 = vpop.f32.mrb[127].mxu0 }
 0x967   :  { %v4690_v29 = vadd.f32 %v5095_v3, %v4888_v39  ;;  %v5098_v4 = vadd.f32 %v5097_v20, %v5096_v23 }
 0x969   :  { %v4693_v11 = vadd.f32 %v5098_v4, %v4888_v39  ;;  %v4696_v52 = vadd.f32 %v4690_v29, %v7352_v28 }
 0x96b   :  { %4698 = vadd.xlane.f32.xlu0 %v4696_v52  ;;  %v4697_v24 = vadd.f32 %v4693_v11, %v7354_v10  ;;  %v4704_v47 = vmul.f32 %v4696_v52, %v4696_v52 }
 0x96d   :  { %4700 = vadd.xlane.f32.xlu1 %v4697_v24  ;;  %v4705_v21 = vmul.f32 %v4697_v24, %v4697_v24 }
 0x96f   :  { %4706 = vadd.xlane.f32.xlu0 %v4704_v47 }
 0x971   :  { %4708 = vadd.xlane.f32.xlu1 %v4705_v21 }
 0x9f8   :  { %v4699_v40 = vpop.xlane.xlu0 %4698 }
 0x9f9   :  { %v4702_v14 = vmul.f32 0.0078125, %v4699_v40 }
 0x9fa   :  { %v4701_v63 = vpop.xlane.xlu1 %4700 }
 0x9fb   :  { %v4703_v48 = vmul.f32 0.0078125, %v4701_v63  ;;  %v4712_v27 = vmul.f32 %v4702_v14, %v4702_v14  ;;  %v4720_v30 = vsub.f32 %v4696_v52, %v4702_v14 }
 0x9fc   :  { %v4707_v44 = vpop.xlane.xlu0 %4706 }
 0x9fd   :  { %v4710_v2 = vmul.f32 0.0078125, %v4707_v44  ;;  %v4713_v1 = vmul.f32 %v4703_v48, %v4703_v48  ;;  %v4721_v57 = vsub.f32 %v4697_v24, %v4703_v48 }
 0x9fe   :  { %v4709_v61 = vpop.xlane.xlu1 %4708 }
 0x9ff   :  { %v4714_v37 = vsub.f32 %v4710_v2, %v4712_v27  ;;  %v4711_v18 = vmul.f32 0.0078125, %v4709_v61 }
 0xa01   :  { %v4716_v28 = vadd.f32 1e-12, %v4714_v37  ;;  %v4715_v8 = vsub.f32 %v4711_v18, %v4713_v1 }
 0xa03   :  { %5878 = vrsqrt.f32 %v4716_v28  ;;  %v4717_v10 = vadd.f32 1e-12, %v4715_v8 }
 0xa05   :  { %5880 = vrsqrt.f32 %v4717_v10 }
 0xa0d   :  { %v5879_v31 = vpop.eup %5878 }
 0xa0e   :  { %v4722_v46 = vmul.f32 %v5879_v31, %v4720_v30 }
 0xa0f   :  { %v5881_v7 = vpop.eup %5880 }
 0xa10   :  { %v4723_v42 = vmul.f32 %v5881_v7, %v4721_v57  ;;  %v4731_v54 = vmul.f32 %v4905_v34, %v4722_v46 }
 0xa12   :  { %v4732_v59 = vmul.f32 %v4905_v34, %v4723_v42  ;;  %v4740_v33 = vadd.f32 %v4906_v0, %v4731_v54 }
 0xa14   :  { %v4741_v60 = vadd.f32 %v4906_v0, %v4732_v59  ;;  %4742 = vst [vmem:[#allocation14] sm:$0xff] %v4740_v33 }
 0xa16   :  { %4743 = vst [vmem:[#allocation14 + $0x8] sm:$0xff] %v4741_v60 }
 0xa17   :  { %6049 = shalt.err (!%p6046_p4)
}
 0xa18   :  { %s7446_s16 = sld [smem:[#allocation35_spill]] }
 0xa1e   :  { %s6050_s11 = scalar_lea.hbm %s7446_s16, 256 }
 0xa1f   :  { %p6051_p5 = scmp.ne.s32.totalorder %s7446_s16, %s6050_s11  ;;  %p6054_p6 = scmp.lt.u32.totalorder %s6050_s11, %s7446_s16 }
 0xa21   :  { %p6056_p7 = pnand %p6054_p6, %p6051_p5 }
 0xa23   :  { %6059 = shalt.err (!%p6056_p7)
}
 0xa24   :  { %4755 = dma.vmem_to_hbm [thread:$0]  %s4750_s22, 256, %s7446_s16, [#allocation4], %s6076_s26, %s6076_s26, %s6077_s25  }
 0xa25   :  { %6068 = dma.done.wait [#allocation4], 256  }
 0xa26   :  { %6069 = vsyncadd [#allocation4], 4294967040 }
 0xa27   :  { %4759 = vsyncpa [#allocation3], 1 }
 0xa28   :  { %4760 = vsyncpa [#allocation6], 1 }
 0xa29   :  { %4761 = vsyncpa [#allocation9], 1 }
 0xa2a   :  { %4762 = vsyncpa [#allocation12], 1 }
 0xa2b   :  { %4763 = vsyncpa [#allocation4], 1 }

</bundles_post_ra>
